<compile_context>
chip_gen: v7x
topology: tpu7x:2x2x1
jax: 0.10.0
libtpu: 0.0.40
codegen_flags: <defaults>
</compile_context>

<pallas_src>
import functools

import jax
import jax.numpy as jnp
from jax import lax
from jax.experimental import pallas as pl
from jax.experimental.pallas import tpu as pltpu


# ---------------------------------------------------------------------------
# Pooling-matrix construction (wrapper-side, tiny)
# ---------------------------------------------------------------------------
def _pool_matrix(n_in, scale, pool_k):
    """(n_out, n_in) matrix equivalent to nearest-upsample(scale) + avgpool(pool_k)."""
    assert (n_in * scale) % pool_k == 0, "floor-mode AvgPool tail not supported here"
    n_out = (n_in * scale) // pool_k
    u = jnp.arange(n_in * scale)
    src = u // scale        # source row of each upsampled row
    blk = u // pool_k       # output row each upsampled row contributes to
    return jnp.zeros((n_out, n_in), jnp.float32).at[blk, src].add(1.0 / pool_k)


# ---------------------------------------------------------------------------
# Fused kernel: pooling matmul + image/text projections + cosine (per batch elem)
# ---------------------------------------------------------------------------
def _fused_clip_kernel(x_ref, kt_ref, wimg_ref, emb_ref, wtxt_ref, o_ref):
    C = x_ref.shape[1]
    D = wimg_ref.shape[2]

    # 1) Upsample(7, nearest) + AvgPool2d(k) as one lane-dense MXU matmul per image:
    #    (C, H*W) @ (H*W, Ho*Wo). Result stays in VMEM/vregs (never written to HBM).
    x = x_ref[0].astype(jnp.bfloat16)                              # (C, H*W)
    pooled = jnp.dot(x, kt_ref[...],
                     preferred_element_type=jnp.float32)           # (C, Ho*Wo) f32
    pooled = pooled.astype(jnp.bfloat16)

    # 2) Image projection: per-channel weight slabs (row order = torch (c,i,j)
    #    flatten), bf16 operands, f32 MXU accumulate. C is tiny and static.
    img_feat = jnp.zeros((1, D), jnp.float32)
    for c in range(C):
        img_feat = img_feat + jnp.dot(pooled[c:c + 1, :], wimg_ref[c],
                                      preferred_element_type=jnp.float32)   # (1, D)

    # 3) Both text projections in one stacked matmul: row 0 = source, row 1 = target.
    txt = jnp.dot(emb_ref[...], wtxt_ref[...],
                  preferred_element_type=jnp.float32)              # (2, D)
    src = txt[0:1, :]
    tgt = txt[1:2, :]

    # 4) Cosine via a 2x2 Gram matmul on the MXU: rows of m are a = img - src and
    #    b = tgt - src; G = m @ m.T gives aa, ab, bb without cross-lane reduce chains.
    m = jnp.concatenate([img_feat, tgt], axis=0) - src             # (2, D)
    g = lax.dot_general(m, m, (((1,), (1,)), ((), ())),
                        preferred_element_type=jnp.float32)        # (2, 2)
    aa = g[0:1, 0:1]
    ab = g[0:1, 1:2]
    bb = g[1:2, 1:2]
    # cos = ab / max(||a||*||b||, eps) with torch eps = 1e-8, via EUP rsqrt.
    cos = ab * lax.rsqrt(jnp.maximum(aa * bb, jnp.float32(1e-16)))  # (1, 1)

    # Lane-dense (8,128) store of this batch element's cosine; wrapper reads [b,0,0].
    o_ref[...] = jnp.broadcast_to(cos, o_ref.shape).astype(o_ref.dtype)


def fused_clip_loss(image, kt_bf16, w_img3, emb2, w_txt):
    B, C, H, W = image.shape
    HW = H * W
    F = kt_bf16.shape[1]          # Ho * Wo
    Dm = emb2.shape[1]
    D = w_txt.shape[1]

    x3 = image.reshape(B, C, HW)  # row-major, metadata-only reshape

    cos_tiles = pl.pallas_call(
        _fused_clip_kernel,
        out_shape=jax.ShapeDtypeStruct((B, 8, 128), jnp.float32),
        grid=(B,),
        in_specs=[
            pl.BlockSpec((1, C, HW), lambda b: (b, 0, 0)),     # image block (per b)
            pl.BlockSpec((HW, F), lambda b: (0, 0)),           # Kronecker pooling matrix
            pl.BlockSpec((C, F, D), lambda b: (0, 0, 0)),      # image-encoder weight
            pl.BlockSpec((2, Dm), lambda b: (0, 0)),           # stacked text embeddings
            pl.BlockSpec((Dm, D), lambda b: (0, 0)),           # text-encoder weight
        ],
        out_specs=pl.BlockSpec((1, 8, 128), lambda b: (b, 0, 0)),
        compiler_params=pltpu.CompilerParams(dimension_semantics=("parallel",)),
    )(x3, kt_bf16, w_img3, emb2, w_txt)

    # 1 - mean over the batch (tiny, done in the wrapper per review).
    return 1.0 - jnp.mean(cos_tiles[:, 0, 0])


# ---------------------------------------------------------------------------
# Full forward (mirrors CLIPLoss.forward)
# ---------------------------------------------------------------------------
@functools.partial(jax.jit, static_argnames=("pool_k",))
def clip_loss_forward(image, source_tokens, target_tokens, params, pool_k):
    B, C, H, W = image.shape
    scale = 7
    Ho = (H * scale) // pool_k
    Wo = (W * scale) // pool_k
    D = params["w_txt"].shape[1]

    # Separable pooling matrices folded into the Kronecker form (bf16-exact weights).
    ph = _pool_matrix(H, scale, pool_k)                     # (Ho, H)
    pw = _pool_matrix(W, scale, pool_k)                     # (Wo, W)
    kt = jnp.kron(ph, pw).T.astype(jnp.bfloat16)            # (H*W, Ho*Wo)

    # TODO(synk): clip.tokenize (string -> BPE token ids) has no Pallas equivalent;
    # token-id arrays are taken directly as inputs, embedding gather + mean is glue.
    tokens = jnp.concatenate([source_tokens, target_tokens], axis=0)    # (2, L)
    emb2 = jnp.take(params["emb"], tokens, axis=0).mean(axis=1)         # (2, Dm)

    # Per-channel view of the image-encoder weight (metadata-only reshape; row order
    # matches torch's pooled.reshape(B, -1) (c, i, j) flatten convention).
    w_img3 = params["w_img"].reshape(C, Ho * Wo, D)

    return fused_clip_loss(image, kt, w_img3, emb2, params["w_txt"])


if __name__ == "__main__":
    key = jax.random.PRNGKey(0)
    k_img, k_src, k_tgt, k_wimg, k_emb, k_wtxt = jax.random.split(key, 6)

    # Small, module-consistent shapes.
    B, C, H, W = 2, 3, 16, 16
    stylegan_size = 64                    # AvgPool2d kernel = 64 // 32 = 2
    pool_k = stylegan_size // 32
    Ho, Wo = (H * 7) // pool_k, (W * 7) // pool_k   # 56, 56
    D, Dm, V, L = 32, 32, 64, 8           # feat dim, token-emb dim, vocab, seq len

    image = jax.random.normal(k_img, (B, C, H, W), jnp.float32)
    source_tokens = jax.random.randint(k_src, (1, L), 0, V)
    target_tokens = jax.random.randint(k_tgt, (1, L), 0, V)

    # Deterministic synthetic stand-in parameters for the CLIP encoders.
    params = {
        # bf16 weight halves HBM/VMEM traffic of the projection; MXU accumulation
        # stays f32 (accepted precision tradeoff for the synthetic stand-in).
        "w_img": (jax.random.normal(k_wimg, (C * Ho * Wo, D), jnp.float32) * 0.02
                  ).astype(jnp.bfloat16),
        "emb":   jax.random.normal(k_emb, (V, Dm), jnp.float32) * 0.02,
        "w_txt": jax.random.normal(k_wtxt, (Dm, D), jnp.float32) * 0.02,
    }

    loss = clip_loss_forward(image, source_tokens, target_tokens, params, pool_k)
    loss = jax.block_until_ready(loss)
    assert loss.shape == () and bool(jnp.isfinite(loss))
    print("KERNEL_OK")
</pallas_src>

<mosaic_0001>
module attributes {stable_mosaic.version = 11 : i64} {
  func.func private @main(%arg0: i32) attributes {dimension_semantics = [#tpu.dimension_semantics<core_parallel>], iteration_bounds = array<i64: 2>, tpu.core_type = #tpu.core_type<sc_scalar_subcore>, window_params = []} {
    return
  }
}

module attributes {stable_mosaic.version = 11 : i64} {
  func.func private @main(%arg0: i32) attributes {dimension_semantics = [#tpu.dimension_semantics<core_parallel>], iteration_bounds = array<i64: 2>, tpu.core_type = #tpu.core_type<sc_scalar_subcore>, window_params = []} {
    return
  }
}

module attributes {stable_mosaic.version = 11 : i64} {
  func.func @_fused_clip_kernel(%arg0: i32, %arg1: memref<1x3x256xf32, #tpu.memory_space<vmem>>, %arg2: memref<256x3136xbf16, #tpu.memory_space<vmem>>, %arg3: memref<3x3136x32xbf16, #tpu.memory_space<vmem>>, %arg4: memref<2x32xf32, #tpu.memory_space<vmem>>, %arg5: memref<32x32xf32, #tpu.memory_space<vmem>>, %arg6: memref<1x8x128xf32, #tpu.memory_space<vmem>>) attributes {dimension_semantics = [#tpu.dimension_semantics<parallel>], iteration_bounds = array<i64: 2>, scalar_prefetch = 0 : i64, scratch_operands = 0 : i64, tpu.core_type = #tpu.core_type<tc>, window_params = [{transform_indices = @transform_0, window_bounds = array<i64: 1, 3, 256>}, {pipeline_mode = #tpu.pipeline_mode<synchronous>, transform_indices = @transform_1, window_bounds = array<i64: 256, 3136>}, {pipeline_mode = #tpu.pipeline_mode<synchronous>, transform_indices = @transform_2, window_bounds = array<i64: 3, 3136, 32>}, {pipeline_mode = #tpu.pipeline_mode<synchronous>, transform_indices = @transform_3, window_bounds = array<i64: 2, 32>}, {pipeline_mode = #tpu.pipeline_mode<synchronous>, transform_indices = @transform_4, window_bounds = array<i64: 32, 32>}, {transform_indices = @transform_5, window_bounds = array<i64: 1, 8, 128>}]} {
    %c0 = arith.constant 0 : index
    %c0_0 = arith.constant 0 : index
    %c0_1 = arith.constant 0 : index
    %0 = vector.load %arg1[%c0, %c0_0, %c0_1] : memref<1x3x256xf32, #tpu.memory_space<vmem>>, vector<1x3x256xf32>
    %1 = vector.shape_cast %0 : vector<1x3x256xf32> to vector<3x256xf32>
    %2 = arith.truncf %1 : vector<3x256xf32> to vector<3x256xbf16>
    %c0_2 = arith.constant 0 : index
    %c0_3 = arith.constant 0 : index
    %3 = vector.load %arg2[%c0_2, %c0_3] : memref<256x3136xbf16, #tpu.memory_space<vmem>>, vector<256x3136xbf16>
    %cst = arith.constant dense<0.000000e+00> : vector<3x3136xf32>
    %4 = tpu.matmul %2, %3, %cst {dimension_numbers = #tpu.dot_dimension_numbers<[1], [0], [0], [1], [0, 0, 1, 1], [], []>} : vector<3x256xbf16>, vector<256x3136xbf16>, vector<3x3136xf32> -> vector<3x3136xf32>
    %5 = arith.truncf %4 : vector<3x3136xf32> to vector<3x3136xbf16>
    %cst_4 = arith.constant 0.000000e+00 : f32
    %6 = vector.broadcast %cst_4 : f32 to vector<1x32xf32>
    %7 = vector.extract_strided_slice %5 {offsets = [0, 0], sizes = [1, 3136], strides = [1, 1]} : vector<3x3136xbf16> to vector<1x3136xbf16>
    %c0_5 = arith.constant 0 : index
    %c0_6 = arith.constant 0 : index
    %c0_7 = arith.constant 0 : index
    %8 = vector.load %arg3[%c0_5, %c0_6, %c0_7] : memref<3x3136x32xbf16, #tpu.memory_space<vmem>>, vector<1x3136x32xbf16>
    %9 = vector.shape_cast %8 : vector<1x3136x32xbf16> to vector<3136x32xbf16>
    %cst_8 = arith.constant dense<0.000000e+00> : vector<1x32xf32>
    %10 = tpu.matmul %7, %9, %cst_8 {dimension_numbers = #tpu.dot_dimension_numbers<[1], [0], [0], [1], [0, 0, 1, 1], [], []>} : vector<1x3136xbf16>, vector<3136x32xbf16>, vector<1x32xf32> -> vector<1x32xf32>
    %11 = arith.addf %6, %10 : vector<1x32xf32>
    %12 = vector.extract_strided_slice %5 {offsets = [1, 0], sizes = [1, 3136], strides = [1, 1]} : vector<3x3136xbf16> to vector<1x3136xbf16>
    %c1 = arith.constant 1 : index
    %c0_9 = arith.constant 0 : index
    %c0_10 = arith.constant 0 : index
    %13 = vector.load %arg3[%c1, %c0_9, %c0_10] : memref<3x3136x32xbf16, #tpu.memory_space<vmem>>, vector<1x3136x32xbf16>
    %14 = vector.shape_cast %13 : vector<1x3136x32xbf16> to vector<3136x32xbf16>
    %cst_11 = arith.constant dense<0.000000e+00> : vector<1x32xf32>
    %15 = tpu.matmul %12, %14, %cst_11 {dimension_numbers = #tpu.dot_dimension_numbers<[1], [0], [0], [1], [0, 0, 1, 1], [], []>} : vector<1x3136xbf16>, vector<3136x32xbf16>, vector<1x32xf32> -> vector<1x32xf32>
    %16 = arith.addf %11, %15 : vector<1x32xf32>
    %17 = vector.extract_strided_slice %5 {offsets = [2, 0], sizes = [1, 3136], strides = [1, 1]} : vector<3x3136xbf16> to vector<1x3136xbf16>
    %c2 = arith.constant 2 : index
    %c0_12 = arith.constant 0 : index
    %c0_13 = arith.constant 0 : index
    %18 = vector.load %arg3[%c2, %c0_12, %c0_13] : memref<3x3136x32xbf16, #tpu.memory_space<vmem>>, vector<1x3136x32xbf16>
    %19 = vector.shape_cast %18 : vector<1x3136x32xbf16> to vector<3136x32xbf16>
    %cst_14 = arith.constant dense<0.000000e+00> : vector<1x32xf32>
    %20 = tpu.matmul %17, %19, %cst_14 {dimension_numbers = #tpu.dot_dimension_numbers<[1], [0], [0], [1], [0, 0, 1, 1], [], []>} : vector<1x3136xbf16>, vector<3136x32xbf16>, vector<1x32xf32> -> vector<1x32xf32>
    %21 = arith.addf %16, %20 : vector<1x32xf32>
    %c0_15 = arith.constant 0 : index
    %c0_16 = arith.constant 0 : index
    %22 = vector.load %arg4[%c0_15, %c0_16] : memref<2x32xf32, #tpu.memory_space<vmem>>, vector<2x32xf32>
    %c0_17 = arith.constant 0 : index
    %c0_18 = arith.constant 0 : index
    %23 = vector.load %arg5[%c0_17, %c0_18] : memref<32x32xf32, #tpu.memory_space<vmem>>, vector<32x32xf32>
    %cst_19 = arith.constant dense<0.000000e+00> : vector<2x32xf32>
    %24 = tpu.matmul %22, %23, %cst_19 {dimension_numbers = #tpu.dot_dimension_numbers<[1], [0], [0], [1], [0, 0, 1, 1], [], []>} : vector<2x32xf32>, vector<32x32xf32>, vector<2x32xf32> -> vector<2x32xf32>
    %25 = vector.extract_strided_slice %24 {offsets = [0, 0], sizes = [1, 32], strides = [1, 1]} : vector<2x32xf32> to vector<1x32xf32>
    %26 = vector.extract_strided_slice %24 {offsets = [1, 0], sizes = [1, 32], strides = [1, 1]} : vector<2x32xf32> to vector<1x32xf32>
    %27 = tpu.concatenate %21, %26 in 0 : vector<1x32xf32>, vector<1x32xf32> -> vector<2x32xf32>
    %28 = vector.broadcast %25 : vector<1x32xf32> to vector<2x32xf32>
    %29 = arith.subf %27, %28 : vector<2x32xf32>
    %cst_20 = arith.constant dense<0.000000e+00> : vector<2x2xf32>
    %30 = tpu.matmul %29, %29, %cst_20 {dimension_numbers = #tpu.dot_dimension_numbers<[1], [1], [0], [0], [0, 0, 1, 0], [], []>} : vector<2x32xf32>, vector<2x32xf32>, vector<2x2xf32> -> vector<2x2xf32>
    %31 = vector.extract_strided_slice %30 {offsets = [0, 0], sizes = [1, 1], strides = [1, 1]} : vector<2x2xf32> to vector<1x1xf32>
    %32 = vector.extract_strided_slice %30 {offsets = [0, 1], sizes = [1, 1], strides = [1, 1]} : vector<2x2xf32> to vector<1x1xf32>
    %33 = vector.extract_strided_slice %30 {offsets = [1, 1], sizes = [1, 1], strides = [1, 1]} : vector<2x2xf32> to vector<1x1xf32>
    %34 = arith.mulf %31, %33 : vector<1x1xf32>
    %cst_21 = arith.constant 1.000000e-16 : f32
    %35 = vector.broadcast %cst_21 : f32 to vector<1x1xf32>
    %36 = arith.maximumf %34, %35 : vector<1x1xf32>
    %37 = math.rsqrt %36 : vector<1x1xf32>
    %38 = arith.mulf %32, %37 : vector<1x1xf32>
    %39 = vector.shape_cast %38 : vector<1x1xf32> to vector<1x1x1xf32>
    %40 = vector.broadcast %39 : vector<1x1x1xf32> to vector<1x8x128xf32>
    %c0_22 = arith.constant 0 : index
    %c0_23 = arith.constant 0 : index
    %c0_24 = arith.constant 0 : index
    %41 = vector.load %arg6[%c0_22, %c0_23, %c0_24] : memref<1x8x128xf32, #tpu.memory_space<vmem>>, vector<1x8x128xf32>
    tpu.vector_store %arg6[%c0_22, %c0_23, %c0_24], %40 {strides = array<i32>} : memref<1x8x128xf32, #tpu.memory_space<vmem>>, vector<1x8x128xf32>,
    return
  }
  func.func @transform_0(%arg0: i32) -> (i32, i32, i32) {
    %c0_i32 = arith.constant 0 : i32
    %c0_i32_0 = arith.constant 0 : i32
    %c0_i32_1 = arith.constant 0 : i32
    return %arg0, %c0_i32, %c0_i32_0 : i32, i32, i32
  }
  func.func @transform_1(%arg0: i32) -> (i32, i32) {
    %c0_i32 = arith.constant 0 : i32
    %c0_i32_0 = arith.constant 0 : i32
    %c0_i32_1 = arith.constant 0 : i32
    return %c0_i32, %c0_i32_0 : i32, i32
  }
  func.func @transform_2(%arg0: i32) -> (i32, i32, i32) {
    %c0_i32 = arith.constant 0 : i32
    %c0_i32_0 = arith.constant 0 : i32
    %c0_i32_1 = arith.constant 0 : i32
    %c0_i32_2 = arith.constant 0 : i32
    return %c0_i32, %c0_i32_0, %c0_i32_1 : i32, i32, i32
  }
  func.func @transform_3(%arg0: i32) -> (i32, i32) {
    %c0_i32 = arith.constant 0 : i32
    %c0_i32_0 = arith.constant 0 : i32
    %c0_i32_1 = arith.constant 0 : i32
    return %c0_i32, %c0_i32_0 : i32, i32
  }
  func.func @transform_4(%arg0: i32) -> (i32, i32) {
    %c0_i32 = arith.constant 0 : i32
    %c0_i32_0 = arith.constant 0 : i32
    %c0_i32_1 = arith.constant 0 : i32
    return %c0_i32, %c0_i32_0 : i32, i32
  }
  func.func @transform_5(%arg0: i32) -> (i32, i32, i32) {
    %c0_i32 = arith.constant 0 : i32
    %c0_i32_0 = arith.constant 0 : i32
    %c0_i32_1 = arith.constant 0 : i32
    return %arg0, %c0_i32, %c0_i32_0 : i32, i32, i32
  }
}

</mosaic_0001>

<bundles_post_ra>
// kernel: clip_loss_forward.1
= control target key start
LH: loop header
LB: loop body
LE: loop exit
PB: predicated region body
PF: predicated region fallthrough
CT: control target
= control target key end

     0   :  { %s13846_s18 = smov 0   ;;  %s17149_s0 = inlined_call_operand.vmem [shape: f32[2,3,256], index: 0, kind: input, shape index: {}]   ;;  %s17150_s1 = inlined_call_operand.vmem [shape: bf16[256,3136], index: 1, kind: input, shape index: {}]   ;;  %s17151_s2 = inlined_call_operand.vmem [shape: bf16[3,3136,32], index: 2, kind: input, shape index: {}]   ;;  %s17152_s3 = inlined_call_operand.vmem [shape: f32[2,32], index: 3, kind: input, shape index: {}]   ;;  %s17153_s4 = inlined_call_operand.vmem [shape: f32[32,32], index: 4, kind: input, shape index: {}]   ;;  %s17154_s5 = inlined_call_operand.vmem [shape: f32[2,8,128], index: 5, kind: output, shape index: {}]  }
   0x1 LB: > { %s9900_s19 = sadd.s32 4294967295, %s13809_s18   ;;  %p9904_p0 = scmp.ge.s32.totalorder %s13809_s18, 1  ;;  %s13809_s18 = sphi %s13846_s18, %s15_s18  }
   0x2   : > { %p187_p1 = scmp.lt.s32.totalorder %s13809_s18, 3 }
   0x4   : > { %p188_p2 = pnand %p9904_p0, %p187_p1 }
   0x5   : > { %v12620_v0 = vld [vmem:[%s17150_s1 + $0x4] ss:$100 sps:$4 sm:$0xff] (!%p188_p2)   ;;  %v12622_v1 = vld [vmem:[%s17150_s1 + $0xc] ss:$100 sps:$4 sm:$0xff] (!%p188_p2)   ;;  %v12628_v5 = vld [vmem:[%s17150_s1 + $0xd4] ss:$100 sps:$4 sm:$0xff] (!%p188_p2)  }
   0x6   : > { %191 = sbr.rel (%p188_p2) target bundleno = 1905 (0x771), region = 40  ;;  %2662 = vmatprep.subr.bf16.mxu0 (!%p188_p2), %v12620_v0  ;;  %v12624_v2 = vld [vmem:[%s17150_s1] ss:$100 sps:$4 sm:$0xff] (!%p188_p2)   ;;  %v12625_v3 = vld [vmem:[%s17150_s1 + $0x8] ss:$100 sps:$4 sm:$0xff] (!%p188_p2)   ;;  %2703 = vmatprep.subr.bf16.mxu1 (!%p188_p2), %v12622_v1  ;;  %p214_p3 = scmp.lt.s32.totalorder (!%p188_p2), %s9900_s19, 1 }
   0x7   : > { %v12626_v4 = vld [vmem:[%s17150_s1 + $0xcc] ss:$100 sps:$4 sm:$0xff] (!%p188_p2)   ;;  %2663 = vmatpush1.bf16.msra.mxu0 (!%p188_p2), %v12624_v2  ;;  %2704 = vmatpush1.bf16.msra.mxu1 (!%p188_p2), %v12625_v3  ;;  %v12632_v8 = vld [vmem:[%s17150_s1 + $0x194] ss:$100 sps:$4 sm:$0xff] (!%p188_p2)   ;;  %v12634_v9 = vld [vmem:[%s17150_s1 + $0x19c] ss:$100 sps:$4 sm:$0xff] (!%p188_p2)  }
   0x8   : > { %v12630_v6 = vld [vmem:[%s17150_s1 + $0xc8] ss:$100 sps:$4 sm:$0xff] (!%p188_p2)   ;;  %2664 = vmatprep.subr.bf16.mxu0 (!%p188_p2), %v12626_v4  ;;  %v12631_v7 = vld [vmem:[%s17150_s1 + $0xd0] ss:$100 sps:$4 sm:$0xff] (!%p188_p2)   ;;  %2705 = vmatprep.subr.bf16.mxu1 (!%p188_p2), %v12628_v5  ;;  %v12637_v11 = vld [vmem:[%s17150_s1 + $0x198] ss:$100 sps:$4 sm:$0xff] (!%p188_p2)  }
   0x9   : > { %v12636_v10 = vld [vmem:[%s17150_s1 + $0x190] ss:$100 sps:$4 sm:$0xff] (!%p188_p2)   ;;  %v12638_v12 = vld [vmem:[%s17150_s1 + $0x25c] ss:$100 sps:$4 sm:$0xff] (!%p188_p2)   ;;  %v12640_v13 = vld [vmem:[%s17150_s1 + $0x264] ss:$100 sps:$4 sm:$0xff] (!%p188_p2)  }
   0xa   : > { %v12642_v14 = vld [vmem:[%s17150_s1 + $0x258] ss:$100 sps:$4 sm:$0xff] (!%p188_p2)   ;;  %v12643_v15 = vld [vmem:[%s17150_s1 + $0x260] ss:$100 sps:$4 sm:$0xff] (!%p188_p2)   ;;  %v12646_v17 = vld [vmem:[%s17150_s1 + $0x32c] ss:$100 sps:$4 sm:$0xff] (!%p188_p2)  }
   0xb   : > { %2665 = vmatpush1.bf16.msra.mxu0 (!%p188_p2), %v12630_v6  ;;  %2706 = vmatpush1.bf16.msra.mxu1 (!%p188_p2), %v12631_v7  ;;  %v12644_v16 = vld [vmem:[%s17150_s1 + $0x324] ss:$100 sps:$4 sm:$0xff] (!%p188_p2)   ;;  %v12650_v20 = vld [vmem:[%s17150_s1 + $0x3ec] ss:$100 sps:$4 sm:$0xff] (!%p188_p2)   ;;  %v12652_v21 = vld [vmem:[%s17150_s1 + $0x3f4] ss:$100 sps:$4 sm:$0xff] (!%p188_p2)  }
   0xc   : > { %2666 = vmatprep.subr.bf16.mxu0 (!%p188_p2), %v12632_v8  ;;  %2707 = vmatprep.subr.bf16.mxu1 (!%p188_p2), %v12634_v9  ;;  %v12648_v18 = vld [vmem:[%s17150_s1 + $0x320] ss:$100 sps:$4 sm:$0xff] (!%p188_p2)   ;;  %v12649_v19 = vld [vmem:[%s17150_s1 + $0x328] ss:$100 sps:$4 sm:$0xff] (!%p188_p2)   ;;  %v12655_v23 = vld [vmem:[%s17150_s1 + $0x3f0] ss:$100 sps:$4 sm:$0xff] (!%p188_p2)  }
   0xd   : > { %v12654_v22 = vld [vmem:[%s17150_s1 + $0x3e8] ss:$100 sps:$4 sm:$0xff]   ;;  %v12656_v24 = vld [vmem:[%s17150_s1 + $0x4b4] ss:$100 sps:$4 sm:$0xff]   ;;  %v12658_v25 = vld [vmem:[%s17150_s1 + $0x4bc] ss:$100 sps:$4 sm:$0xff]  }
   0xe   : > { %v12660_v26 = vld [vmem:[%s17150_s1 + $0x4b0] ss:$100 sps:$4 sm:$0xff]   ;;  %v12661_v27 = vld [vmem:[%s17150_s1 + $0x4b8] ss:$100 sps:$4 sm:$0xff]   ;;  %v12664_v29 = vld [vmem:[%s17150_s1 + $0x584] ss:$100 sps:$4 sm:$0xff]  }
   0xf   : > { %2667 = vmatpush1.bf16.msra.mxu0 %v12636_v10  ;;  %2708 = vmatpush1.bf16.msra.mxu1 %v12637_v11  ;;  %v12662_v28 = vld [vmem:[%s17150_s1 + $0x57c] ss:$100 sps:$4 sm:$0xff]   ;;  %v12668_v32 = vld [vmem:[%s17150_s1 + $0x644] ss:$100 sps:$4 sm:$0xff]   ;;  %v12670_v33 = vld [vmem:[%s17150_s1 + $0x64c] ss:$100 sps:$4 sm:$0xff]  }
  0x10   : > { %2668 = vmatprep.subr.bf16.mxu0 %v12638_v12  ;;  %2709 = vmatprep.subr.bf16.mxu1 %v12640_v13  ;;  %v12666_v30 = vld [vmem:[%s17150_s1 + $0x578] ss:$100 sps:$4 sm:$0xff]   ;;  %v12667_v31 = vld [vmem:[%s17150_s1 + $0x580] ss:$100 sps:$4 sm:$0xff]   ;;  %v12673_v35 = vld [vmem:[%s17150_s1 + $0x648] ss:$100 sps:$4 sm:$0xff]  }
  0x11   : > { %v12672_v34 = vld [vmem:[%s17150_s1 + $0x640] ss:$100 sps:$4 sm:$0xff]   ;;  %v12674_v36 = vld [vmem:[%s17150_s1 + $0x70c] ss:$100 sps:$4 sm:$0xff]   ;;  %s17156_s19 = smov (!%p214_p3, %s9900_s19), 1  ;;  %vm13812_vm0 = vmmov 0  }
  0x12   : > { %v12676_v37 = vld [vmem:[%s17150_s1 + $0x714] ss:$100 sps:$4 sm:$0xff]   ;;  %v12678_v38 = vld [vmem:[%s17150_s1 + $0x708] ss:$100 sps:$4 sm:$0xff]   ;;  %s11688_s8 = sshll.u32 %s17156_s19, 3  ;;  %vm5279_vm1 = vcmask 523264  }
  0x13   : > { %2669 = vmatpush1.bf16.msra.mxu0 %v12642_v14  ;;  %2710 = vmatpush1.bf16.msra.mxu1 %v12643_v15  ;;  %v12679_v39 = vld [vmem:[%s17150_s1 + $0x710] ss:$100 sps:$4 sm:$0xff]   ;;  %v12682_v41 = vld [vmem:[%s17150_s1 + $0x7dc] ss:$100 sps:$4 sm:$0xff]   ;;  %s218_s17 = scalar_lea.vmem %s17149_s0, %s11688_s8  ;;  %v12688_v45 = vld [vmem:[%s17150_s1 + $0x8a4] ss:$100 sps:$4 sm:$0xff]   ;;  %s222_s30 = scalar_lea.vmem %s17154_s5, %s11688_s8 }
  0x14   : > { %2670 = vmatprep.subr.bf16.mxu0 %v12644_v16  ;;  %2711 = vmatprep.subr.bf16.mxu1 %v12646_v17  ;;  %v12680_v40 = vld [vmem:[%s17150_s1 + $0x7d4] ss:$100 sps:$4 sm:$0xff]   ;;  %v12686_v44 = vld [vmem:[%s17150_s1 + $0x89c] ss:$100 sps:$4 sm:$0xff]   ;;  %v12692_v50 = vld [vmem:[%s17150_s1 + $0x964] ss:$100 sps:$4 sm:$0xff]  }
  0x15   : > { %v12684_v42 = vld [vmem:[%s17150_s1 + $0x7d0] ss:$100 sps:$4 sm:$0xff]   ;;  %v12685_v43 = vld [vmem:[%s17150_s1 + $0x7d8] ss:$100 sps:$4 sm:$0xff]   ;;  %v224_v46 = vld [vmem:[%s218_s17] sm:$0x77] }
  0x16   : > { %v12690_v47 = vld [vmem:[%s17150_s1 + $0x898] ss:$100 sps:$4 sm:$0xff]   ;;  %v226_v48 = vcombine.high %v224_v46, %v224_v46  ;;  %v12691_v49 = vld [vmem:[%s17150_s1 + $0x8a0] ss:$100 sps:$4 sm:$0xff]   ;;  %v12694_v51 = vld [vmem:[%s17150_s1 + $0x96c] ss:$100 sps:$4 sm:$0xff]   ;;  %v14068_v5 = vpack.c.bf16 %v224_v46, %v224_v46 }
  0x17   : > { %2671 = vmatpush1.bf16.msra.mxu0 %v12648_v18  ;;  %2712 = vmatpush1.bf16.msra.mxu1 %v12649_v19  ;;  %v12696_v53 = vld [vmem:[%s17150_s1 + $0x960] ss:$100 sps:$4 sm:$0xff]   ;;  %v12697_v54 = vld [vmem:[%s17150_s1 + $0x968] ss:$100 sps:$4 sm:$0xff]   ;;  %v12700_v56 = vld [vmem:[%s17150_s1 + $0xa34] ss:$100 sps:$4 sm:$0xff]  }
  0x18   : > { %2672 = vmatprep.subr.bf16.mxu0 %v12650_v20  ;;  %2713 = vmatprep.subr.bf16.mxu1 %v12652_v21  ;;  %v14016_v52 = vpack.c.bf16 %v226_v48, %v226_v48  ;;  %v12698_v55 = vld [vmem:[%s17150_s1 + $0xa2c] ss:$100 sps:$4 sm:$0xff]   ;;  %v12704_v59 = vld [vmem:[%s17150_s1 + $0xaf4] ss:$100 sps:$4 sm:$0xff]   ;;  %v12706_v60 = vld [vmem:[%s17150_s1 + $0xafc] ss:$100 sps:$4 sm:$0xff]  }
  0x19   : > { %v12702_v57 = vld [vmem:[%s17150_s1 + $0xa28] ss:$100 sps:$4 sm:$0xff]   ;;  %v12703_v58 = vld [vmem:[%s17150_s1 + $0xa30] ss:$100 sps:$4 sm:$0xff]   ;;  %v12709_v62 = vld [vmem:[%s17150_s1 + $0xaf8] ss:$100 sps:$4 sm:$0xff]  }
  0x1a   : > { %2694 = vmatprep.mubr.bf16.mxu0 %v14016_v52  ;;  %2735 = vmatprep.mubr.bf16.mxu1 %v14016_v52  ;;  %v12708_v61 = vld [vmem:[%s17150_s1 + $0xaf0] ss:$100 sps:$4 sm:$0xff]   ;;  %v12710_v63 = vld [vmem:[%s17150_s1 + $0xbbc] ss:$100 sps:$4 sm:$0xff]   ;;  %v12712_v0 = vld [vmem:[%s17150_s1 + $0xbc4] ss:$100 sps:$4 sm:$0xff]  }
  0x1b   : > { %2673 = vmatpush1.bf16.msra.mxu0 %v12654_v22  ;;  %2714 = vmatpush1.bf16.msra.mxu1 %v12655_v23  ;;  %v12714_v1 = vld [vmem:[%s17150_s1 + $0xbb8] ss:$100 sps:$4 sm:$0xff]   ;;  %v12715_v2 = vld [vmem:[%s17150_s1 + $0xbc0] ss:$100 sps:$4 sm:$0xff]   ;;  %v12717_v6 = vld [vmem:[%s17150_s1 + $0x10] ss:$100 sps:$4 sm:$0xff]  }
  0x1c   : > { %2674 = vmatprep.subr.bf16.mxu0 %v12656_v24  ;;  %2715 = vmatprep.subr.bf16.mxu1 %v12658_v25  ;;  %v12719_v3 = vld [vmem:[%s17150_s1 + $0x14] ss:$100 sps:$4 sm:$0xff]   ;;  %v12722_v4 = vld [vmem:[%s17150_s1 + $0x1c] ss:$100 sps:$4 sm:$0xff]   ;;  %v12728_v9 = vld [vmem:[%s17150_s1 + $0xe4] ss:$100 sps:$4 sm:$0xff]  }
  0x1d   : > { %v12720_v7 = vld [vmem:[%s17150_s1 + $0x18] ss:$100 sps:$4 sm:$0xff]   ;;  %v12726_v11 = vld [vmem:[%s17150_s1 + $0xe0] ss:$100 sps:$4 sm:$0xff]   ;;  %v12734_v13 = vld [vmem:[%s17150_s1 + $0x1ac] ss:$100 sps:$4 sm:$0xff]  }
  0x1e   : > { %v12725_v8 = vld [vmem:[%s17150_s1 + $0xdc] ss:$100 sps:$4 sm:$0xff]   ;;  %v12731_v12 = vld [vmem:[%s17150_s1 + $0x1a4] ss:$100 sps:$4 sm:$0xff]   ;;  %v12737_v16 = vld [vmem:[%s17150_s1 + $0x26c] ss:$100 sps:$4 sm:$0xff]  }
  0x1f   : > { %2675 = vmatpush1.bf16.msra.mxu0 %v12660_v26  ;;  %2716 = vmatpush1.bf16.msra.mxu1 %v12661_v27  ;;  %v12723_v10 = vld [vmem:[%s17150_s1 + $0xd8] ss:$100 sps:$4 sm:$0xff]   ;;  %v12729_v14 = vld [vmem:[%s17150_s1 + $0x1a0] ss:$100 sps:$4 sm:$0xff]   ;;  %v12732_v15 = vld [vmem:[%s17150_s1 + $0x1a8] ss:$100 sps:$4 sm:$0xff]  }
  0x20   : > { %2676 = vmatprep.subr.bf16.mxu0 %v12662_v28  ;;  %2717 = vmatprep.subr.bf16.mxu1 %v12664_v29  ;;  %v12740_v17 = vld [vmem:[%s17150_s1 + $0x274] ss:$100 sps:$4 sm:$0xff]   ;;  %v12735_v18 = vld [vmem:[%s17150_s1 + $0x268] ss:$100 sps:$4 sm:$0xff]   ;;  %v12746_v21 = vld [vmem:[%s17150_s1 + $0x33c] ss:$100 sps:$4 sm:$0xff]  }
  0x21   : > { %v12738_v19 = vld [vmem:[%s17150_s1 + $0x270] ss:$100 sps:$4 sm:$0xff]   ;;  %v12744_v23 = vld [vmem:[%s17150_s1 + $0x338] ss:$100 sps:$4 sm:$0xff]   ;;  %v12752_v25 = vld [vmem:[%s17150_s1 + $0x404] ss:$100 sps:$4 sm:$0xff]  }
  0x22   : > { %v12743_v20 = vld [vmem:[%s17150_s1 + $0x334] ss:$100 sps:$4 sm:$0xff]   ;;  %v12749_v24 = vld [vmem:[%s17150_s1 + $0x3fc] ss:$100 sps:$4 sm:$0xff]   ;;  %v12755_v28 = vld [vmem:[%s17150_s1 + $0x4c4] ss:$100 sps:$4 sm:$0xff]  }
  0x23   : > { %2677 = vmatpush1.bf16.msra.mxu0 %v12666_v30  ;;  %2718 = vmatpush1.bf16.msra.mxu1 %v12667_v31  ;;  %v12741_v22 = vld [vmem:[%s17150_s1 + $0x330] ss:$100 sps:$4 sm:$0xff]   ;;  %v12747_v26 = vld [vmem:[%s17150_s1 + $0x3f8] ss:$100 sps:$4 sm:$0xff]   ;;  %v12750_v27 = vld [vmem:[%s17150_s1 + $0x400] ss:$100 sps:$4 sm:$0xff]  }
  0x24   : > { %2678 = vmatprep.subr.bf16.mxu0 %v12668_v32  ;;  %2719 = vmatprep.subr.bf16.mxu1 %v12670_v33  ;;  %v12758_v29 = vld [vmem:[%s17150_s1 + $0x4cc] ss:$100 sps:$4 sm:$0xff]   ;;  %v12753_v30 = vld [vmem:[%s17150_s1 + $0x4c0] ss:$100 sps:$4 sm:$0xff]   ;;  %v12764_v33 = vld [vmem:[%s17150_s1 + $0x594] ss:$100 sps:$4 sm:$0xff]  }
  0x25   : > { %v12756_v31 = vld [vmem:[%s17150_s1 + $0x4c8] ss:$100 sps:$4 sm:$0xff]   ;;  %v12777_v46 = vld [vmem:[%s17150_s1 + $0x7e0] ss:$100 sps:$4 sm:$0xff]   ;;  %vm9673_vm2 = vcmask 261120   ;;  %vm9747_vm3 = vcmask 1040384  }
  0x26   : > { %v12761_v32 = vld [vmem:[%s17150_s1 + $0x58c] ss:$100 sps:$4 sm:$0xff]   ;;  %s13814_s26 = smov 127   ;;  %s13815_s27 = smov 1  }
  0x27   : > { %2679 = vmatpush1.bf16.msra.mxu0 %v12672_v34  ;;  %2720 = vmatpush1.bf16.msra.mxu1 %v12673_v35  ;;  %v12759_v34 = vld [vmem:[%s17150_s1 + $0x588] ss:$100 sps:$4 sm:$0xff]   ;;  %v12762_v35 = vld [vmem:[%s17150_s1 + $0x590] ss:$100 sps:$4 sm:$0xff]  }
  0x28   : > { %2680 = vmatprep.subr.bf16.mxu0 %v12674_v36  ;;  %2721 = vmatprep.subr.bf16.mxu1 %v12676_v37  ;;  %v12767_v36 = vld [vmem:[%s17150_s1 + $0x654] ss:$100 sps:$4 sm:$0xff]   ;;  %v12770_v37 = vld [vmem:[%s17150_s1 + $0x65c] ss:$100 sps:$4 sm:$0xff]   ;;  %v12785_v48 = vld [vmem:[%s17150_s1 + $0x8ac] ss:$100 sps:$4 sm:$0xff]  }
  0x2b   : > { %2681 = vmatpush1.bf16.msra.mxu0 %v12678_v38  ;;  %2722 = vmatpush1.bf16.msra.mxu1 %v12679_v39  ;;  %v12765_v38 = vld [vmem:[%s17150_s1 + $0x650] ss:$100 sps:$4 sm:$0xff]   ;;  %v12768_v39 = vld [vmem:[%s17150_s1 + $0x658] ss:$100 sps:$4 sm:$0xff]  }
  0x2c   : > { %2682 = vmatprep.subr.bf16.mxu0 %v12680_v40  ;;  %2723 = vmatprep.subr.bf16.mxu1 %v12682_v41  ;;  %v12773_v40 = vld [vmem:[%s17150_s1 + $0x71c] ss:$100 sps:$4 sm:$0xff]   ;;  %v12776_v41 = vld [vmem:[%s17150_s1 + $0x724] ss:$100 sps:$4 sm:$0xff]  }
  0x2f   : > { %2683 = vmatpush1.bf16.msra.mxu0 %v12684_v42  ;;  %2724 = vmatpush1.bf16.msra.mxu1 %v12685_v43  ;;  %v12771_v42 = vld [vmem:[%s17150_s1 + $0x718] ss:$100 sps:$4 sm:$0xff]   ;;  %v12774_v43 = vld [vmem:[%s17150_s1 + $0x720] ss:$100 sps:$4 sm:$0xff]  }
  0x30   : > { %2684 = vmatprep.subr.bf16.mxu0 %v12686_v44  ;;  %2725 = vmatprep.subr.bf16.mxu1 %v12688_v45  ;;  %v12779_v44 = vld [vmem:[%s17150_s1 + $0x7e4] ss:$100 sps:$4 sm:$0xff]   ;;  %v12782_v45 = vld [vmem:[%s17150_s1 + $0x7ec] ss:$100 sps:$4 sm:$0xff]  }
  0x33   : > { %2685 = vmatpush1.bf16.msra.mxu0 %v12690_v47  ;;  %2726 = vmatpush1.bf16.msra.mxu1 %v12691_v49  ;;  %v12780_v47 = vld [vmem:[%s17150_s1 + $0x7e8] ss:$100 sps:$4 sm:$0xff]   ;;  %v12788_v49 = vld [vmem:[%s17150_s1 + $0x8b4] ss:$100 sps:$4 sm:$0xff]  }
  0x34   : > { %2686 = vmatprep.subr.bf16.mxu0 %v12692_v50  ;;  %2727 = vmatprep.subr.bf16.mxu1 %v12694_v51  ;;  %v12783_v50 = vld [vmem:[%s17150_s1 + $0x8a8] ss:$100 sps:$4 sm:$0xff]   ;;  %v12786_v51 = vld [vmem:[%s17150_s1 + $0x8b0] ss:$100 sps:$4 sm:$0xff]  }
  0x37   : > { %2687 = vmatpush1.bf16.msra.mxu0 %v12696_v53  ;;  %2728 = vmatpush1.bf16.msra.mxu1 %v12697_v54  ;;  %v12791_v53 = vld [vmem:[%s17150_s1 + $0x974] ss:$100 sps:$4 sm:$0xff]   ;;  %v12794_v54 = vld [vmem:[%s17150_s1 + $0x97c] ss:$100 sps:$4 sm:$0xff]  }
  0x38   : > { %2688 = vmatprep.subr.bf16.mxu0 %v12698_v55  ;;  %2729 = vmatprep.subr.bf16.mxu1 %v12700_v56  ;;  %v12789_v55 = vld [vmem:[%s17150_s1 + $0x970] ss:$100 sps:$4 sm:$0xff]   ;;  %v12792_v56 = vld [vmem:[%s17150_s1 + $0x978] ss:$100 sps:$4 sm:$0xff]  }
  0x3b   : > { %2689 = vmatpush1.bf16.msra.mxu0 %v12702_v57  ;;  %2730 = vmatpush1.bf16.msra.mxu1 %v12703_v58  ;;  %v12797_v57 = vld [vmem:[%s17150_s1 + $0xa3c] ss:$100 sps:$4 sm:$0xff]   ;;  %v12800_v58 = vld [vmem:[%s17150_s1 + $0xa44] ss:$100 sps:$4 sm:$0xff]  }
  0x3c   : > { %2690 = vmatprep.subr.bf16.mxu0 %v12704_v59  ;;  %2731 = vmatprep.subr.bf16.mxu1 %v12706_v60  ;;  %v12795_v59 = vld [vmem:[%s17150_s1 + $0xa38] ss:$100 sps:$4 sm:$0xff]   ;;  %v12798_v60 = vld [vmem:[%s17150_s1 + $0xa40] ss:$100 sps:$4 sm:$0xff]  }
  0x3f   : > { %2691 = vmatpush1.bf16.msra.mxu0 %v12708_v61  ;;  %2732 = vmatpush1.bf16.msra.mxu1 %v12709_v62  ;;  %v12803_v61 = vld [vmem:[%s17150_s1 + $0xb04] ss:$100 sps:$4 sm:$0xff]   ;;  %v12806_v62 = vld [vmem:[%s17150_s1 + $0xb0c] ss:$100 sps:$4 sm:$0xff]  }
  0x40   : > { %2692 = vmatprep.subr.bf16.mxu0 %v12710_v63  ;;  %2733 = vmatprep.subr.bf16.mxu1 %v12712_v0  ;;  %v12801_v63 = vld [vmem:[%s17150_s1 + $0xb00] ss:$100 sps:$4 sm:$0xff]   ;;  %v12804_v0 = vld [vmem:[%s17150_s1 + $0xb08] ss:$100 sps:$4 sm:$0xff]  }
  0x43   : > { %2693 = vmatpush1.bf16.msra.mxu0 %v12714_v1  ;;  %2734 = vmatpush1.bf16.msra.mxu1 %v12715_v2  ;;  %v12809_v1 = vld [vmem:[%s17150_s1 + $0xbcc] ss:$100 sps:$4 sm:$0xff]   ;;  %v12812_v2 = vld [vmem:[%s17150_s1 + $0xbd4] ss:$100 sps:$4 sm:$0xff]  }
  0x44   : > { %2744 = vmatprep.subr.bf16.mxu0 %v12719_v3  ;;  %2785 = vmatprep.subr.bf16.mxu1 %v12722_v4  ;;  %v12807_v3 = vld [vmem:[%s17150_s1 + $0xbc8] ss:$100 sps:$4 sm:$0xff]   ;;  %v12810_v4 = vld [vmem:[%s17150_s1 + $0xbd0] ss:$100 sps:$4 sm:$0xff]  }
  0x46   : > { %2695 = vmatmul.mubr.bf16.vlgmr.msra.gmra.mrb[0].mxu0 %v14068_v5  ;;  %2736 = vmatmul.mubr.bf16.vlgmr.msra.gmra.mrb[0].mxu1 %v14068_v5 }
  0x47   : > { %2745 = vmatpush1.bf16.msra.mxu0 %v12717_v6  ;;  %2786 = vmatpush1.bf16.msra.mxu1 %v12720_v7  ;;  %v12815_v6 = vld [vmem:[%s17150_s1 + $0x24] ss:$100 sps:$4 sm:$0xff]   ;;  %v12818_v7 = vld [vmem:[%s17150_s1 + $0x2c] ss:$100 sps:$4 sm:$0xff]  }
  0x48   : > { %2746 = vmatprep.subr.bf16.mxu0 %v12725_v8  ;;  %2787 = vmatprep.subr.bf16.mxu1 %v12728_v9  ;;  %v12813_v8 = vld [vmem:[%s17150_s1 + $0x20] ss:$100 sps:$4 sm:$0xff]   ;;  %v12816_v9 = vld [vmem:[%s17150_s1 + $0x28] ss:$100 sps:$4 sm:$0xff]  }
  0x49   : > { %2776 = vmatprep.mubr.bf16.mxu0 %v14016_v52  ;;  %2817 = vmatprep.mubr.bf16.mxu1 %v14016_v52 }
  0x4b   : > { %2747 = vmatpush1.bf16.msra.mxu0 %v12723_v10  ;;  %2788 = vmatpush1.bf16.msra.mxu1 %v12726_v11  ;;  %v12821_v10 = vld [vmem:[%s17150_s1 + $0xec] ss:$100 sps:$4 sm:$0xff]   ;;  %v12824_v11 = vld [vmem:[%s17150_s1 + $0xf4] ss:$100 sps:$4 sm:$0xff]  }
  0x4c   : > { %2748 = vmatprep.subr.bf16.mxu0 %v12731_v12  ;;  %2789 = vmatprep.subr.bf16.mxu1 %v12734_v13  ;;  %v12819_v12 = vld [vmem:[%s17150_s1 + $0xe8] ss:$100 sps:$4 sm:$0xff]   ;;  %v12822_v13 = vld [vmem:[%s17150_s1 + $0xf0] ss:$100 sps:$4 sm:$0xff]  }
  0x4f   : > { %2749 = vmatpush1.bf16.msra.mxu0 %v12729_v14  ;;  %2790 = vmatpush1.bf16.msra.mxu1 %v12732_v15  ;;  %v12827_v14 = vld [vmem:[%s17150_s1 + $0x1b4] ss:$100 sps:$4 sm:$0xff]   ;;  %v12830_v15 = vld [vmem:[%s17150_s1 + $0x1bc] ss:$100 sps:$4 sm:$0xff]  }
  0x50   : > { %2750 = vmatprep.subr.bf16.mxu0 %v12737_v16  ;;  %2791 = vmatprep.subr.bf16.mxu1 %v12740_v17  ;;  %v12825_v16 = vld [vmem:[%s17150_s1 + $0x1b0] ss:$100 sps:$4 sm:$0xff]   ;;  %v12828_v17 = vld [vmem:[%s17150_s1 + $0x1b8] ss:$100 sps:$4 sm:$0xff]  }
  0x53   : > { %2751 = vmatpush1.bf16.msra.mxu0 %v12735_v18  ;;  %2792 = vmatpush1.bf16.msra.mxu1 %v12738_v19  ;;  %v12833_v18 = vld [vmem:[%s17150_s1 + $0x27c] ss:$100 sps:$4 sm:$0xff]   ;;  %v12836_v19 = vld [vmem:[%s17150_s1 + $0x284] ss:$100 sps:$4 sm:$0xff]  }
  0x54   : > { %2752 = vmatprep.subr.bf16.mxu0 %v12743_v20  ;;  %2793 = vmatprep.subr.bf16.mxu1 %v12746_v21  ;;  %v12831_v20 = vld [vmem:[%s17150_s1 + $0x278] ss:$100 sps:$4 sm:$0xff]   ;;  %v12834_v21 = vld [vmem:[%s17150_s1 + $0x280] ss:$100 sps:$4 sm:$0xff]  }
  0x57   : > { %2753 = vmatpush1.bf16.msra.mxu0 %v12741_v22  ;;  %2794 = vmatpush1.bf16.msra.mxu1 %v12744_v23  ;;  %v12839_v22 = vld [vmem:[%s17150_s1 + $0x344] ss:$100 sps:$4 sm:$0xff]   ;;  %v12842_v23 = vld [vmem:[%s17150_s1 + $0x34c] ss:$100 sps:$4 sm:$0xff]  }
  0x58   : > { %2754 = vmatprep.subr.bf16.mxu0 %v12749_v24  ;;  %2795 = vmatprep.subr.bf16.mxu1 %v12752_v25  ;;  %v12837_v24 = vld [vmem:[%s17150_s1 + $0x340] ss:$100 sps:$4 sm:$0xff]   ;;  %v12840_v25 = vld [vmem:[%s17150_s1 + $0x348] ss:$100 sps:$4 sm:$0xff]  }
  0x5b   : > { %2755 = vmatpush1.bf16.msra.mxu0 %v12747_v26  ;;  %2796 = vmatpush1.bf16.msra.mxu1 %v12750_v27  ;;  %v12845_v26 = vld [vmem:[%s17150_s1 + $0x40c] ss:$100 sps:$4 sm:$0xff]   ;;  %v12848_v27 = vld [vmem:[%s17150_s1 + $0x414] ss:$100 sps:$4 sm:$0xff]  }
  0x5c   : > { %2756 = vmatprep.subr.bf16.mxu0 %v12755_v28  ;;  %2797 = vmatprep.subr.bf16.mxu1 %v12758_v29  ;;  %v12843_v28 = vld [vmem:[%s17150_s1 + $0x408] ss:$100 sps:$4 sm:$0xff]   ;;  %v12846_v29 = vld [vmem:[%s17150_s1 + $0x410] ss:$100 sps:$4 sm:$0xff]  }
  0x5f   : > { %2757 = vmatpush1.bf16.msra.mxu0 %v12753_v30  ;;  %2798 = vmatpush1.bf16.msra.mxu1 %v12756_v31  ;;  %v12851_v30 = vld [vmem:[%s17150_s1 + $0x4d4] ss:$100 sps:$4 sm:$0xff]   ;;  %v12854_v31 = vld [vmem:[%s17150_s1 + $0x4dc] ss:$100 sps:$4 sm:$0xff]  }
  0x60   : > { %2758 = vmatprep.subr.bf16.mxu0 %v12761_v32  ;;  %2799 = vmatprep.subr.bf16.mxu1 %v12764_v33  ;;  %v12849_v32 = vld [vmem:[%s17150_s1 + $0x4d0] ss:$100 sps:$4 sm:$0xff]   ;;  %v12852_v33 = vld [vmem:[%s17150_s1 + $0x4d8] ss:$100 sps:$4 sm:$0xff]  }
  0x63   : > { %2759 = vmatpush1.bf16.msra.mxu0 %v12759_v34  ;;  %2800 = vmatpush1.bf16.msra.mxu1 %v12762_v35  ;;  %v12857_v34 = vld [vmem:[%s17150_s1 + $0x59c] ss:$100 sps:$4 sm:$0xff]   ;;  %v12860_v35 = vld [vmem:[%s17150_s1 + $0x5a4] ss:$100 sps:$4 sm:$0xff]  }
  0x64   : > { %2760 = vmatprep.subr.bf16.mxu0 %v12767_v36  ;;  %2801 = vmatprep.subr.bf16.mxu1 %v12770_v37  ;;  %v12855_v36 = vld [vmem:[%s17150_s1 + $0x598] ss:$100 sps:$4 sm:$0xff]   ;;  %v12858_v37 = vld [vmem:[%s17150_s1 + $0x5a0] ss:$100 sps:$4 sm:$0xff]  }
  0x67   : > { %2761 = vmatpush1.bf16.msra.mxu0 %v12765_v38  ;;  %2802 = vmatpush1.bf16.msra.mxu1 %v12768_v39  ;;  %v12863_v38 = vld [vmem:[%s17150_s1 + $0x664] ss:$100 sps:$4 sm:$0xff]   ;;  %v12866_v39 = vld [vmem:[%s17150_s1 + $0x66c] ss:$100 sps:$4 sm:$0xff]  }
  0x68   : > { %2762 = vmatprep.subr.bf16.mxu0 %v12773_v40  ;;  %2803 = vmatprep.subr.bf16.mxu1 %v12776_v41  ;;  %v12861_v40 = vld [vmem:[%s17150_s1 + $0x660] ss:$100 sps:$4 sm:$0xff]   ;;  %v12864_v41 = vld [vmem:[%s17150_s1 + $0x668] ss:$100 sps:$4 sm:$0xff]  }
  0x6b   : > { %2763 = vmatpush1.bf16.msra.mxu0 %v12771_v42  ;;  %2804 = vmatpush1.bf16.msra.mxu1 %v12774_v43  ;;  %v12869_v42 = vld [vmem:[%s17150_s1 + $0x72c] ss:$100 sps:$4 sm:$0xff]   ;;  %v12872_v43 = vld [vmem:[%s17150_s1 + $0x734] ss:$100 sps:$4 sm:$0xff]  }
  0x6c   : > { %2764 = vmatprep.subr.bf16.mxu0 %v12779_v44  ;;  %2805 = vmatprep.subr.bf16.mxu1 %v12782_v45  ;;  %v12867_v44 = vld [vmem:[%s17150_s1 + $0x728] ss:$100 sps:$4 sm:$0xff]   ;;  %v12870_v45 = vld [vmem:[%s17150_s1 + $0x730] ss:$100 sps:$4 sm:$0xff]  }
  0x6f   : > { %2765 = vmatpush1.bf16.msra.mxu0 %v12777_v46  ;;  %2806 = vmatpush1.bf16.msra.mxu1 %v12780_v47  ;;  %v12875_v46 = vld [vmem:[%s17150_s1 + $0x7f4] ss:$100 sps:$4 sm:$0xff]   ;;  %v12878_v47 = vld [vmem:[%s17150_s1 + $0x7fc] ss:$100 sps:$4 sm:$0xff]  }
  0x70   : > { %2766 = vmatprep.subr.bf16.mxu0 %v12785_v48  ;;  %2807 = vmatprep.subr.bf16.mxu1 %v12788_v49  ;;  %v12873_v48 = vld [vmem:[%s17150_s1 + $0x7f0] ss:$100 sps:$4 sm:$0xff]   ;;  %v12876_v49 = vld [vmem:[%s17150_s1 + $0x7f8] ss:$100 sps:$4 sm:$0xff]  }
  0x73   : > { %2767 = vmatpush1.bf16.msra.mxu0 %v12783_v50  ;;  %2808 = vmatpush1.bf16.msra.mxu1 %v12786_v51  ;;  %v12881_v50 = vld [vmem:[%s17150_s1 + $0x8bc] ss:$100 sps:$4 sm:$0xff]   ;;  %v12884_v51 = vld [vmem:[%s17150_s1 + $0x8c4] ss:$100 sps:$4 sm:$0xff]  }
  0x74   : > { %2768 = vmatprep.subr.bf16.mxu0 %v12791_v53  ;;  %2809 = vmatprep.subr.bf16.mxu1 %v12794_v54  ;;  %v12879_v53 = vld [vmem:[%s17150_s1 + $0x8b8] ss:$100 sps:$4 sm:$0xff]   ;;  %v12882_v54 = vld [vmem:[%s17150_s1 + $0x8c0] ss:$100 sps:$4 sm:$0xff]  }
  0x77   : > { %2769 = vmatpush1.bf16.msra.mxu0 %v12789_v55  ;;  %2810 = vmatpush1.bf16.msra.mxu1 %v12792_v56  ;;  %v12887_v55 = vld [vmem:[%s17150_s1 + $0x984] ss:$100 sps:$4 sm:$0xff]   ;;  %v12890_v56 = vld [vmem:[%s17150_s1 + $0x98c] ss:$100 sps:$4 sm:$0xff]  }
  0x78   : > { %2770 = vmatprep.subr.bf16.mxu0 %v12797_v57  ;;  %2811 = vmatprep.subr.bf16.mxu1 %v12800_v58  ;;  %v12885_v57 = vld [vmem:[%s17150_s1 + $0x980] ss:$100 sps:$4 sm:$0xff]   ;;  %v12888_v58 = vld [vmem:[%s17150_s1 + $0x988] ss:$100 sps:$4 sm:$0xff]  }
  0x7b   : > { %2771 = vmatpush1.bf16.msra.mxu0 %v12795_v59  ;;  %2812 = vmatpush1.bf16.msra.mxu1 %v12798_v60  ;;  %v12893_v59 = vld [vmem:[%s17150_s1 + $0xa4c] ss:$100 sps:$4 sm:$0xff]   ;;  %v12896_v60 = vld [vmem:[%s17150_s1 + $0xa54] ss:$100 sps:$4 sm:$0xff]  }
  0x7c   : > { %2772 = vmatprep.subr.bf16.mxu0 %v12803_v61  ;;  %2813 = vmatprep.subr.bf16.mxu1 %v12806_v62  ;;  %v12891_v61 = vld [vmem:[%s17150_s1 + $0xa48] ss:$100 sps:$4 sm:$0xff]   ;;  %v12894_v62 = vld [vmem:[%s17150_s1 + $0xa50] ss:$100 sps:$4 sm:$0xff]  }
  0x7f   : > { %2773 = vmatpush1.bf16.msra.mxu0 %v12801_v63  ;;  %2814 = vmatpush1.bf16.msra.mxu1 %v12804_v0  ;;  %v12899_v63 = vld [vmem:[%s17150_s1 + $0xb14] ss:$100 sps:$4 sm:$0xff]   ;;  %v12902_v0 = vld [vmem:[%s17150_s1 + $0xb1c] ss:$100 sps:$4 sm:$0xff]  }
  0x80   : > { %2774 = vmatprep.subr.bf16.mxu0 %v12809_v1  ;;  %2815 = vmatprep.subr.bf16.mxu1 %v12812_v2  ;;  %v12897_v1 = vld [vmem:[%s17150_s1 + $0xb10] ss:$100 sps:$4 sm:$0xff]   ;;  %v12900_v2 = vld [vmem:[%s17150_s1 + $0xb18] ss:$100 sps:$4 sm:$0xff]  }
  0x83   : > { %2775 = vmatpush1.bf16.msra.mxu0 %v12807_v3  ;;  %2816 = vmatpush1.bf16.msra.mxu1 %v12810_v4  ;;  %v12905_v3 = vld [vmem:[%s17150_s1 + $0xbdc] ss:$100 sps:$4 sm:$0xff]   ;;  %v12908_v4 = vld [vmem:[%s17150_s1 + $0xbe4] ss:$100 sps:$4 sm:$0xff]  }
  0x84   : > { %2826 = vmatprep.subr.bf16.mxu0 %v12815_v6  ;;  %2867 = vmatprep.subr.bf16.mxu1 %v12818_v7  ;;  %v12903_v6 = vld [vmem:[%s17150_s1 + $0xbd8] ss:$100 sps:$4 sm:$0xff]   ;;  %v12906_v7 = vld [vmem:[%s17150_s1 + $0xbe0] ss:$100 sps:$4 sm:$0xff]  }
  0x86   : > { %2777 = vmatmul.mubr.bf16.vlgmr.msra.gmra.mrb[4].mxu0 %v14068_v5  ;;  %2818 = vmatmul.mubr.bf16.vlgmr.msra.gmra.mrb[4].mxu1 %v14068_v5 }
  0x87   : > { %2827 = vmatpush1.bf16.msra.mxu0 %v12813_v8  ;;  %2868 = vmatpush1.bf16.msra.mxu1 %v12816_v9  ;;  %v12911_v8 = vld [vmem:[%s17150_s1 + $0x34] ss:$100 sps:$4 sm:$0xff]   ;;  %v12914_v9 = vld [vmem:[%s17150_s1 + $0x3c] ss:$100 sps:$4 sm:$0xff]  }
  0x88   : > { %2828 = vmatprep.subr.bf16.mxu0 %v12821_v10  ;;  %2869 = vmatprep.subr.bf16.mxu1 %v12824_v11  ;;  %v12909_v10 = vld [vmem:[%s17150_s1 + $0x30] ss:$100 sps:$4 sm:$0xff]   ;;  %v12912_v11 = vld [vmem:[%s17150_s1 + $0x38] ss:$100 sps:$4 sm:$0xff]  }
  0x89   : > { %2858 = vmatprep.mubr.bf16.mxu0 %v14016_v52  ;;  %2899 = vmatprep.mubr.bf16.mxu1 %v14016_v52 }
  0x8b   : > { %2829 = vmatpush1.bf16.msra.mxu0 %v12819_v12  ;;  %2870 = vmatpush1.bf16.msra.mxu1 %v12822_v13  ;;  %v12917_v12 = vld [vmem:[%s17150_s1 + $0xfc] ss:$100 sps:$4 sm:$0xff]   ;;  %v12920_v13 = vld [vmem:[%s17150_s1 + $0x104] ss:$100 sps:$4 sm:$0xff]  }
  0x8c   : > { %2830 = vmatprep.subr.bf16.mxu0 %v12827_v14  ;;  %2871 = vmatprep.subr.bf16.mxu1 %v12830_v15  ;;  %v12915_v14 = vld [vmem:[%s17150_s1 + $0xf8] ss:$100 sps:$4 sm:$0xff]   ;;  %v12918_v15 = vld [vmem:[%s17150_s1 + $0x100] ss:$100 sps:$4 sm:$0xff]  }
  0x8f   : > { %2831 = vmatpush1.bf16.msra.mxu0 %v12825_v16  ;;  %2872 = vmatpush1.bf16.msra.mxu1 %v12828_v17  ;;  %v12923_v16 = vld [vmem:[%s17150_s1 + $0x1c4] ss:$100 sps:$4 sm:$0xff]   ;;  %v12926_v17 = vld [vmem:[%s17150_s1 + $0x1cc] ss:$100 sps:$4 sm:$0xff]  }
  0x90   : > { %2832 = vmatprep.subr.bf16.mxu0 %v12833_v18  ;;  %2873 = vmatprep.subr.bf16.mxu1 %v12836_v19  ;;  %v12921_v18 = vld [vmem:[%s17150_s1 + $0x1c0] ss:$100 sps:$4 sm:$0xff]   ;;  %v12924_v19 = vld [vmem:[%s17150_s1 + $0x1c8] ss:$100 sps:$4 sm:$0xff]  }
  0x93   : > { %2833 = vmatpush1.bf16.msra.mxu0 %v12831_v20  ;;  %2874 = vmatpush1.bf16.msra.mxu1 %v12834_v21  ;;  %v12929_v20 = vld [vmem:[%s17150_s1 + $0x28c] ss:$100 sps:$4 sm:$0xff]   ;;  %v12932_v21 = vld [vmem:[%s17150_s1 + $0x294] ss:$100 sps:$4 sm:$0xff]  }
  0x94   : > { %2834 = vmatprep.subr.bf16.mxu0 %v12839_v22  ;;  %2875 = vmatprep.subr.bf16.mxu1 %v12842_v23  ;;  %v12927_v22 = vld [vmem:[%s17150_s1 + $0x288] ss:$100 sps:$4 sm:$0xff]   ;;  %v12930_v23 = vld [vmem:[%s17150_s1 + $0x290] ss:$100 sps:$4 sm:$0xff]  }
  0x97   : > { %2835 = vmatpush1.bf16.msra.mxu0 %v12837_v24  ;;  %2876 = vmatpush1.bf16.msra.mxu1 %v12840_v25  ;;  %v12935_v24 = vld [vmem:[%s17150_s1 + $0x354] ss:$100 sps:$4 sm:$0xff]   ;;  %v12938_v25 = vld [vmem:[%s17150_s1 + $0x35c] ss:$100 sps:$4 sm:$0xff]  }
  0x98   : > { %2836 = vmatprep.subr.bf16.mxu0 %v12845_v26  ;;  %2877 = vmatprep.subr.bf16.mxu1 %v12848_v27  ;;  %v12933_v26 = vld [vmem:[%s17150_s1 + $0x350] ss:$100 sps:$4 sm:$0xff]   ;;  %v12936_v27 = vld [vmem:[%s17150_s1 + $0x358] ss:$100 sps:$4 sm:$0xff]  }
  0x9b   : > { %2837 = vmatpush1.bf16.msra.mxu0 %v12843_v28  ;;  %2878 = vmatpush1.bf16.msra.mxu1 %v12846_v29  ;;  %v12941_v28 = vld [vmem:[%s17150_s1 + $0x41c] ss:$100 sps:$4 sm:$0xff]   ;;  %v12944_v29 = vld [vmem:[%s17150_s1 + $0x424] ss:$100 sps:$4 sm:$0xff]  }
  0x9c   : > { %2838 = vmatprep.subr.bf16.mxu0 %v12851_v30  ;;  %2879 = vmatprep.subr.bf16.mxu1 %v12854_v31  ;;  %v12939_v30 = vld [vmem:[%s17150_s1 + $0x418] ss:$100 sps:$4 sm:$0xff]   ;;  %v12942_v31 = vld [vmem:[%s17150_s1 + $0x420] ss:$100 sps:$4 sm:$0xff]  }
  0x9f   : > { %2839 = vmatpush1.bf16.msra.mxu0 %v12849_v32  ;;  %2880 = vmatpush1.bf16.msra.mxu1 %v12852_v33  ;;  %v12947_v32 = vld [vmem:[%s17150_s1 + $0x4e4] ss:$100 sps:$4 sm:$0xff]   ;;  %v12950_v33 = vld [vmem:[%s17150_s1 + $0x4ec] ss:$100 sps:$4 sm:$0xff]  }
  0xa0   : > { %2840 = vmatprep.subr.bf16.mxu0 %v12857_v34  ;;  %2881 = vmatprep.subr.bf16.mxu1 %v12860_v35  ;;  %v12945_v34 = vld [vmem:[%s17150_s1 + $0x4e0] ss:$100 sps:$4 sm:$0xff]   ;;  %v12948_v35 = vld [vmem:[%s17150_s1 + $0x4e8] ss:$100 sps:$4 sm:$0xff]  }
  0xa3   : > { %2841 = vmatpush1.bf16.msra.mxu0 %v12855_v36  ;;  %2882 = vmatpush1.bf16.msra.mxu1 %v12858_v37  ;;  %v12953_v36 = vld [vmem:[%s17150_s1 + $0x5ac] ss:$100 sps:$4 sm:$0xff]   ;;  %v12956_v37 = vld [vmem:[%s17150_s1 + $0x5b4] ss:$100 sps:$4 sm:$0xff]  }
  0xa4   : > { %2842 = vmatprep.subr.bf16.mxu0 %v12863_v38  ;;  %2883 = vmatprep.subr.bf16.mxu1 %v12866_v39  ;;  %v12951_v38 = vld [vmem:[%s17150_s1 + $0x5a8] ss:$100 sps:$4 sm:$0xff]   ;;  %v12954_v39 = vld [vmem:[%s17150_s1 + $0x5b0] ss:$100 sps:$4 sm:$0xff]  }
  0xa7   : > { %2843 = vmatpush1.bf16.msra.mxu0 %v12861_v40  ;;  %2884 = vmatpush1.bf16.msra.mxu1 %v12864_v41  ;;  %v12959_v40 = vld [vmem:[%s17150_s1 + $0x674] ss:$100 sps:$4 sm:$0xff]   ;;  %v12962_v41 = vld [vmem:[%s17150_s1 + $0x67c] ss:$100 sps:$4 sm:$0xff]  }
  0xa8   : > { %2844 = vmatprep.subr.bf16.mxu0 %v12869_v42  ;;  %2885 = vmatprep.subr.bf16.mxu1 %v12872_v43  ;;  %v12957_v42 = vld [vmem:[%s17150_s1 + $0x670] ss:$100 sps:$4 sm:$0xff]   ;;  %v12960_v43 = vld [vmem:[%s17150_s1 + $0x678] ss:$100 sps:$4 sm:$0xff]  }
  0xab   : > { %2845 = vmatpush1.bf16.msra.mxu0 %v12867_v44  ;;  %2886 = vmatpush1.bf16.msra.mxu1 %v12870_v45  ;;  %v12965_v44 = vld [vmem:[%s17150_s1 + $0x73c] ss:$100 sps:$4 sm:$0xff]   ;;  %v12968_v45 = vld [vmem:[%s17150_s1 + $0x744] ss:$100 sps:$4 sm:$0xff]  }
  0xac   : > { %2846 = vmatprep.subr.bf16.mxu0 %v12875_v46  ;;  %2887 = vmatprep.subr.bf16.mxu1 %v12878_v47  ;;  %v12963_v46 = vld [vmem:[%s17150_s1 + $0x738] ss:$100 sps:$4 sm:$0xff]   ;;  %v12966_v47 = vld [vmem:[%s17150_s1 + $0x740] ss:$100 sps:$4 sm:$0xff]  }
  0xaf   : > { %2847 = vmatpush1.bf16.msra.mxu0 %v12873_v48  ;;  %2888 = vmatpush1.bf16.msra.mxu1 %v12876_v49  ;;  %v12971_v48 = vld [vmem:[%s17150_s1 + $0x804] ss:$100 sps:$4 sm:$0xff]   ;;  %v12974_v49 = vld [vmem:[%s17150_s1 + $0x80c] ss:$100 sps:$4 sm:$0xff]  }
  0xb0   : > { %2848 = vmatprep.subr.bf16.mxu0 %v12881_v50  ;;  %2889 = vmatprep.subr.bf16.mxu1 %v12884_v51  ;;  %v12969_v50 = vld [vmem:[%s17150_s1 + $0x800] ss:$100 sps:$4 sm:$0xff]   ;;  %v12972_v51 = vld [vmem:[%s17150_s1 + $0x808] ss:$100 sps:$4 sm:$0xff]  }
  0xb3   : > { %2849 = vmatpush1.bf16.msra.mxu0 %v12879_v53  ;;  %2890 = vmatpush1.bf16.msra.mxu1 %v12882_v54  ;;  %v12977_v53 = vld [vmem:[%s17150_s1 + $0x8cc] ss:$100 sps:$4 sm:$0xff]   ;;  %v12980_v54 = vld [vmem:[%s17150_s1 + $0x8d4] ss:$100 sps:$4 sm:$0xff]  }
  0xb4   : > { %2850 = vmatprep.subr.bf16.mxu0 %v12887_v55  ;;  %2891 = vmatprep.subr.bf16.mxu1 %v12890_v56  ;;  %v12975_v55 = vld [vmem:[%s17150_s1 + $0x8c8] ss:$100 sps:$4 sm:$0xff]   ;;  %v12978_v56 = vld [vmem:[%s17150_s1 + $0x8d0] ss:$100 sps:$4 sm:$0xff]  }
  0xb7   : > { %2851 = vmatpush1.bf16.msra.mxu0 %v12885_v57  ;;  %2892 = vmatpush1.bf16.msra.mxu1 %v12888_v58  ;;  %v12983_v57 = vld [vmem:[%s17150_s1 + $0x994] ss:$100 sps:$4 sm:$0xff]   ;;  %v12986_v58 = vld [vmem:[%s17150_s1 + $0x99c] ss:$100 sps:$4 sm:$0xff]  }
  0xb8   : > { %2852 = vmatprep.subr.bf16.mxu0 %v12893_v59  ;;  %2893 = vmatprep.subr.bf16.mxu1 %v12896_v60  ;;  %v12981_v59 = vld [vmem:[%s17150_s1 + $0x990] ss:$100 sps:$4 sm:$0xff]   ;;  %v12984_v60 = vld [vmem:[%s17150_s1 + $0x998] ss:$100 sps:$4 sm:$0xff]  }
  0xbb   : > { %2853 = vmatpush1.bf16.msra.mxu0 %v12891_v61  ;;  %2894 = vmatpush1.bf16.msra.mxu1 %v12894_v62  ;;  %v12989_v61 = vld [vmem:[%s17150_s1 + $0xa5c] ss:$100 sps:$4 sm:$0xff]   ;;  %v12992_v62 = vld [vmem:[%s17150_s1 + $0xa64] ss:$100 sps:$4 sm:$0xff]  }
  0xbc   : > { %2854 = vmatprep.subr.bf16.mxu0 %v12899_v63  ;;  %2895 = vmatprep.subr.bf16.mxu1 %v12902_v0  ;;  %v12987_v63 = vld [vmem:[%s17150_s1 + $0xa58] ss:$100 sps:$4 sm:$0xff]   ;;  %v12990_v0 = vld [vmem:[%s17150_s1 + $0xa60] ss:$100 sps:$4 sm:$0xff]  }
  0xbf   : > { %2855 = vmatpush1.bf16.msra.mxu0 %v12897_v1  ;;  %2896 = vmatpush1.bf16.msra.mxu1 %v12900_v2  ;;  %v12995_v1 = vld [vmem:[%s17150_s1 + $0xb24] ss:$100 sps:$4 sm:$0xff]   ;;  %v12998_v2 = vld [vmem:[%s17150_s1 + $0xb2c] ss:$100 sps:$4 sm:$0xff]  }
  0xc0   : > { %2856 = vmatprep.subr.bf16.mxu0 %v12905_v3  ;;  %2897 = vmatprep.subr.bf16.mxu1 %v12908_v4  ;;  %v12993_v3 = vld [vmem:[%s17150_s1 + $0xb20] ss:$100 sps:$4 sm:$0xff]   ;;  %v12996_v4 = vld [vmem:[%s17150_s1 + $0xb28] ss:$100 sps:$4 sm:$0xff]  }
  0xc3   : > { %2857 = vmatpush1.bf16.msra.mxu0 %v12903_v6  ;;  %2898 = vmatpush1.bf16.msra.mxu1 %v12906_v7  ;;  %v13001_v6 = vld [vmem:[%s17150_s1 + $0xbec] ss:$100 sps:$4 sm:$0xff]   ;;  %v13004_v7 = vld [vmem:[%s17150_s1 + $0xbf4] ss:$100 sps:$4 sm:$0xff]  }
  0xc4   : > { %2908 = vmatprep.subr.bf16.mxu0 %v12911_v8  ;;  %2949 = vmatprep.subr.bf16.mxu1 %v12914_v9  ;;  %v12999_v8 = vld [vmem:[%s17150_s1 + $0xbe8] ss:$100 sps:$4 sm:$0xff]   ;;  %v13002_v9 = vld [vmem:[%s17150_s1 + $0xbf0] ss:$100 sps:$4 sm:$0xff]  }
  0xc6   : > { %2859 = vmatmul.mubr.bf16.vlgmr.msra.gmra.mrb[8].mxu0 %v14068_v5  ;;  %2900 = vmatmul.mubr.bf16.vlgmr.msra.gmra.mrb[8].mxu1 %v14068_v5 }
  0xc7   : > { %2909 = vmatpush1.bf16.msra.mxu0 %v12909_v10  ;;  %2950 = vmatpush1.bf16.msra.mxu1 %v12912_v11  ;;  %v13007_v10 = vld [vmem:[%s17150_s1 + $0x44] ss:$100 sps:$4 sm:$0xff]   ;;  %v13010_v11 = vld [vmem:[%s17150_s1 + $0x4c] ss:$100 sps:$4 sm:$0xff]  }
  0xc8   : > { %2910 = vmatprep.subr.bf16.mxu0 %v12917_v12  ;;  %2951 = vmatprep.subr.bf16.mxu1 %v12920_v13  ;;  %v13005_v12 = vld [vmem:[%s17150_s1 + $0x40] ss:$100 sps:$4 sm:$0xff]   ;;  %v13008_v13 = vld [vmem:[%s17150_s1 + $0x48] ss:$100 sps:$4 sm:$0xff]  }
  0xc9   : > { %2940 = vmatprep.mubr.bf16.mxu0 %v14016_v52  ;;  %2981 = vmatprep.mubr.bf16.mxu1 %v14016_v52 }
  0xcb   : > { %2911 = vmatpush1.bf16.msra.mxu0 %v12915_v14  ;;  %2952 = vmatpush1.bf16.msra.mxu1 %v12918_v15  ;;  %v13013_v14 = vld [vmem:[%s17150_s1 + $0x10c] ss:$100 sps:$4 sm:$0xff]   ;;  %v13016_v15 = vld [vmem:[%s17150_s1 + $0x114] ss:$100 sps:$4 sm:$0xff]  }
  0xcc   : > { %2912 = vmatprep.subr.bf16.mxu0 %v12923_v16  ;;  %2953 = vmatprep.subr.bf16.mxu1 %v12926_v17  ;;  %v13011_v16 = vld [vmem:[%s17150_s1 + $0x108] ss:$100 sps:$4 sm:$0xff]   ;;  %v13014_v17 = vld [vmem:[%s17150_s1 + $0x110] ss:$100 sps:$4 sm:$0xff]  }
  0xcf   : > { %2913 = vmatpush1.bf16.msra.mxu0 %v12921_v18  ;;  %2954 = vmatpush1.bf16.msra.mxu1 %v12924_v19  ;;  %v13019_v18 = vld [vmem:[%s17150_s1 + $0x1d4] ss:$100 sps:$4 sm:$0xff]   ;;  %v13022_v19 = vld [vmem:[%s17150_s1 + $0x1dc] ss:$100 sps:$4 sm:$0xff]  }
  0xd0   : > { %2914 = vmatprep.subr.bf16.mxu0 %v12929_v20  ;;  %2955 = vmatprep.subr.bf16.mxu1 %v12932_v21  ;;  %v13017_v20 = vld [vmem:[%s17150_s1 + $0x1d0] ss:$100 sps:$4 sm:$0xff]   ;;  %v13020_v21 = vld [vmem:[%s17150_s1 + $0x1d8] ss:$100 sps:$4 sm:$0xff]  }
  0xd3   : > { %2915 = vmatpush1.bf16.msra.mxu0 %v12927_v22  ;;  %2956 = vmatpush1.bf16.msra.mxu1 %v12930_v23  ;;  %v13025_v22 = vld [vmem:[%s17150_s1 + $0x29c] ss:$100 sps:$4 sm:$0xff]   ;;  %v13028_v23 = vld [vmem:[%s17150_s1 + $0x2a4] ss:$100 sps:$4 sm:$0xff]  }
  0xd4   : > { %2916 = vmatprep.subr.bf16.mxu0 %v12935_v24  ;;  %2957 = vmatprep.subr.bf16.mxu1 %v12938_v25  ;;  %v13023_v24 = vld [vmem:[%s17150_s1 + $0x298] ss:$100 sps:$4 sm:$0xff]   ;;  %v13026_v25 = vld [vmem:[%s17150_s1 + $0x2a0] ss:$100 sps:$4 sm:$0xff]  }
  0xd7   : > { %2917 = vmatpush1.bf16.msra.mxu0 %v12933_v26  ;;  %2958 = vmatpush1.bf16.msra.mxu1 %v12936_v27  ;;  %v13031_v26 = vld [vmem:[%s17150_s1 + $0x364] ss:$100 sps:$4 sm:$0xff]   ;;  %v13034_v27 = vld [vmem:[%s17150_s1 + $0x36c] ss:$100 sps:$4 sm:$0xff]  }
  0xd8   : > { %2918 = vmatprep.subr.bf16.mxu0 %v12941_v28  ;;  %2959 = vmatprep.subr.bf16.mxu1 %v12944_v29  ;;  %v13029_v28 = vld [vmem:[%s17150_s1 + $0x360] ss:$100 sps:$4 sm:$0xff]   ;;  %v13032_v29 = vld [vmem:[%s17150_s1 + $0x368] ss:$100 sps:$4 sm:$0xff]  }
  0xdb   : > { %2919 = vmatpush1.bf16.msra.mxu0 %v12939_v30  ;;  %2960 = vmatpush1.bf16.msra.mxu1 %v12942_v31  ;;  %v13037_v30 = vld [vmem:[%s17150_s1 + $0x42c] ss:$100 sps:$4 sm:$0xff]   ;;  %v13040_v31 = vld [vmem:[%s17150_s1 + $0x434] ss:$100 sps:$4 sm:$0xff]  }
  0xdc   : > { %2920 = vmatprep.subr.bf16.mxu0 %v12947_v32  ;;  %2961 = vmatprep.subr.bf16.mxu1 %v12950_v33  ;;  %v13035_v32 = vld [vmem:[%s17150_s1 + $0x428] ss:$100 sps:$4 sm:$0xff]   ;;  %v13038_v33 = vld [vmem:[%s17150_s1 + $0x430] ss:$100 sps:$4 sm:$0xff]  }
  0xdf   : > { %2921 = vmatpush1.bf16.msra.mxu0 %v12945_v34  ;;  %2962 = vmatpush1.bf16.msra.mxu1 %v12948_v35  ;;  %v13043_v34 = vld [vmem:[%s17150_s1 + $0x4f4] ss:$100 sps:$4 sm:$0xff]   ;;  %v13046_v35 = vld [vmem:[%s17150_s1 + $0x4fc] ss:$100 sps:$4 sm:$0xff]  }
  0xe0   : > { %2922 = vmatprep.subr.bf16.mxu0 %v12953_v36  ;;  %2963 = vmatprep.subr.bf16.mxu1 %v12956_v37  ;;  %v13041_v37 = vld [vmem:[%s17150_s1 + $0x4f0] ss:$100 sps:$4 sm:$0xff]  }
  0xe3   : > { %2923 = vmatpush1.bf16.msra.mxu0 %v12951_v38  ;;  %2964 = vmatpush1.bf16.msra.mxu1 %v12954_v39 }
  0xe4   : > { %2924 = vmatprep.subr.bf16.mxu0 %v12959_v40  ;;  %2965 = vmatprep.subr.bf16.mxu1 %v12962_v41  ;;  %v13044_v40 = vld [vmem:[%s17150_s1 + $0x4f8] ss:$100 sps:$4 sm:$0xff]  }
  0xe7   : > { %2925 = vmatpush1.bf16.msra.mxu0 %v12957_v42  ;;  %2966 = vmatpush1.bf16.msra.mxu1 %v12960_v43 }
  0xe8   : > { %2926 = vmatprep.subr.bf16.mxu0 %v12965_v44  ;;  %2967 = vmatprep.subr.bf16.mxu1 %v12968_v45  ;;  %v13049_v45 = vld [vmem:[%s17150_s1 + $0x5bc] ss:$100 sps:$4 sm:$0xff]  }
  0xeb   : > { %2927 = vmatpush1.bf16.msra.mxu0 %v12963_v46  ;;  %2968 = vmatpush1.bf16.msra.mxu1 %v12966_v47  ;;  %v13052_v46 = vld [vmem:[%s17150_s1 + $0x5c4] ss:$100 sps:$4 sm:$0xff]  }
  0xec   : > { %2928 = vmatprep.subr.bf16.mxu0 %v12971_v48  ;;  %2969 = vmatprep.subr.bf16.mxu1 %v12974_v49  ;;  %v13047_v48 = vld [vmem:[%s17150_s1 + $0x5b8] ss:$100 sps:$4 sm:$0xff]   ;;  %v13050_v49 = vld [vmem:[%s17150_s1 + $0x5c0] ss:$100 sps:$4 sm:$0xff]  }
  0xef   : > { %2929 = vmatpush1.bf16.msra.mxu0 %v12969_v50  ;;  %2970 = vmatpush1.bf16.msra.mxu1 %v12972_v51  ;;  %v13055_v50 = vld [vmem:[%s17150_s1 + $0x684] ss:$100 sps:$4 sm:$0xff]   ;;  %v13058_v51 = vld [vmem:[%s17150_s1 + $0x68c] ss:$100 sps:$4 sm:$0xff]  }
  0xf0   : > { %2930 = vmatprep.subr.bf16.mxu0 %v12977_v53  ;;  %2971 = vmatprep.subr.bf16.mxu1 %v12980_v54  ;;  %v13053_v53 = vld [vmem:[%s17150_s1 + $0x680] ss:$100 sps:$4 sm:$0xff]   ;;  %v13056_v54 = vld [vmem:[%s17150_s1 + $0x688] ss:$100 sps:$4 sm:$0xff]  }
  0xf3   : > { %2931 = vmatpush1.bf16.msra.mxu0 %v12975_v55  ;;  %2972 = vmatpush1.bf16.msra.mxu1 %v12978_v56  ;;  %v13061_v55 = vld [vmem:[%s17150_s1 + $0x74c] ss:$100 sps:$4 sm:$0xff]   ;;  %v13064_v56 = vld [vmem:[%s17150_s1 + $0x754] ss:$100 sps:$4 sm:$0xff]  }
  0xf4   : > { %2932 = vmatprep.subr.bf16.mxu0 %v12983_v57  ;;  %2973 = vmatprep.subr.bf16.mxu1 %v12986_v58  ;;  %v13059_v57 = vld [vmem:[%s17150_s1 + $0x748] ss:$100 sps:$4 sm:$0xff]   ;;  %v13062_v58 = vld [vmem:[%s17150_s1 + $0x750] ss:$100 sps:$4 sm:$0xff]  }
  0xf7   : > { %2933 = vmatpush1.bf16.msra.mxu0 %v12981_v59  ;;  %2974 = vmatpush1.bf16.msra.mxu1 %v12984_v60  ;;  %v13067_v59 = vld [vmem:[%s17150_s1 + $0x814] ss:$100 sps:$4 sm:$0xff]   ;;  %v13070_v60 = vld [vmem:[%s17150_s1 + $0x81c] ss:$100 sps:$4 sm:$0xff]  }
  0xf8   : > { %2934 = vmatprep.subr.bf16.mxu0 %v12989_v61  ;;  %2975 = vmatprep.subr.bf16.mxu1 %v12992_v62  ;;  %v13065_v61 = vld [vmem:[%s17150_s1 + $0x810] ss:$100 sps:$4 sm:$0xff]   ;;  %v13068_v62 = vld [vmem:[%s17150_s1 + $0x818] ss:$100 sps:$4 sm:$0xff]  }
  0xfb   : > { %2935 = vmatpush1.bf16.msra.mxu0 %v12987_v63  ;;  %2976 = vmatpush1.bf16.msra.mxu1 %v12990_v0  ;;  %v13073_v63 = vld [vmem:[%s17150_s1 + $0x8dc] ss:$100 sps:$4 sm:$0xff]   ;;  %v13076_v0 = vld [vmem:[%s17150_s1 + $0x8e4] ss:$100 sps:$4 sm:$0xff]  }
  0xfc   : > { %2936 = vmatprep.subr.bf16.mxu0 %v12995_v1  ;;  %2977 = vmatprep.subr.bf16.mxu1 %v12998_v2  ;;  %v13071_v1 = vld [vmem:[%s17150_s1 + $0x8d8] ss:$100 sps:$4 sm:$0xff]   ;;  %v13074_v2 = vld [vmem:[%s17150_s1 + $0x8e0] ss:$100 sps:$4 sm:$0xff]  }
  0xff   : > { %2937 = vmatpush1.bf16.msra.mxu0 %v12993_v3  ;;  %2978 = vmatpush1.bf16.msra.mxu1 %v12996_v4  ;;  %v13079_v3 = vld [vmem:[%s17150_s1 + $0x9a4] ss:$100 sps:$4 sm:$0xff]   ;;  %v13082_v4 = vld [vmem:[%s17150_s1 + $0x9ac] ss:$100 sps:$4 sm:$0xff]  }
 0x100   : > { %2938 = vmatprep.subr.bf16.mxu0 %v13001_v6  ;;  %2979 = vmatprep.subr.bf16.mxu1 %v13004_v7  ;;  %v13077_v6 = vld [vmem:[%s17150_s1 + $0x9a0] ss:$100 sps:$4 sm:$0xff]   ;;  %v13080_v7 = vld [vmem:[%s17150_s1 + $0x9a8] ss:$100 sps:$4 sm:$0xff]  }
 0x103   : > { %2939 = vmatpush1.bf16.msra.mxu0 %v12999_v8  ;;  %2980 = vmatpush1.bf16.msra.mxu1 %v13002_v9  ;;  %v13085_v8 = vld [vmem:[%s17150_s1 + $0xa6c] ss:$100 sps:$4 sm:$0xff]   ;;  %v13088_v9 = vld [vmem:[%s17150_s1 + $0xa74] ss:$100 sps:$4 sm:$0xff]  }
 0x104   : > { %2990 = vmatprep.subr.bf16.mxu0 %v13007_v10  ;;  %3031 = vmatprep.subr.bf16.mxu1 %v13010_v11  ;;  %v13083_v10 = vld [vmem:[%s17150_s1 + $0xa68] ss:$100 sps:$4 sm:$0xff]   ;;  %v13086_v11 = vld [vmem:[%s17150_s1 + $0xa70] ss:$100 sps:$4 sm:$0xff]  }
 0x106   : > { %2941 = vmatmul.mubr.bf16.vlgmr.msra.gmra.mrb[12].mxu0 %v14068_v5  ;;  %2982 = vmatmul.mubr.bf16.vlgmr.msra.gmra.mrb[12].mxu1 %v14068_v5 }
 0x107   : > { %2991 = vmatpush1.bf16.msra.mxu0 %v13005_v12  ;;  %3032 = vmatpush1.bf16.msra.mxu1 %v13008_v13  ;;  %v13091_v12 = vld [vmem:[%s17150_s1 + $0xb34] ss:$100 sps:$4 sm:$0xff]   ;;  %v13094_v13 = vld [vmem:[%s17150_s1 + $0xb3c] ss:$100 sps:$4 sm:$0xff]  }
 0x108   : > { %2992 = vmatprep.subr.bf16.mxu0 %v13013_v14  ;;  %3033 = vmatprep.subr.bf16.mxu1 %v13016_v15  ;;  %v13089_v14 = vld [vmem:[%s17150_s1 + $0xb30] ss:$100 sps:$4 sm:$0xff]   ;;  %v13092_v15 = vld [vmem:[%s17150_s1 + $0xb38] ss:$100 sps:$4 sm:$0xff]  }
 0x109   : > { %3022 = vmatprep.mubr.bf16.mxu0 %v14016_v52  ;;  %3063 = vmatprep.mubr.bf16.mxu1 %v14016_v52 }
 0x10b   : > { %2993 = vmatpush1.bf16.msra.mxu0 %v13011_v16  ;;  %3034 = vmatpush1.bf16.msra.mxu1 %v13014_v17  ;;  %v13097_v16 = vld [vmem:[%s17150_s1 + $0xbfc] ss:$100 sps:$4 sm:$0xff]   ;;  %v13100_v17 = vld [vmem:[%s17150_s1 + $0xc04] ss:$100 sps:$4 sm:$0xff]  }
 0x10c   : > { %2994 = vmatprep.subr.bf16.mxu0 %v13019_v18  ;;  %3035 = vmatprep.subr.bf16.mxu1 %v13022_v19  ;;  %v13095_v18 = vld [vmem:[%s17150_s1 + $0xbf8] ss:$100 sps:$4 sm:$0xff]   ;;  %v13098_v19 = vld [vmem:[%s17150_s1 + $0xc00] ss:$100 sps:$4 sm:$0xff]  }
 0x10f   : > { %2995 = vmatpush1.bf16.msra.mxu0 %v13017_v20  ;;  %3036 = vmatpush1.bf16.msra.mxu1 %v13020_v21  ;;  %v13103_v20 = vld [vmem:[%s17150_s1 + $0x54] ss:$100 sps:$4 sm:$0xff]   ;;  %v13106_v21 = vld [vmem:[%s17150_s1 + $0x5c] ss:$100 sps:$4 sm:$0xff]  }
 0x110   : > { %2996 = vmatprep.subr.bf16.mxu0 %v13025_v22  ;;  %3037 = vmatprep.subr.bf16.mxu1 %v13028_v23  ;;  %v13101_v22 = vld [vmem:[%s17150_s1 + $0x50] ss:$100 sps:$4 sm:$0xff]   ;;  %v13104_v23 = vld [vmem:[%s17150_s1 + $0x58] ss:$100 sps:$4 sm:$0xff]  }
 0x113   : > { %2997 = vmatpush1.bf16.msra.mxu0 %v13023_v24  ;;  %3038 = vmatpush1.bf16.msra.mxu1 %v13026_v25  ;;  %v13109_v24 = vld [vmem:[%s17150_s1 + $0x11c] ss:$100 sps:$4 sm:$0xff]   ;;  %v13112_v25 = vld [vmem:[%s17150_s1 + $0x124] ss:$100 sps:$4 sm:$0xff]  }
 0x114   : > { %2998 = vmatprep.subr.bf16.mxu0 %v13031_v26  ;;  %3039 = vmatprep.subr.bf16.mxu1 %v13034_v27  ;;  %v13107_v26 = vld [vmem:[%s17150_s1 + $0x118] ss:$100 sps:$4 sm:$0xff]   ;;  %v13110_v27 = vld [vmem:[%s17150_s1 + $0x120] ss:$100 sps:$4 sm:$0xff]  }
 0x117   : > { %2999 = vmatpush1.bf16.msra.mxu0 %v13029_v28  ;;  %3040 = vmatpush1.bf16.msra.mxu1 %v13032_v29  ;;  %v13115_v28 = vld [vmem:[%s17150_s1 + $0x1e4] ss:$100 sps:$4 sm:$0xff]   ;;  %v13118_v29 = vld [vmem:[%s17150_s1 + $0x1ec] ss:$100 sps:$4 sm:$0xff]  }
 0x118   : > { %3000 = vmatprep.subr.bf16.mxu0 %v13037_v30  ;;  %3041 = vmatprep.subr.bf16.mxu1 %v13040_v31  ;;  %v13113_v30 = vld [vmem:[%s17150_s1 + $0x1e0] ss:$100 sps:$4 sm:$0xff]   ;;  %v13116_v31 = vld [vmem:[%s17150_s1 + $0x1e8] ss:$100 sps:$4 sm:$0xff]  }
 0x119   : > { %v14734_v36 = vpop.f32.mrb[0].mxu0  ;;  %v14739_v38 = vpop.f32.mrb[0].mxu1 }
 0x11a   : > { %v14741_v39 = vpop.f32.mrb[1].mxu0  ;;  %v14746_v41 = vpop.f32.mrb[1].mxu1 }
 0x11b   : > { %v2700_v42 = vpop.f32.mrb[2].mxu0  ;;  %3001 = vmatpush1.bf16.msra.mxu0 %v13035_v32  ;;  %3042 = vmatpush1.bf16.msra.mxu1 %v13038_v33  ;;  %v2741_v43 = vpop.f32.mrb[2].mxu1  ;;  %v13121_v32 = vld [vmem:[%s17150_s1 + $0x2ac] ss:$100 sps:$4 sm:$0xff]   ;;  %v13124_v33 = vld [vmem:[%s17150_s1 + $0x2b4] ss:$100 sps:$4 sm:$0xff]  }
 0x11c   : > { %v2701_v44 = vpop.f32.mrb[3].mxu0  ;;  %3002 = vmatprep.subr.bf16.mxu0 %v13043_v34  ;;  %3043 = vmatprep.subr.bf16.mxu1 %v13046_v35  ;;  %v2742_v47 = vpop.f32.mrb[3].mxu1  ;;  %v13119_v34 = vld [vmem:[%s17150_s1 + $0x2a8] ss:$100 sps:$4 sm:$0xff]   ;;  %v13122_v35 = vld [vmem:[%s17150_s1 + $0x2b0] ss:$100 sps:$4 sm:$0xff]  }
 0x11d   : > { %v13125_v42 = vld [vmem:[%s17150_s1 + $0x370] ss:$100 sps:$4 sm:$0xff]   ;;  %v13128_v43 = vld [vmem:[%s17150_s1 + $0x378] ss:$100 sps:$4 sm:$0xff]   ;;  %v13134_v47 = vld [vmem:[%s17150_s1 + $0x440] ss:$100 sps:$4 sm:$0xff]  }
 0x11e   : > { %v13133_v44 = vld [vmem:[%s17150_s1 + $0x43c] ss:$100 sps:$4 sm:$0xff]  }
 0x11f   : > { %3003 = vmatpush1.bf16.msra.mxu0 %v13041_v37  ;;  %3044 = vmatpush1.bf16.msra.mxu1 %v13044_v40  ;;  %v13127_v37 = vld [vmem:[%s17150_s1 + $0x374] ss:$100 sps:$4 sm:$0xff]   ;;  %v13130_v40 = vld [vmem:[%s17150_s1 + $0x37c] ss:$100 sps:$4 sm:$0xff]  }
 0x120   : > { %3004 = vmatprep.subr.bf16.mxu0 %v13049_v45  ;;  %3045 = vmatprep.subr.bf16.mxu1 %v13052_v46  ;;  %v13136_v45 = vld [vmem:[%s17150_s1 + $0x444] ss:$100 sps:$4 sm:$0xff]   ;;  %v13131_v46 = vld [vmem:[%s17150_s1 + $0x438] ss:$100 sps:$4 sm:$0xff]  }
 0x123   : > { %3005 = vmatpush1.bf16.msra.mxu0 %v13047_v48  ;;  %3046 = vmatpush1.bf16.msra.mxu1 %v13050_v49  ;;  %v13139_v48 = vld [vmem:[%s17150_s1 + $0x504] ss:$100 sps:$4 sm:$0xff]   ;;  %v13142_v49 = vld [vmem:[%s17150_s1 + $0x50c] ss:$100 sps:$4 sm:$0xff]  }
 0x124   : > { %3006 = vmatprep.subr.bf16.mxu0 %v13055_v50  ;;  %3047 = vmatprep.subr.bf16.mxu1 %v13058_v51  ;;  %v13137_v51 = vld [vmem:[%s17150_s1 + $0x500] ss:$100 sps:$4 sm:$0xff]  }
 0x127   : > { %3007 = vmatpush1.bf16.msra.mxu0 %v13053_v53  ;;  %3048 = vmatpush1.bf16.msra.mxu1 %v13056_v54 }
 0x128   : > { %3008 = vmatprep.subr.bf16.mxu0 %v13061_v55  ;;  %3049 = vmatprep.subr.bf16.mxu1 %v13064_v56  ;;  %v13140_v55 = vld [vmem:[%s17150_s1 + $0x508] ss:$100 sps:$4 sm:$0xff]  }
 0x12b   : > { %3009 = vmatpush1.bf16.msra.mxu0 %v13059_v57  ;;  %3050 = vmatpush1.bf16.msra.mxu1 %v13062_v58 }
 0x12c   : > { %3010 = vmatprep.subr.bf16.mxu0 %v13067_v59  ;;  %3051 = vmatprep.subr.bf16.mxu1 %v13070_v60  ;;  %v13145_v60 = vld [vmem:[%s17150_s1 + $0x5cc] ss:$100 sps:$4 sm:$0xff]  }
 0x12f   : > { %3011 = vmatpush1.bf16.msra.mxu0 %v13065_v61  ;;  %3052 = vmatpush1.bf16.msra.mxu1 %v13068_v62  ;;  %v13148_v61 = vld [vmem:[%s17150_s1 + $0x5d4] ss:$100 sps:$4 sm:$0xff]  }
 0x130   : > { %3012 = vmatprep.subr.bf16.mxu0 %v13073_v63  ;;  %3053 = vmatprep.subr.bf16.mxu1 %v13076_v0  ;;  %v13143_v63 = vld [vmem:[%s17150_s1 + $0x5c8] ss:$100 sps:$4 sm:$0xff]   ;;  %v13146_v0 = vld [vmem:[%s17150_s1 + $0x5d0] ss:$100 sps:$4 sm:$0xff]  }
 0x133   : > { %3013 = vmatpush1.bf16.msra.mxu0 %v13071_v1  ;;  %3054 = vmatpush1.bf16.msra.mxu1 %v13074_v2  ;;  %v13151_v1 = vld [vmem:[%s17150_s1 + $0x694] ss:$100 sps:$4 sm:$0xff]   ;;  %v13154_v2 = vld [vmem:[%s17150_s1 + $0x69c] ss:$100 sps:$4 sm:$0xff]  }
 0x134   : > { %3014 = vmatprep.subr.bf16.mxu0 %v13079_v3  ;;  %3055 = vmatprep.subr.bf16.mxu1 %v13082_v4  ;;  %v13149_v3 = vld [vmem:[%s17150_s1 + $0x690] ss:$100 sps:$4 sm:$0xff]   ;;  %v13152_v4 = vld [vmem:[%s17150_s1 + $0x698] ss:$100 sps:$4 sm:$0xff]  }
 0x137   : > { %3015 = vmatpush1.bf16.msra.mxu0 %v13077_v6  ;;  %3056 = vmatpush1.bf16.msra.mxu1 %v13080_v7  ;;  %v13157_v6 = vld [vmem:[%s17150_s1 + $0x75c] ss:$100 sps:$4 sm:$0xff]   ;;  %v13160_v7 = vld [vmem:[%s17150_s1 + $0x764] ss:$100 sps:$4 sm:$0xff]  }
 0x138   : > { %3016 = vmatprep.subr.bf16.mxu0 %v13085_v8  ;;  %3057 = vmatprep.subr.bf16.mxu1 %v13088_v9  ;;  %v13155_v8 = vld [vmem:[%s17150_s1 + $0x758] ss:$100 sps:$4 sm:$0xff]   ;;  %v13158_v9 = vld [vmem:[%s17150_s1 + $0x760] ss:$100 sps:$4 sm:$0xff]  }
 0x13b   : > { %3017 = vmatpush1.bf16.msra.mxu0 %v13083_v10  ;;  %3058 = vmatpush1.bf16.msra.mxu1 %v13086_v11  ;;  %v13163_v10 = vld [vmem:[%s17150_s1 + $0x824] ss:$100 sps:$4 sm:$0xff]   ;;  %v13166_v11 = vld [vmem:[%s17150_s1 + $0x82c] ss:$100 sps:$4 sm:$0xff]  }
 0x13c   : > { %3018 = vmatprep.subr.bf16.mxu0 %v13091_v12  ;;  %3059 = vmatprep.subr.bf16.mxu1 %v13094_v13  ;;  %v13161_v12 = vld [vmem:[%s17150_s1 + $0x820] ss:$100 sps:$4 sm:$0xff]   ;;  %v13164_v13 = vld [vmem:[%s17150_s1 + $0x828] ss:$100 sps:$4 sm:$0xff]  }
 0x13f   : > { %3019 = vmatpush1.bf16.msra.mxu0 %v13089_v14  ;;  %3060 = vmatpush1.bf16.msra.mxu1 %v13092_v15  ;;  %v13169_v14 = vld [vmem:[%s17150_s1 + $0x8ec] ss:$100 sps:$4 sm:$0xff]   ;;  %v13172_v15 = vld [vmem:[%s17150_s1 + $0x8f4] ss:$100 sps:$4 sm:$0xff]  }
 0x140   : > { %3020 = vmatprep.subr.bf16.mxu0 %v13097_v16  ;;  %3061 = vmatprep.subr.bf16.mxu1 %v13100_v17  ;;  %v13167_v16 = vld [vmem:[%s17150_s1 + $0x8e8] ss:$100 sps:$4 sm:$0xff]   ;;  %v13170_v17 = vld [vmem:[%s17150_s1 + $0x8f0] ss:$100 sps:$4 sm:$0xff]  }
 0x143   : > { %3021 = vmatpush1.bf16.msra.mxu0 %v13095_v18  ;;  %3062 = vmatpush1.bf16.msra.mxu1 %v13098_v19  ;;  %v13175_v18 = vld [vmem:[%s17150_s1 + $0x9b4] ss:$100 sps:$4 sm:$0xff]   ;;  %v13178_v19 = vld [vmem:[%s17150_s1 + $0x9bc] ss:$100 sps:$4 sm:$0xff]  }
 0x144   : > { %3072 = vmatprep.subr.bf16.mxu0 %v13103_v20  ;;  %3113 = vmatprep.subr.bf16.mxu1 %v13106_v21  ;;  %v13173_v20 = vld [vmem:[%s17150_s1 + $0x9b0] ss:$100 sps:$4 sm:$0xff]   ;;  %v13176_v21 = vld [vmem:[%s17150_s1 + $0x9b8] ss:$100 sps:$4 sm:$0xff]  }
 0x146   : > { %3023 = vmatmul.mubr.bf16.vlgmr.msra.gmra.mrb[16].mxu0 %v14068_v5  ;;  %3064 = vmatmul.mubr.bf16.vlgmr.msra.gmra.mrb[16].mxu1 %v14068_v5 }
 0x147   : > { %3073 = vmatpush1.bf16.msra.mxu0 %v13101_v22  ;;  %3114 = vmatpush1.bf16.msra.mxu1 %v13104_v23  ;;  %v13181_v22 = vld [vmem:[%s17150_s1 + $0xa7c] ss:$100 sps:$4 sm:$0xff]   ;;  %v13184_v23 = vld [vmem:[%s17150_s1 + $0xa84] ss:$100 sps:$4 sm:$0xff]  }
 0x148   : > { %3074 = vmatprep.subr.bf16.mxu0 %v13109_v24  ;;  %3115 = vmatprep.subr.bf16.mxu1 %v13112_v25  ;;  %v13179_v24 = vld [vmem:[%s17150_s1 + $0xa78] ss:$100 sps:$4 sm:$0xff]   ;;  %v13182_v25 = vld [vmem:[%s17150_s1 + $0xa80] ss:$100 sps:$4 sm:$0xff]  }
 0x149   : > { %3104 = vmatprep.mubr.bf16.mxu0 %v14016_v52  ;;  %3145 = vmatprep.mubr.bf16.mxu1 %v14016_v52 }
 0x14b   : > { %3075 = vmatpush1.bf16.msra.mxu0 %v13107_v26  ;;  %3116 = vmatpush1.bf16.msra.mxu1 %v13110_v27  ;;  %v13187_v26 = vld [vmem:[%s17150_s1 + $0xb44] ss:$100 sps:$4 sm:$0xff]   ;;  %v13190_v27 = vld [vmem:[%s17150_s1 + $0xb4c] ss:$100 sps:$4 sm:$0xff]  }
 0x14c   : > { %3076 = vmatprep.subr.bf16.mxu0 %v13115_v28  ;;  %3117 = vmatprep.subr.bf16.mxu1 %v13118_v29  ;;  %v13185_v28 = vld [vmem:[%s17150_s1 + $0xb40] ss:$100 sps:$4 sm:$0xff]   ;;  %v13188_v29 = vld [vmem:[%s17150_s1 + $0xb48] ss:$100 sps:$4 sm:$0xff]  }
 0x14f   : > { %3077 = vmatpush1.bf16.msra.mxu0 %v13113_v30  ;;  %3118 = vmatpush1.bf16.msra.mxu1 %v13116_v31  ;;  %v13193_v30 = vld [vmem:[%s17150_s1 + $0xc0c] ss:$100 sps:$4 sm:$0xff]   ;;  %v13196_v31 = vld [vmem:[%s17150_s1 + $0xc14] ss:$100 sps:$4 sm:$0xff]  }
 0x150   : > { %3078 = vmatprep.subr.bf16.mxu0 %v13121_v32  ;;  %3119 = vmatprep.subr.bf16.mxu1 %v13124_v33  ;;  %v13191_v32 = vld [vmem:[%s17150_s1 + $0xc08] ss:$100 sps:$4 sm:$0xff]   ;;  %v13194_v33 = vld [vmem:[%s17150_s1 + $0xc10] ss:$100 sps:$4 sm:$0xff]  }
 0x153   : > { %3079 = vmatpush1.bf16.msra.mxu0 %v13119_v34  ;;  %3120 = vmatpush1.bf16.msra.mxu1 %v13122_v35  ;;  %v13197_v34 = vld [vmem:[%s17150_s1 + $0x6a0] ss:$100 sps:$4 sm:$0xff]  }
 0x154   : > { %3080 = vmatprep.subr.bf16.mxu0 %v13127_v37  ;;  %3121 = vmatprep.subr.bf16.mxu1 %v13130_v40  ;;  %v13198_v35 = vld [vmem:[%s17151_s2 + $0x660] sm:$0xff]   ;;  %v15071_v40 = vpack.c.bf16 %v14741_v39, %v14741_v39  ;;  %v13203_v39 = vld [vmem:[%s17150_s1 + $0x128] ss:$100 sps:$4 sm:$0xff]  }
 0x155   : > { %v13199_v37 = vld [vmem:[%s17150_s1 + $0x60] ss:$100 sps:$4 sm:$0xff]  }
 0x157   : > { %3081 = vmatpush1.bf16.msra.mxu0 %v13125_v42  ;;  %3122 = vmatpush1.bf16.msra.mxu1 %v13128_v43  ;;  %v13200_v42 = vld [vmem:[%s17151_s2 + $0x620] sm:$0xff]   ;;  %v13201_v43 = vld [vmem:[%s17150_s1 + $0x768] ss:$100 sps:$4 sm:$0xff]  }
 0x158   : > { %3082 = vmatprep.subr.bf16.mxu0 %v13133_v44  ;;  %3123 = vmatprep.subr.bf16.mxu1 %v13136_v45  ;;  %v13202_v44 = vld [vmem:[%s17151_s2 + $0x668] sm:$0xff]   ;;  %v4008_v45 = vshrl.u32 %v15071_v40, 16 }
 0x159   : > { %v14938_v50 = vpop.f32.mrb[4].mxu0  ;;  %v14943_v53 = vpop.f32.mrb[4].mxu1 }
 0x15a   : > { %v14945_v54 = vpop.f32.mrb[5].mxu0  ;;  %v14950_v56 = vpop.f32.mrb[5].mxu1 }
 0x15b   : > { %v2782_v57 = vpop.f32.mrb[6].mxu0  ;;  %3083 = vmatpush1.bf16.msra.mxu0 %v13131_v46  ;;  %3124 = vmatpush1.bf16.msra.mxu1 %v13134_v47  ;;  %v2823_v58 = vpop.f32.mrb[6].mxu1  ;;  %v13204_v46 = vld [vmem:[%s17151_s2 + $0x628] sm:$0xff]   ;;  %v13205_v47 = vld [vmem:[%s17150_s1 + $0x830] ss:$100 sps:$4 sm:$0xff]  }
 0x15c   : > { %v2783_v59 = vpop.f32.mrb[7].mxu0  ;;  %3084 = vmatprep.subr.bf16.mxu0 %v13139_v48  ;;  %3125 = vmatprep.subr.bf16.mxu1 %v13142_v49  ;;  %v2824_v62 = vpop.f32.mrb[7].mxu1  ;;  %v13206_v48 = vld [vmem:[%s17151_s2 + $0x670] sm:$0xff]   ;;  %v13210_v57 = vld [vmem:[%s17151_s2 + $0x678] sm:$0xff]  }
 0x15d   : > { %v13207_v49 = vld [vmem:[%s17150_s1 + $0x1f0] ss:$100 sps:$4 sm:$0xff]   ;;  %v13212_v58 = vld [vmem:[%s17151_s2 + $0x638] sm:$0xff]   ;;  %v13213_v59 = vld [vmem:[%s17150_s1 + $0x9c0] ss:$100 sps:$4 sm:$0xff]  }
 0x15e   : > { %v13216_v62 = vld [vmem:[%s17151_s2 + $0x640] sm:$0xff]  }
 0x15f   : > { %3085 = vmatpush1.bf16.msra.mxu0 %v13137_v51  ;;  %3126 = vmatpush1.bf16.msra.mxu1 %v13140_v55  ;;  %v13208_v51 = vld [vmem:[%s17151_s2 + $0x630] sm:$0xff]   ;;  %v13209_v55 = vld [vmem:[%s17150_s1 + $0x8f8] ss:$100 sps:$4 sm:$0xff]  }
 0x160   : > { %3086 = vmatprep.subr.bf16.mxu0 %v13145_v60  ;;  %3127 = vmatprep.subr.bf16.mxu1 %v13148_v61  ;;  %v13214_v60 = vld [vmem:[%s17151_s2 + $0x680] sm:$0xff]  }
 0x161   : > { %v13215_v61 = vld [vmem:[%s17150_s1 + $0x380] ss:$100 sps:$4 sm:$0xff]  }
 0x163   : > { %3087 = vmatpush1.bf16.msra.mxu0 %v13143_v63  ;;  %3128 = vmatpush1.bf16.msra.mxu1 %v13146_v0  ;;  %v13217_v63 = vld [vmem:[%s17150_s1 + $0xa88] ss:$100 sps:$4 sm:$0xff]  }
 0x164   : > { %3088 = vmatprep.subr.bf16.mxu0 %v13151_v1  ;;  %3129 = vmatprep.subr.bf16.mxu1 %v13154_v2  ;;  %v13218_v0 = vld [vmem:[%s17151_s2 + $0x688] sm:$0xff]  }
 0x165   : > { %v13219_v1 = vld [vmem:[%s17150_s1 + $0x448] ss:$100 sps:$4 sm:$0xff]  }
 0x166   : > { %v13220_v2 = vld [vmem:[%s17151_s2 + $0x648] sm:$0xff]  }
 0x167   : > { %3089 = vmatpush1.bf16.msra.mxu0 %v13149_v3  ;;  %3130 = vmatpush1.bf16.msra.mxu1 %v13152_v4  ;;  %v13221_v3 = vld [vmem:[%s17150_s1 + $0xb50] ss:$100 sps:$4 sm:$0xff]  }
 0x168   : > { %3090 = vmatprep.subr.bf16.mxu0 %v13157_v6  ;;  %3131 = vmatprep.subr.bf16.mxu1 %v13160_v7  ;;  %v13222_v4 = vld [vmem:[%s17151_s2 + $0x690] sm:$0xff]  }
 0x169   : > { %v13223_v7 = vld [vmem:[%s17150_s1 + $0x510] ss:$100 sps:$4 sm:$0xff]  }
 0x16b   : > { %3091 = vmatpush1.bf16.msra.mxu0 %v13155_v8  ;;  %3132 = vmatpush1.bf16.msra.mxu1 %v13158_v9 }
 0x16c   : > { %3092 = vmatprep.subr.bf16.mxu0 %v13163_v10  ;;  %3133 = vmatprep.subr.bf16.mxu1 %v13166_v11 }
 0x16f   : > { %3093 = vmatpush1.bf16.msra.mxu0 %v13161_v12  ;;  %3134 = vmatpush1.bf16.msra.mxu1 %v13164_v13  ;;  %v13224_v12 = vld [vmem:[%s17151_s2 + $0x650] sm:$0xff]  }
 0x170   : > { %3094 = vmatprep.subr.bf16.mxu0 %v13169_v14  ;;  %3135 = vmatprep.subr.bf16.mxu1 %v13172_v15  ;;  %v13225_v15 = vld [vmem:[%s17150_s1 + $0xc18] ss:$100 sps:$4 sm:$0xff]  }
 0x173   : > { %3095 = vmatpush1.bf16.msra.mxu0 %v13167_v16  ;;  %3136 = vmatpush1.bf16.msra.mxu1 %v13170_v17  ;;  %v13226_v16 = vld [vmem:[%s17151_s2 + $0x698] sm:$0xff]  }
 0x174   : > { %3096 = vmatprep.subr.bf16.mxu0 %v13175_v18  ;;  %3137 = vmatprep.subr.bf16.mxu1 %v13178_v19  ;;  %v13227_v18 = vld [vmem:[%s17150_s1 + $0x5d8] ss:$100 sps:$4 sm:$0xff]  }
 0x175   : > { %v13228_v19 = vld [vmem:[%s17151_s2 + $0x658] sm:$0xff]  }
 0x177   : > { %3097 = vmatpush1.bf16.msra.mxu0 %v13173_v20  ;;  %3138 = vmatpush1.bf16.msra.mxu1 %v13176_v21  ;;  %v13229_v20 = vld [vmem:[%s17151_s2 + $0x6e0] sm:$0xff]   ;;  %v15177_v21 = vpack.c.bf16 %v14734_v36, %v14734_v36 }
 0x178   : > { %3098 = vmatprep.subr.bf16.mxu0 %v13181_v22  ;;  %3139 = vmatprep.subr.bf16.mxu1 %v13184_v23  ;;  %v13230_v22 = vld [vmem:[%s17151_s2 + $0x760] sm:$0xff]   ;;  %v15184_v23 = vpack.c.bf16 %v14746_v41, %v14746_v41 }
 0x179   : > { %v13232_v36 = vld [vmem:[%s17151_s2 + $0x720] sm:$0xff]   ;;  %v4005_v41 = vshrl.u32 %v15177_v21, 16 }
 0x17b   : > { %3099 = vmatpush1.bf16.msra.mxu0 %v13179_v24  ;;  %3140 = vmatpush1.bf16.msra.mxu1 %v13182_v25  ;;  %v13231_v24 = vld [vmem:[%s17151_s2 + $0x6a0] sm:$0xff]   ;;  %v15191_v25 = vpack.c.bf16 %v14945_v54, %v14945_v54  ;;  %v4014_v54 = vshrl.u32 %v15184_v23, 16 }
 0x17c   : > { %3100 = vmatprep.subr.bf16.mxu0 %v13187_v26  ;;  %3141 = vmatprep.subr.bf16.mxu1 %v13190_v27  ;;  %v13233_v26 = vld [vmem:[%s17151_s2 + $0x6e8] sm:$0xff]  }
 0x17d   : > { %v13234_v27 = vld [vmem:[%s17151_s2 + $0x768] sm:$0xff]  }
 0x17f   : > { %3101 = vmatpush1.bf16.msra.mxu0 %v13185_v28  ;;  %3142 = vmatpush1.bf16.msra.mxu1 %v13188_v29  ;;  %v13235_v28 = vld [vmem:[%s17151_s2 + $0x6a8] sm:$0xff]   ;;  %v4020_v29 = vshrl.u32 %v15191_v25, 16 }
 0x180   : > { %3102 = vmatprep.subr.bf16.mxu0 %v13193_v30  ;;  %3143 = vmatprep.subr.bf16.mxu1 %v13196_v31  ;;  %v13236_v30 = vld [vmem:[%s17151_s2 + $0x728] sm:$0xff]   ;;  %v13237_v31 = vld [vmem:[%s17151_s2 + $0x6f0] sm:$0xff]  }
 0x183   : > { %3103 = vmatpush1.bf16.msra.mxu0 %v13191_v32  ;;  %3144 = vmatpush1.bf16.msra.mxu1 %v13194_v33  ;;  %v13238_v32 = vld [vmem:[%s17151_s2 + $0x770] sm:$0xff]  }
 0x184   : > { %11689 = vmatprep.subr.bf16.mxu0 %v13197_v34  ;;  %11711 = vmatprep.subr.bf16.mxu1 %v13198_v35  ;;  %v13240_v33 = vld [vmem:[%s17151_s2 + $0x730] sm:$0xff]   ;;  %v13241_v34 = vld [vmem:[%s17151_s2 + $0x6f8] sm:$0xff]  }
 0x185   : > { %v13242_v35 = vld [vmem:[%s17151_s2 + $0x778] sm:$0xff]  }
 0x186   : > { %3105 = vmatmul.mubr.bf16.vlgmr.msra.gmra.mrb[20].mxu0 %v14068_v5  ;;  %3146 = vmatmul.mubr.bf16.vlgmr.msra.gmra.mrb[20].mxu1 %v14068_v5 }
 0x187   : > { %11690 = vmatpush3.bf16.msra.mxu0 %v13199_v37  ;;  %11712 = vmatpush3.bf16.msra.mxu1 %v13200_v42  ;;  %v13243_v37 = vld [vmem:[%s17151_s2 + $0x6b8] sm:$0xff]  }
 0x188   : > { %5315 = vmatprep.mubr.bf16.mxu1 %v4008_v45  ;;  %11691 = vmatprep.subr.bf16.mxu0 %v13201_v43  ;;  %v13244_v42 = vld [vmem:[%s17151_s2 + $0x738] sm:$0xff]   ;;  %v13245_v43 = vld [vmem:[%s17151_s2 + $0x700] sm:$0xff]  }
 0x189   : > { %11713 = vmatprep.subr.bf16.mxu1 %v13202_v44  ;;  %3186 = vmatprep.mubr.bf16.mxu0 %v14016_v52  ;;  %v13211_v52 = vld [vmem:[%s17150_s1 + $0x2b8] ss:$100 sps:$4 sm:$0xff]   ;;  %v13246_v44 = vld [vmem:[%s17151_s2 + $0x780] sm:$0xff]  }
 0x18a   : > { %v13248_v45 = vld [vmem:[%s17151_s2 + $0x740] sm:$0xff]  }
 0x18b   : > { %11692 = vmatpush3.bf16.msra.mxu0 %v13203_v39  ;;  %11714 = vmatpush3.bf16.msra.mxu1 %v13204_v46  ;;  %v13247_v39 = vld [vmem:[%s17151_s2 + $0x6c0] sm:$0xff]   ;;  %v13249_v46 = vld [vmem:[%s17151_s2 + $0x708] sm:$0xff]  }
 0x18c   : > { %11693 = vmatprep.subr.bf16.mxu0 %v13205_v47  ;;  %11715 = vmatprep.subr.bf16.mxu1 %v13206_v48  ;;  %v13250_v47 = vld [vmem:[%s17151_s2 + $0x788] sm:$0xff]  }
 0x18d   : > { %v13251_v48 = vld [vmem:[%s17151_s2 + $0x6c8] sm:$0xff]  }
 0x18f   : > { %11694 = vmatpush3.bf16.msra.mxu0 %v13207_v49  ;;  %11716 = vmatpush3.bf16.msra.mxu1 %v13208_v51  ;;  %v13252_v49 = vld [vmem:[%s17151_s2 + $0x748] sm:$0xff]   ;;  %v13253_v51 = vld [vmem:[%s17151_s2 + $0x710] sm:$0xff]  }
 0x190   : > { %11695 = vmatprep.subr.bf16.mxu0 %v13209_v55  ;;  %11717 = vmatprep.subr.bf16.mxu1 %v13210_v57  ;;  %v13254_v55 = vld [vmem:[%s17151_s2 + $0x790] sm:$0xff]  }
 0x191   : > { %v13255_v57 = vld [vmem:[%s17151_s2 + $0x6d0] sm:$0xff]  }
 0x193   : > { %11696 = vmatpush3.bf16.msra.mxu0 %v13211_v52  ;;  %11718 = vmatpush3.bf16.msra.mxu1 %v13212_v58  ;;  %v13256_v52 = vld [vmem:[%s17151_s2 + $0x750] sm:$0xff]   ;;  %v13257_v58 = vld [vmem:[%s17151_s2 + $0x718] sm:$0xff]  }
 0x194   : > { %11697 = vmatprep.subr.bf16.mxu0 %v13213_v59  ;;  %11719 = vmatprep.subr.bf16.mxu1 %v13214_v60  ;;  %v13258_v59 = vld [vmem:[%s17151_s2 + $0x798] sm:$0xff]   ;;  %v15280_v60 = vpack.c.bf16 %v14739_v38, %v14739_v38  ;;  %v13262_v38 = vld [vmem:[%s17151_s2 + $0x860] sm:$0xff]  }
 0x197   : > { %11698 = vmatpush3.bf16.msra.mxu0 %v13215_v61  ;;  %11720 = vmatpush3.bf16.msra.mxu1 %v13216_v62  ;;  %v15284_v61 = vpack.c.bf16 %v14938_v50, %v14938_v50  ;;  %v13259_v62 = vld [vmem:[%s17151_s2 + $0x6d8] sm:$0xff]   ;;  %v13263_v50 = vld [vmem:[%s17151_s2 + $0x7a0] sm:$0xff]  }
 0x198   : > { %11699 = vmatprep.subr.bf16.mxu0 %v13217_v63  ;;  %11721 = vmatprep.subr.bf16.mxu1 %v13218_v0  ;;  %v13260_v63 = vld [vmem:[%s17151_s2 + $0x758] sm:$0xff]   ;;  %v13261_v0 = vld [vmem:[%s17151_s2 + $0x7e0] sm:$0xff]  }
 0x199   : > { %v15146_v6 = vpop.f32.mrb[8].mxu0  ;;  %v15151_v8 = vpop.f32.mrb[8].mxu1 }
 0x19a   : > { %v15153_v9 = vpop.f32.mrb[9].mxu0  ;;  %v15155_v10 = vpop.f32.mrb[9].mxu1 }
 0x19b   : > { %v2864_v11 = vpop.f32.mrb[10].mxu0  ;;  %11700 = vmatpush3.bf16.msra.mxu0 %v13219_v1  ;;  %11722 = vmatpush3.bf16.msra.mxu1 %v13220_v2  ;;  %v2905_v13 = vpop.f32.mrb[10].mxu1  ;;  %v15303_v1 = vpack.c.bf16 %v14950_v56, %v14950_v56  ;;  %v4011_v2 = vshrl.u32 %v15280_v60, 16 }
 0x19c   : > { %v2865_v14 = vpop.f32.mrb[11].mxu0  ;;  %11701 = vmatprep.subr.bf16.mxu0 %v13221_v3  ;;  %11723 = vmatprep.subr.bf16.mxu1 %v13222_v4  ;;  %v2906_v17 = vpop.f32.mrb[11].mxu1  ;;  %v4017_v3 = vshrl.u32 %v15284_v61, 16  ;;  %v15309_v4 = vpack.c.bf16 %v15153_v9, %v15153_v9  ;;  %v13265_v11 = vld [vmem:[%s17151_s2 + $0x7e8] sm:$0xff]  }
 0x19d   : > { %v4026_v56 = vshrl.u32 %v15303_v1, 16  ;;  %v13266_v9 = vld [vmem:[%s17151_s2 + $0x868] sm:$0xff]   ;;  %v13271_v17 = vld [vmem:[%s17151_s2 + $0x7b0] sm:$0xff]  }
 0x19e   : > { %v13267_v13 = vld [vmem:[%s17151_s2 + $0x7a8] sm:$0xff]  }
 0x19f   : > { %11702 = vmatpush3.bf16.msra.mxu0 %v13223_v7  ;;  %11724 = vmatpush3.bf16.msra.mxu1 %v13224_v12  ;;  %v13264_v7 = vld [vmem:[%s17151_s2 + $0x820] sm:$0xff]   ;;  %v4032_v12 = vshrl.u32 %v15309_v4, 16  ;;  %v13268_v14 = vld [vmem:[%s17151_s2 + $0x828] sm:$0xff]  }
 0x1a0   : > { %11703 = vmatprep.subr.bf16.mxu0 %v13225_v15  ;;  %11725 = vmatprep.subr.bf16.mxu1 %v13226_v16  ;;  %v13269_v15 = vld [vmem:[%s17151_s2 + $0x7f0] sm:$0xff]  }
 0x1a1   : > { %v13270_v16 = vld [vmem:[%s17151_s2 + $0x870] sm:$0xff]  }
 0x1a3   : > { %11704 = vmatpush3.bf16.msra.mxu0 %v13227_v18  ;;  %11726 = vmatpush3.bf16.msra.mxu1 %v13228_v19  ;;  %v13272_v18 = vld [vmem:[%s17151_s2 + $0x830] sm:$0xff]   ;;  %v13273_v19 = vld [vmem:[%s17151_s2 + $0x7f8] sm:$0xff]  }
 0x1a4   : > { %11733 = vmatprep.subr.bf16.mxu0 %v13229_v20  ;;  %11755 = vmatprep.subr.bf16.mxu1 %v13230_v22  ;;  %v13274_v20 = vld [vmem:[%s17151_s2 + $0x878] sm:$0xff]  }
 0x1a5   : > { %v13275_v22 = vld [vmem:[%s17151_s2 + $0x7b8] sm:$0xff]  }
 0x1a6   : > { %3187 = vmatmul.mubr.bf16.vlgmr.msra.gmra.mrb[24].mxu0 %v14068_v5  ;;  %5316 = vmatmul.mubr.bf16.vlgmr.msra.gmra.mrb[24].mxu1 %v4005_v41  ;;  %v13239_v5 = vld [vmem:[%s17151_s2 + $0x6b0] sm:$0xff]   ;;  %v13279_v41 = vld [vmem:[%s17151_s2 + $0x7c0] sm:$0xff]  }
 0x1a7   : > { %11734 = vmatpush3.bf16.msra.mxu0 %v13231_v24  ;;  %5355 = vmatprep.mubr.bf16.mxu0 %v4014_v54  ;;  %v13276_v24 = vld [vmem:[%s17151_s2 + $0x838] sm:$0xff]   ;;  %v13281_v54 = vld [vmem:[%s17151_s2 + $0x808] sm:$0xff]  }
 0x1a8   : > { %11756 = vmatpush3.bf16.msra.mxu1 %v13232_v36  ;;  %5395 = vmatprep.mubr.bf16.mxu1 %v4020_v29  ;;  %v13277_v36 = vld [vmem:[%s17151_s2 + $0x800] sm:$0xff]   ;;  %v13283_v29 = vld [vmem:[%s17151_s2 + $0x7c8] sm:$0xff]  }
 0x1a9   : > { %11735 = vmatprep.subr.bf16.mxu0 %v13233_v26  ;;  %11757 = vmatprep.subr.bf16.mxu1 %v13234_v27  ;;  %v13278_v26 = vld [vmem:[%s17151_s2 + $0x880] sm:$0xff]  }
 0x1aa   : > { %v13280_v27 = vld [vmem:[%s17151_s2 + $0x840] sm:$0xff]  }
 0x1ab   : > { %11736 = vmatpush3.bf16.msra.mxu0 %v13235_v28  ;;  %v13282_v28 = vld [vmem:[%s17151_s2 + $0x888] sm:$0xff]  }
 0x1ac   : > { %11758 = vmatpush3.bf16.msra.mxu1 %v13236_v30  ;;  %11737 = vmatprep.subr.bf16.mxu0 %v13237_v31  ;;  %v13284_v30 = vld [vmem:[%s17151_s2 + $0x848] sm:$0xff]   ;;  %v13285_v31 = vld [vmem:[%s17151_s2 + $0x810] sm:$0xff]  }
 0x1ad   : > { %11759 = vmatprep.subr.bf16.mxu1 %v13238_v32 }
 0x1af   : > { %11738 = vmatpush3.bf16.msra.mxu0 %v13239_v5  ;;  %v13286_v5 = vld [vmem:[%s17151_s2 + $0x890] sm:$0xff]  }
 0x1b0   : > { %11760 = vmatpush3.bf16.msra.mxu1 %v13240_v33  ;;  %11739 = vmatprep.subr.bf16.mxu0 %v13241_v34 }
 0x1b1   : > { %11761 = vmatprep.subr.bf16.mxu1 %v13242_v35 }
 0x1b3   : > { %11740 = vmatpush3.bf16.msra.mxu0 %v13243_v37 }
 0x1b4   : > { %11762 = vmatpush3.bf16.msra.mxu1 %v13244_v42  ;;  %11741 = vmatprep.subr.bf16.mxu0 %v13245_v43  ;;  %v13287_v42 = vld [vmem:[%s17151_s2 + $0x7d0] sm:$0xff]  }
 0x1b5   : > { %11763 = vmatprep.subr.bf16.mxu1 %v13246_v44  ;;  %v15393_v44 = vpack.c.bf16 %v14943_v53, %v14943_v53  ;;  %v13290_v53 = vld [vmem:[%s17151_s2 + $0x898] sm:$0xff]  }
 0x1b7   : > { %11742 = vmatpush3.bf16.msra.mxu0 %v13247_v39  ;;  %v15397_v39 = vpack.c.bf16 %v15146_v6, %v15146_v6  ;;  %v13291_v6 = vld [vmem:[%s17151_s2 + $0x7d8] sm:$0xff]  }
 0x1b8   : > { %11764 = vmatpush3.bf16.msra.mxu1 %v13248_v45  ;;  %11743 = vmatprep.subr.bf16.mxu0 %v13249_v46  ;;  %v13288_v46 = vld [vmem:[%s17151_s2 + $0x850] sm:$0xff]  }
 0x1b9   : > { %11765 = vmatprep.subr.bf16.mxu1 %v13250_v47  ;;  %v13289_v47 = vld [vmem:[%s17151_s2 + $0x818] sm:$0xff]  }
 0x1bb   : > { %11744 = vmatpush3.bf16.msra.mxu0 %v13251_v48 }
 0x1bc   : > { %11766 = vmatpush3.bf16.msra.mxu1 %v13252_v49  ;;  %11745 = vmatprep.subr.bf16.mxu0 %v13253_v51  ;;  %v13292_v49 = vld [vmem:[%s17151_s2 + $0x858] sm:$0xff]   ;;  %v4023_v51 = vshrl.u32 %v15393_v44, 16 }
 0x1bd   : > { %11767 = vmatprep.subr.bf16.mxu1 %v13254_v55  ;;  %v4029_v55 = vshrl.u32 %v15397_v39, 16 }
 0x1bf   : > { %11746 = vmatpush3.bf16.msra.mxu0 %v13255_v57  ;;  %v13293_v57 = vld [vmem:[%s17151_s2 + $0x8e0] sm:$0xff]  }
 0x1c0   : > { %11768 = vmatpush3.bf16.msra.mxu1 %v13256_v52  ;;  %11747 = vmatprep.subr.bf16.mxu0 %v13257_v58  ;;  %v13294_v52 = vld [vmem:[%s17151_s2 + $0x960] sm:$0xff]  }
 0x1c1   : > { %11769 = vmatprep.subr.bf16.mxu1 %v13258_v59  ;;  %v13295_v58 = vld [vmem:[%s17151_s2 + $0x8a0] sm:$0xff]   ;;  %v15427_v59 = vpack.c.bf16 %v15155_v10, %v15155_v10 }
 0x1c3   : > { %11748 = vmatpush3.bf16.msra.mxu0 %v13259_v62  ;;  %v13296_v62 = vld [vmem:[%s17151_s2 + $0x920] sm:$0xff]   ;;  %v4038_v10 = vshrl.u32 %v15427_v59, 16 }
 0x1c4   : > { %11770 = vmatpush3.bf16.msra.mxu1 %v13260_v63  ;;  %11777 = vmatprep.subr.bf16.mxu0 %v13261_v0  ;;  %v13297_v0 = vld [vmem:[%s17151_s2 + $0x8e8] sm:$0xff]  }
 0x1c5   : > { %11799 = vmatprep.subr.bf16.mxu1 %v13262_v38  ;;  %v13298_v38 = vld [vmem:[%s17151_s2 + $0x968] sm:$0xff]  }
 0x1c6   : > { %5356 = vmatmul.mubr.bf16.vlgmr.msra.gmra.mrb[28].mxu0 %v4011_v2  ;;  %v13300_v2 = vld [vmem:[%s17151_s2 + $0x928] sm:$0xff]  }
 0x1c7   : > { %5396 = vmatmul.mubr.bf16.vlgmr.msra.gmra.mrb[28].mxu1 %v4017_v3  ;;  %11778 = vmatpush3.bf16.msra.mxu0 %v13263_v50  ;;  %v13299_v50 = vld [vmem:[%s17151_s2 + $0x8a8] sm:$0xff]  }
 0x1c8   : > { %5435 = vmatprep.mubr.bf16.mxu0 %v4026_v56  ;;  %11800 = vmatpush3.bf16.msra.mxu1 %v13264_v7  ;;  %v13301_v7 = vld [vmem:[%s17151_s2 + $0x8f0] sm:$0xff]  }
 0x1c9   : > { %5475 = vmatprep.mubr.bf16.mxu1 %v4032_v12  ;;  %11779 = vmatprep.subr.bf16.mxu0 %v13265_v11  ;;  %v13302_v11 = vld [vmem:[%s17151_s2 + $0x970] sm:$0xff]   ;;  %v13305_v12 = vld [vmem:[%s17151_s2 + $0x8f8] sm:$0xff]  }
 0x1ca   : > { %11801 = vmatprep.subr.bf16.mxu1 %v13266_v9  ;;  %v13303_v56 = vld [vmem:[%s17151_s2 + $0x8b0] sm:$0xff]  }
 0x1cb   : > { %11780 = vmatpush3.bf16.msra.mxu0 %v13267_v13  ;;  %v13304_v9 = vld [vmem:[%s17151_s2 + $0x930] sm:$0xff]   ;;  %v13306_v13 = vld [vmem:[%s17151_s2 + $0x978] sm:$0xff]  }
 0x1cc   : > { %11802 = vmatpush3.bf16.msra.mxu1 %v13268_v14  ;;  %11781 = vmatprep.subr.bf16.mxu0 %v13269_v15  ;;  %v13307_v14 = vld [vmem:[%s17151_s2 + $0x8b8] sm:$0xff]  }
 0x1cd   : > { %11803 = vmatprep.subr.bf16.mxu1 %v13270_v16  ;;  %v13308_v15 = vld [vmem:[%s17151_s2 + $0x938] sm:$0xff]   ;;  %v13309_v16 = vld [vmem:[%s17151_s2 + $0x900] sm:$0xff]  }
 0x1cf   : > { %11782 = vmatpush3.bf16.msra.mxu0 %v13271_v17  ;;  %v13310_v17 = vld [vmem:[%s17151_s2 + $0x980] sm:$0xff]  }
 0x1d0   : > { %11804 = vmatpush3.bf16.msra.mxu1 %v13272_v18  ;;  %11783 = vmatprep.subr.bf16.mxu0 %v13273_v19  ;;  %v13311_v18 = vld [vmem:[%s17151_s2 + $0x8c0] sm:$0xff]  }
 0x1d1   : > { %11805 = vmatprep.subr.bf16.mxu1 %v13274_v20  ;;  %v13312_v19 = vld [vmem:[%s17151_s2 + $0x940] sm:$0xff]   ;;  %v13313_v20 = vld [vmem:[%s17151_s2 + $0x908] sm:$0xff]  }
 0x1d3   : > { %11784 = vmatpush3.bf16.msra.mxu0 %v13275_v22  ;;  %v13314_v22 = vld [vmem:[%s17151_s2 + $0x988] sm:$0xff]  }
 0x1d4   : > { %11806 = vmatpush3.bf16.msra.mxu1 %v13276_v24  ;;  %11785 = vmatprep.subr.bf16.mxu0 %v13277_v36  ;;  %v13315_v24 = vld [vmem:[%s17151_s2 + $0x8c8] sm:$0xff]  }
 0x1d5   : > { %11807 = vmatprep.subr.bf16.mxu1 %v13278_v26  ;;  %v13316_v36 = vld [vmem:[%s17151_s2 + $0x948] sm:$0xff]   ;;  %v13317_v26 = vld [vmem:[%s17151_s2 + $0x910] sm:$0xff]  }
 0x1d7   : > { %11786 = vmatpush3.bf16.msra.mxu0 %v13279_v41  ;;  %v13318_v41 = vld [vmem:[%s17151_s2 + $0x990] sm:$0xff]  }
 0x1d8   : > { %11808 = vmatpush3.bf16.msra.mxu1 %v13280_v27  ;;  %11787 = vmatprep.subr.bf16.mxu0 %v13281_v54  ;;  %v13319_v27 = vld [vmem:[%s17151_s2 + $0x8d0] sm:$0xff]  }
 0x1d9   : > { %v15379_v32 = vpop.f32.mrb[12].mxu0  ;;  %11809 = vmatprep.subr.bf16.mxu1 %v13282_v28  ;;  %v15384_v33 = vpop.f32.mrb[12].mxu1  ;;  %v13320_v54 = vld [vmem:[%s17151_s2 + $0x950] sm:$0xff]   ;;  %v13321_v28 = vld [vmem:[%s17151_s2 + $0x918] sm:$0xff]  }
 0x1da   : > { %v2944_v34 = vpop.f32.mrb[13].mxu0  ;;  %v15386_v35 = vpop.f32.mrb[13].mxu1 }
 0x1db   : > { %v2946_v37 = vpop.f32.mrb[14].mxu0  ;;  %11788 = vmatpush3.bf16.msra.mxu0 %v13283_v29  ;;  %v2987_v43 = vpop.f32.mrb[14].mxu1  ;;  %v15432_v63 = vpack.c.bf16 %v2944_v34, %v2944_v34  ;;  %v13322_v29 = vld [vmem:[%s17151_s2 + $0x998] sm:$0xff]   ;;  %v15527_v34 = vpack.c.bf16 %v15386_v35, %v15386_v35  ;;  %v13328_v35 = vld [vmem:[%s17151_s2 + $0xa20] sm:$0xff]  }
 0x1dc   : > { %11810 = vmatpush3.bf16.msra.mxu1 %v13284_v30  ;;  %v2947_v45 = vpop.f32.mrb[15].mxu0  ;;  %11789 = vmatprep.subr.bf16.mxu0 %v13285_v31  ;;  %v2988_v48 = vpop.f32.mrb[15].mxu1  ;;  %v13323_v30 = vld [vmem:[%s17151_s2 + $0x8d8] sm:$0xff]   ;;  %v15519_v31 = vpack.c.bf16 %v15151_v8, %v15151_v8  ;;  %v13326_v8 = vld [vmem:[%s17151_s2 + $0xa60] sm:$0xff]  }
 0x1dd   : > { %11811 = vmatprep.subr.bf16.mxu1 %v13286_v5  ;;  %v4044_v3 = vshrl.u32 %v15432_v63, 16  ;;  %v15523_v5 = vpack.c.bf16 %v15379_v32, %v15379_v32  ;;  %v13324_v37 = vld [vmem:[%s17151_s2 + $0x958] sm:$0xff]   ;;  %v13327_v32 = vld [vmem:[%s17151_s2 + $0x9a0] sm:$0xff]   ;;  %v13330_v48 = vld [vmem:[%s17151_s2 + $0xa68] sm:$0xff]  }
 0x1de   : > { %v4035_v43 = vshrl.u32 %v15519_v31, 16 }
 0x1df   : > { %11790 = vmatpush3.bf16.msra.mxu0 %v13287_v42  ;;  %v13325_v42 = vld [vmem:[%s17151_s2 + $0x9e0] sm:$0xff]   ;;  %v4041_v45 = vshrl.u32 %v15523_v5, 16 }
 0x1e0   : > { %11812 = vmatpush3.bf16.msra.mxu1 %v13288_v46  ;;  %11791 = vmatprep.subr.bf16.mxu0 %v13289_v47  ;;  %v4050_v46 = vshrl.u32 %v15527_v34, 16  ;;  %v13329_v47 = vld [vmem:[%s17151_s2 + $0x9e8] sm:$0xff]  }
 0x1e1   : > { %11813 = vmatprep.subr.bf16.mxu1 %v13290_v53  ;;  %v13331_v53 = vld [vmem:[%s17151_s2 + $0x9a8] sm:$0xff]  }
 0x1e3   : > { %11792 = vmatpush3.bf16.msra.mxu0 %v13291_v6  ;;  %v13332_v6 = vld [vmem:[%s17151_s2 + $0xa28] sm:$0xff]  }
 0x1e4   : > { %11814 = vmatpush3.bf16.msra.mxu1 %v13292_v49  ;;  %11821 = vmatprep.subr.bf16.mxu0 %v13293_v57  ;;  %v13333_v49 = vld [vmem:[%s17151_s2 + $0x9f0] sm:$0xff]  }
 0x1e5   : > { %11843 = vmatprep.subr.bf16.mxu1 %v13294_v52  ;;  %v13336_v57 = vld [vmem:[%s17151_s2 + $0xa30] sm:$0xff]   ;;  %v13337_v52 = vld [vmem:[%s17151_s2 + $0x9f8] sm:$0xff]  }
 0x1e6   : > { %5436 = vmatmul.mubr.bf16.vlgmr.msra.gmra.mrb[32].mxu0 %v4023_v51  ;;  %v13334_v51 = vld [vmem:[%s17151_s2 + $0xa70] sm:$0xff]  }
 0x1e7   : > { %5476 = vmatmul.mubr.bf16.vlgmr.msra.gmra.mrb[32].mxu1 %v4029_v55  ;;  %11822 = vmatpush3.bf16.msra.mxu0 %v13295_v58  ;;  %v13335_v55 = vld [vmem:[%s17151_s2 + $0x9b0] sm:$0xff]   ;;  %v13338_v58 = vld [vmem:[%s17151_s2 + $0xa78] sm:$0xff]  }
 0x1e8   : > { %5515 = vmatprep.mubr.bf16.mxu0 %v4038_v10  ;;  %11844 = vmatpush3.bf16.msra.mxu1 %v13296_v62  ;;  %v13339_v62 = vld [vmem:[%s17151_s2 + $0x9b8] sm:$0xff]   ;;  %v13342_v10 = vld [vmem:[%s17151_s2 + $0xa80] sm:$0xff]  }
 0x1e9   : > { %5555 = vmatprep.mubr.bf16.mxu1 %v4044_v3  ;;  %11823 = vmatprep.subr.bf16.mxu0 %v13297_v0  ;;  %v13340_v0 = vld [vmem:[%s17151_s2 + $0xa38] sm:$0xff]   ;;  %v13345_v3 = vld [vmem:[%s17151_s2 + $0xa08] sm:$0xff]  }
 0x1ea   : > { %11845 = vmatprep.subr.bf16.mxu1 %v13298_v38  ;;  %v13341_v38 = vld [vmem:[%s17151_s2 + $0xa00] sm:$0xff]  }
 0x1eb   : > { %11824 = vmatpush3.bf16.msra.mxu0 %v13299_v50  ;;  %v13343_v50 = vld [vmem:[%s17151_s2 + $0x9c0] sm:$0xff]  }
 0x1ec   : > { %11846 = vmatpush3.bf16.msra.mxu1 %v13300_v2  ;;  %11825 = vmatprep.subr.bf16.mxu0 %v13301_v7  ;;  %v13344_v2 = vld [vmem:[%s17151_s2 + $0xa40] sm:$0xff]   ;;  %v13346_v7 = vld [vmem:[%s17151_s2 + $0xa88] sm:$0xff]  }
 0x1ed   : > { %11847 = vmatprep.subr.bf16.mxu1 %v13302_v11  ;;  %v13347_v11 = vld [vmem:[%s17151_s2 + $0x9c8] sm:$0xff]  }
 0x1ef   : > { %11826 = vmatpush3.bf16.msra.mxu0 %v13303_v56  ;;  %v13348_v56 = vld [vmem:[%s17151_s2 + $0xa48] sm:$0xff]  }
 0x1f0   : > { %11848 = vmatpush3.bf16.msra.mxu1 %v13304_v9  ;;  %11827 = vmatprep.subr.bf16.mxu0 %v13305_v12  ;;  %v13349_v9 = vld [vmem:[%s17151_s2 + $0xa10] sm:$0xff]  }
 0x1f1   : > { %11849 = vmatprep.subr.bf16.mxu1 %v13306_v13  ;;  %v13350_v13 = vld [vmem:[%s17151_s2 + $0xa90] sm:$0xff]  }
 0x1f3   : > { %11828 = vmatpush3.bf16.msra.mxu0 %v13307_v14 }
 0x1f4   : > { %11850 = vmatpush3.bf16.msra.mxu1 %v13308_v15  ;;  %11829 = vmatprep.subr.bf16.mxu0 %v13309_v16 }
 0x1f5   : > { %11851 = vmatprep.subr.bf16.mxu1 %v13310_v17 }
 0x1f7   : > { %11830 = vmatpush3.bf16.msra.mxu0 %v13311_v18 }
 0x1f8   : > { %11852 = vmatpush3.bf16.msra.mxu1 %v13312_v19  ;;  %11831 = vmatprep.subr.bf16.mxu0 %v13313_v20  ;;  %v13351_v19 = vld [vmem:[%s17151_s2 + $0x9d0] sm:$0xff]  }
 0x1f9   : > { %11853 = vmatprep.subr.bf16.mxu1 %v13314_v22 }
 0x1fb   : > { %11832 = vmatpush3.bf16.msra.mxu0 %v13315_v24  ;;  %v13352_v24 = vld [vmem:[%s17151_s2 + $0xa50] sm:$0xff]  }
 0x1fc   : > { %11854 = vmatpush3.bf16.msra.mxu1 %v13316_v36  ;;  %11833 = vmatprep.subr.bf16.mxu0 %v13317_v26  ;;  %v13353_v36 = vld [vmem:[%s17151_s2 + $0xa18] sm:$0xff]  }
 0x1fd   : > { %11855 = vmatprep.subr.bf16.mxu1 %v13318_v41 }
 0x1ff   : > { %11834 = vmatpush3.bf16.msra.mxu0 %v13319_v27  ;;  %v13354_v27 = vld [vmem:[%s17151_s2 + $0xa98] sm:$0xff]  }
 0x200   : > { %11856 = vmatpush3.bf16.msra.mxu1 %v13320_v54  ;;  %11835 = vmatprep.subr.bf16.mxu0 %v13321_v28  ;;  %v13355_v54 = vld [vmem:[%s17151_s2 + $0x9d8] sm:$0xff]   ;;  %v15635_v28 = vpack.c.bf16 %v15384_v33, %v15384_v33  ;;  %v13358_v33 = vld [vmem:[%s17151_s2 + $0xaa0] sm:$0xff]  }
 0x201   : > { %11857 = vmatprep.subr.bf16.mxu1 %v13322_v29 }
 0x203   : > { %11836 = vmatpush3.bf16.msra.mxu0 %v13323_v30  ;;  %v13356_v30 = vld [vmem:[%s17151_s2 + $0xa58] sm:$0xff]  }
 0x204   : > { %11858 = vmatpush3.bf16.msra.mxu1 %v13324_v37  ;;  %11865 = vmatprep.subr.bf16.mxu0 %v13325_v42  ;;  %v13357_v42 = vld [vmem:[%s17151_s2 + $0xae0] sm:$0xff]  }
 0x205   : > { %11887 = vmatprep.subr.bf16.mxu1 %v13326_v8  ;;  %v13371_v8 = vld [vmem:[%s17151_s2 + $0xb60] sm:$0xff]  }
 0x206   : > { %5516 = vmatmul.mubr.bf16.vlgmr.msra.gmra.mrb[36].mxu0 %v4035_v43  ;;  %v4047_v43 = vshrl.u32 %v15635_v28, 16 }
 0x207   : > { %5556 = vmatmul.mubr.bf16.vlgmr.msra.gmra.mrb[36].mxu1 %v4041_v45  ;;  %11866 = vmatpush3.bf16.msra.mxu0 %v13327_v32  ;;  %v13359_v32 = vld [vmem:[%s17151_s2 + $0xae8] sm:$0xff]  }
 0x208   : > { %11888 = vmatpush3.bf16.msra.mxu1 %v13328_v35  ;;  %5595 = vmatprep.mubr.bf16.mxu0 %v4050_v46  ;;  %v13372_v35 = vld [vmem:[%s17151_s2 + $0xb20] sm:$0xff]   ;;  %v13375_v46 = vld [vmem:[%s17151_s2 + $0xb68] sm:$0xff]  }
 0x209   : > { %11867 = vmatprep.subr.bf16.mxu0 %v13329_v47  ;;  %11889 = vmatprep.subr.bf16.mxu1 %v13330_v48  ;;  %v13360_v48 = vld [vmem:[%s17151_s2 + $0xaa8] sm:$0xff]  }
 0x20b   : > { %11868 = vmatpush3.bf16.msra.mxu0 %v13331_v53  ;;  %v13361_v53 = vld [vmem:[%s17151_s2 + $0xaf0] sm:$0xff]  }
 0x20c   : > { %11890 = vmatpush3.bf16.msra.mxu1 %v13332_v6  ;;  %11869 = vmatprep.subr.bf16.mxu0 %v13333_v49  ;;  %v13376_v6 = vld [vmem:[%s17151_s2 + $0xb28] sm:$0xff]   ;;  %v13379_v49 = vld [vmem:[%s17151_s2 + $0xb70] sm:$0xff]  }
 0x20d   : > { %11891 = vmatprep.subr.bf16.mxu1 %v13334_v51  ;;  %v13362_v51 = vld [vmem:[%s17151_s2 + $0xab0] sm:$0xff]  }
 0x20f   : > { %11870 = vmatpush3.bf16.msra.mxu0 %v13335_v55  ;;  %v13363_v55 = vld [vmem:[%s17151_s2 + $0xaf8] sm:$0xff]  }
 0x210   : > { %11892 = vmatpush3.bf16.msra.mxu1 %v13336_v57  ;;  %11871 = vmatprep.subr.bf16.mxu0 %v13337_v52  ;;  %v13380_v57 = vld [vmem:[%s17151_s2 + $0xb30] sm:$0xff]   ;;  %v13383_v52 = vld [vmem:[%s17151_s2 + $0xb78] sm:$0xff]  }
 0x211   : > { %11893 = vmatprep.subr.bf16.mxu1 %v13338_v58  ;;  %v13364_v58 = vld [vmem:[%s17151_s2 + $0xab8] sm:$0xff]  }
 0x213   : > { %11872 = vmatpush3.bf16.msra.mxu0 %v13339_v62  ;;  %v13365_v62 = vld [vmem:[%s17151_s2 + $0xb00] sm:$0xff]  }
 0x214   : > { %11894 = vmatpush3.bf16.msra.mxu1 %v13340_v0  ;;  %11873 = vmatprep.subr.bf16.mxu0 %v13341_v38  ;;  %v13384_v0 = vld [vmem:[%s17151_s2 + $0xb38] sm:$0xff]   ;;  %v13387_v38 = vld [vmem:[%s17151_s2 + $0xb80] sm:$0xff]  }
 0x215   : > { %11895 = vmatprep.subr.bf16.mxu1 %v13342_v10  ;;  %v13366_v10 = vld [vmem:[%s17151_s2 + $0xac0] sm:$0xff]  }
 0x217   : > { %11874 = vmatpush3.bf16.msra.mxu0 %v13343_v50  ;;  %v13367_v50 = vld [vmem:[%s17151_s2 + $0xb08] sm:$0xff]  }
 0x218   : > { %11896 = vmatpush3.bf16.msra.mxu1 %v13344_v2  ;;  %11875 = vmatprep.subr.bf16.mxu0 %v13345_v3  ;;  %v13388_v2 = vld [vmem:[%s17151_s2 + $0xb40] sm:$0xff]   ;;  %v13391_v3 = vld [vmem:[%s17151_s2 + $0xb88] sm:$0xff]  }
 0x219   : > { %v3024_v12 = vpop.f32.mrb[16].mxu0  ;;  %11897 = vmatprep.subr.bf16.mxu1 %v13346_v7  ;;  %v15613_v14 = vpop.f32.mrb[16].mxu1  ;;  %v13368_v7 = vld [vmem:[%s17151_s2 + $0xac8] sm:$0xff]  }
 0x21a   : > { %v3026_v15 = vpop.f32.mrb[17].mxu0  ;;  %v3067_v16 = vpop.f32.mrb[17].mxu1  ;;  %v15637_v29 = vpack.c.bf16 %v3024_v12, %v3024_v12  ;;  %v13370_v12 = vld [vmem:[%s17151_s2 + $0xad0] sm:$0xff]  }
 0x21b   : > { %v15615_v17 = vpack.c.bf16 %v3026_v15, %v3026_v15  ;;  %v3028_v18 = vpop.f32.mrb[18].mxu0  ;;  %11876 = vmatpush3.bf16.msra.mxu0 %v13347_v11  ;;  %v3069_v20 = vpop.f32.mrb[18].mxu1  ;;  %v15642_v37 = vpack.c.bf16 %v3067_v16, %v3067_v16  ;;  %v13369_v11 = vld [vmem:[%s17151_s2 + $0xb10] sm:$0xff]   ;;  %v13399_v16 = vld [vmem:[%s17151_s2 + $0xb98] sm:$0xff]  }
 0x21c   : > { %11898 = vmatpush3.bf16.msra.mxu1 %v13348_v56  ;;  %v3029_v22 = vpop.f32.mrb[19].mxu0  ;;  %11877 = vmatprep.subr.bf16.mxu0 %v13349_v9  ;;  %v3070_v26 = vpop.f32.mrb[19].mxu1  ;;  %v4053_v45 = vshrl.u32 %v15637_v29, 16  ;;  %v13392_v56 = vld [vmem:[%s17151_s2 + $0xb48] sm:$0xff]   ;;  %v13395_v9 = vld [vmem:[%s17151_s2 + $0xb90] sm:$0xff]   ;;  %v15739_v18 = vpack.c.bf16 %v15613_v14, %v15613_v14  ;;  %v13377_v20 = vld [vmem:[%s17151_s2 + $0xbe0] sm:$0xff]  }
 0x21d   : > { %11899 = vmatprep.subr.bf16.mxu1 %v13350_v13  ;;  %v4056_v41 = vshrl.u32 %v15615_v17, 16  ;;  %v4062_v47 = vshrl.u32 %v15642_v37, 16  ;;  %v13373_v13 = vld [vmem:[%s17151_s2 + $0xb18] sm:$0xff]   ;;  %v13396_v15 = vld [vmem:[%s17151_s2 + $0xb50] sm:$0xff]   ;;  %v13378_v14 = vld [vmem:[%s17151_s2 + $0xba0] sm:$0xff]   ;;  %v13811_v26 = vmov 0.0  }
 0x21e   : > { %v13400_v22 = vld [vmem:[%s17151_s2 + $0xb58] sm:$0xff]  }
 0x21f   : > { %11878 = vmatpush3.bf16.msra.mxu0 %v13351_v19  ;;  %5635 = vmatprep.mubr.bf16.mxu1 %v4056_v41  ;;  %v13374_v19 = vld [vmem:[%s17151_s2 + $0xad8] sm:$0xff]   ;;  %v13382_v41 = vld [vmem:[%s17151_s2 + $0xba8] sm:$0xff]  }
 0x220   : > { %11900 = vmatpush3.bf16.msra.mxu1 %v13352_v24  ;;  %11879 = vmatprep.subr.bf16.mxu0 %v13353_v36  ;;  %v4059_v24 = vshrl.u32 %v15739_v18, 16  ;;  %v13381_v36 = vld [vmem:[%s17151_s2 + $0xbe8] sm:$0xff]  }
 0x221   : > { %11901 = vmatprep.subr.bf16.mxu1 %v13354_v27  ;;  %v13385_v27 = vld [vmem:[%s17151_s2 + $0xbf0] sm:$0xff]  }
 0x223   : > { %11880 = vmatpush3.bf16.msra.mxu0 %v13355_v54  ;;  %v13386_v54 = vld [vmem:[%s17151_s2 + $0xbb0] sm:$0xff]  }
 0x224   : > { %11902 = vmatpush3.bf16.msra.mxu1 %v13356_v30  ;;  %11909 = vmatprep.subr.bf16.mxu0 %v13357_v42  ;;  %v13389_v30 = vld [vmem:[%s17151_s2 + $0xbf8] sm:$0xff]  }
 0x225   : > { %11931 = vmatprep.subr.bf16.mxu1 %v13371_v8  ;;  %v13390_v42 = vld [vmem:[%s17151_s2 + $0xbb8] sm:$0xff]   ;;  %v13394_v8 = vld [vmem:[%s17151_s2 + $0xbc0] sm:$0xff]  }
 0x226   : > { %5596 = vmatmul.mubr.bf16.vlgmr.msra.gmra.mrb[40].mxu0 %v4047_v43  ;;  %v13401_v43 = vld [vmem:[%s17151_s2 + $0xc10] sm:$0xff]  }
 0x227   : > { %5636 = vmatmul.mubr.bf16.vlgmr.msra.gmra.mrb[40].mxu1 %v4053_v45  ;;  %11910 = vmatpush3.bf16.msra.mxu0 %v13358_v33  ;;  %v13393_v33 = vld [vmem:[%s17151_s2 + $0xc00] sm:$0xff]  }
 0x228   : > { %11911 = vmatprep.subr.bf16.mxu0 %v13359_v32  ;;  %11932 = vmatpush3.bf16.msra.mxu1 %v13372_v35  ;;  %v13397_v32 = vld [vmem:[%s17151_s2 + $0xc08] sm:$0xff]  }
 0x229   : > { %11933 = vmatprep.subr.bf16.mxu1 %v13375_v46  ;;  %5675 = vmatprep.mubr.bf16.mxu0 %v4062_v47  ;;  %v13398_v35 = vld [vmem:[%s17151_s2 + $0xbc8] sm:$0xff]  }
 0x22b   : > { %11912 = vmatpush3.bf16.msra.mxu0 %v13360_v48 }
 0x22c   : > { %11913 = vmatprep.subr.bf16.mxu0 %v13361_v53  ;;  %11934 = vmatpush3.bf16.msra.mxu1 %v13376_v6 }
 0x22d   : > { %11935 = vmatprep.subr.bf16.mxu1 %v13379_v49 }
 0x22f   : > { %11914 = vmatpush3.bf16.msra.mxu0 %v13362_v51  ;;  %v13402_v51 = vld [vmem:[%s17151_s2 + $0xbd0] sm:$0xff]  }
 0x230   : > { %11915 = vmatprep.subr.bf16.mxu0 %v13363_v55  ;;  %11936 = vmatpush3.bf16.msra.mxu1 %v13380_v57 }
 0x231   : > { %11937 = vmatprep.subr.bf16.mxu1 %v13383_v52 }
 0x233   : > { %11916 = vmatpush3.bf16.msra.mxu0 %v13364_v58 }
 0x234   : > { %11917 = vmatprep.subr.bf16.mxu0 %v13365_v62  ;;  %11938 = vmatpush3.bf16.msra.mxu1 %v13384_v0  ;;  %v13403_v62 = vld [vmem:[%s17151_s2 + $0xc18] sm:$0xff]  }
 0x235   : > { %11939 = vmatprep.subr.bf16.mxu1 %v13387_v38 }
 0x237   : > { %11918 = vmatpush3.bf16.msra.mxu0 %v13366_v10 }
 0x238   : > { %11919 = vmatprep.subr.bf16.mxu0 %v13367_v50  ;;  %11940 = vmatpush3.bf16.msra.mxu1 %v13388_v2  ;;  %v13411_v50 = vld [vmem:[%s17151_s2 + $0xc20] sm:$0xff]  }
 0x239   : > { %11941 = vmatprep.subr.bf16.mxu1 %v13391_v3  ;;  %v13404_v3 = vld [vmem:[%s17151_s2 + $0xbd8] sm:$0xff]  }
 0x23b   : > { %11920 = vmatpush3.bf16.msra.mxu0 %v13368_v7  ;;  %v13405_v7 = vld [vmem:[%s17151_s2 + $0xc0] sm:$0xff]  }
 0x23c   : > { %11921 = vmatprep.subr.bf16.mxu0 %v13369_v11  ;;  %11942 = vmatpush3.bf16.msra.mxu1 %v13392_v56  ;;  %v13414_v11 = vld [vmem:[%s17151_s2 + $0xc28] sm:$0xff]  }
 0x23d   : > { %11943 = vmatprep.subr.bf16.mxu1 %v13395_v9  ;;  %v13406_v9 = vld [vmem:[%s17151_s2 + $0x80] sm:$0xff]  }
 0x23f   : > { %11922 = vmatpush3.bf16.msra.mxu0 %v13370_v12  ;;  %v13407_v12 = vld [vmem:[%s17151_s2 + $0xc8] sm:$0xff]  }
 0x240   : > { %11923 = vmatprep.subr.bf16.mxu0 %v13373_v13  ;;  %11944 = vmatpush3.bf16.msra.mxu1 %v13396_v15  ;;  %v13417_v13 = vld [vmem:[%s17151_s2 + $0xc30] sm:$0xff]   ;;  %v13408_v15 = vld [vmem:[%s17151_s2 + $0x88] sm:$0xff]  }
 0x241   : > { %11945 = vmatprep.subr.bf16.mxu1 %v13399_v16  ;;  %v13409_v16 = vld [vmem:[%s17151_s2 + $0xd0] sm:$0xff]  }
 0x243   : > { %11924 = vmatpush3.bf16.msra.mxu0 %v13374_v19  ;;  %v13420_v19 = vld [vmem:[%s17151_s2 + $0xc38] sm:$0xff]  }
 0x244   : > { %11953 = vmatprep.subr.bf16.mxu0 %v13377_v20  ;;  %11946 = vmatpush3.bf16.msra.mxu1 %v13400_v22  ;;  %v13423_v20 = vld [vmem:[%s17151_s2 + $0x40] sm:$0xff]   ;;  %v13410_v22 = vld [vmem:[%s17151_s2 + $0x90] sm:$0xff]  }
 0x245   : > { %12525 = vmatprep.subr.bf16.mxu1 %v13811_v26 }
 0x246   : > { %5676 = vmatmul.mubr.bf16.vlgmr.msra.gmra.mrb[44].mxu0 %v4059_v24  ;;  %v13412_v24 = vld [vmem:[%s17151_s2 + $0xd8] sm:$0xff]  }
 0x247   : > { %11954 = vmatpush3.bf16.msra.mxu0 %v13378_v14  ;;  %v13413_v14 = vld [vmem:[%s17151_s2 + $0x98] sm:$0xff]  }
 0x248   : > { %11955 = vmatprep.subr.bf16.mxu0 %v13381_v36  ;;  %v13415_v36 = vld [vmem:[%s17151_s2 + $0xe0] sm:$0xff]  }
 0x24b   : > { %11956 = vmatpush3.bf16.msra.mxu0 %v13382_v41  ;;  %v13416_v41 = vld [vmem:[%s17151_s2 + $0xa0] sm:$0xff]  }
 0x24c   : > { %11957 = vmatprep.subr.bf16.mxu0 %v13385_v27  ;;  %v13418_v27 = vld [vmem:[%s17151_s2 + $0xe8] sm:$0xff]  }
 0x24f   : > { %11958 = vmatpush3.bf16.msra.mxu0 %v13386_v54  ;;  %v13419_v54 = vld [vmem:[%s17151_s2 + $0xa8] sm:$0xff]  }
 0x250   : > { %11959 = vmatprep.subr.bf16.mxu0 %v13389_v30  ;;  %v13421_v30 = vld [vmem:[%s17151_s2 + $0xf0] sm:$0xff]  }
 0x253   : > { %11960 = vmatpush3.bf16.msra.mxu0 %v13390_v42 }
 0x254   : > { %11961 = vmatprep.subr.bf16.mxu0 %v13393_v33 }
 0x257   : > { %11962 = vmatpush3.bf16.msra.mxu0 %v13394_v8 }
 0x258   : > { %11963 = vmatprep.subr.bf16.mxu0 %v13397_v32 }
 0x259   : > { %v3106_v45 = vpop.f32.mrb[20].mxu0  ;;  %v3147_v46 = vpop.f32.mrb[20].mxu1 }
 0x25a   : > { %v15788_v47 = vpack.c.bf16 %v3106_v45, %v3106_v45  ;;  %v3108_v48 = vpop.f32.mrb[21].mxu0  ;;  %v3149_v53 = vpop.f32.mrb[21].mxu1  ;;  %v15806_v2 = vpack.c.bf16 %v3147_v46, %v3147_v46 }
 0x25b   : > { %v15790_v6 = vpack.c.bf16 %v3108_v48, %v3108_v48  ;;  %v3110_v49 = vpop.f32.mrb[22].mxu0  ;;  %11964 = vmatpush3.bf16.msra.mxu0 %v13398_v35  ;;  %v15795_v55 = vpack.c.bf16 %v3149_v53, %v3149_v53  ;;  %v3151_v57 = vpop.f32.mrb[22].mxu1  ;;  %v13422_v48 = vld [vmem:[%s17151_s2 + $0xb0] sm:$0xff]  }
 0x25c   : > { %v4065_v52 = vshrl.u32 %v15788_v47, 16  ;;  %v3111_v58 = vpop.f32.mrb[23].mxu0  ;;  %11965 = vmatprep.subr.bf16.mxu0 %v13401_v43  ;;  %v3152_v0 = vpop.f32.mrb[23].mxu1  ;;  %v4071_v56 = vshrl.u32 %v15806_v2, 16 }
 0x25d   : > { %v4068_v38 = vshrl.u32 %v15790_v6, 16  ;;  %v4074_v10 = vshrl.u32 %v15795_v55, 16  ;;  %v13427_v0 = vld [vmem:[%s17151_s2 + $0x48] sm:$0xff]  }
 0x25f   : > { %5715 = vmatprep.mubr.bf16.mxu1 %v4068_v38  ;;  %11966 = vmatpush3.bf16.msra.mxu0 %v13402_v51  ;;  %v13425_v51 = vld [vmem:[%s17151_s2 + $0xf8] sm:$0xff]   ;;  %v13429_v38 = vld [vmem:[%s17151_s2 + $0x1c0] sm:$0xff]  }
 0x260   : > { %5716 = vmatmul.mubr.bf16.vlgmr.msra.gmra.mrb[44].mxu1 %v4065_v52  ;;  %11967 = vmatprep.subr.bf16.mxu0 %v13403_v62  ;;  %v13424_v52 = vld [vmem:[%s17151_s2] sm:$0xff]   ;;  %v13426_v62 = vld [vmem:[%s17151_s2 + $0xb8] sm:$0xff]  }
 0x261   : > { %5755 = vmatprep.mubr.bf16.mxu0 %v4074_v10  ;;  %12526 = vmatpush3.bf16.msra.mxu1 %v13411_v50  ;;  %v13428_v10 = vld [vmem:[%s17151_s2 + $0x8] sm:$0xff]   ;;  %v13430_v50 = vld [vmem:[%s17151_s2 + $0x180] sm:$0xff]  }
 0x262   : > { %12527 = vmatprep.subr.bf16.mxu1 %v13811_v26  ;;  %12533 = vmatprep.mubr.msk.bf16.mxu1 %vm13812_vm0, %v13811_v26 }
 0x263   : > { %11968 = vmatpush3.bf16.msra.mxu0 %v13404_v3  ;;  %v13431_v3 = vld [vmem:[%s17151_s2 + $0x50] sm:$0xff]  }
 0x264   : > { %12002 = vmatprep.subr.bf16.mxu0 %v13405_v7  ;;  %v13433_v7 = vld [vmem:[%s17151_s2 + $0x1c8] sm:$0xff]  }
 0x265   : > { %12528 = vmatpush3.bf16.msra.mxu1 %v13414_v11  ;;  %v13432_v11 = vld [vmem:[%s17151_s2 + $0x10] sm:$0xff]  }
 0x266   : > { %5756 = vmatmul.mubr.bf16.vlgmr.msra.gmra.mrb[48].mxu0 %v4071_v56  ;;  %12529 = vmatprep.subr.bf16.mxu1 %v13811_v26  ;;  %v13434_v56 = vld [vmem:[%s17151_s2 + $0x188] sm:$0xff]  }
 0x267   : > { %12003 = vmatpush3.bf16.msra.mxu0 %v13406_v9  ;;  %7053 = vmatprep.mubr.bf16.mxu0 %v15184_v23  ;;  %v13435_v9 = vld [vmem:[%s17151_s2 + $0x58] sm:$0xff]  }
 0x268   : > { %12004 = vmatprep.subr.bf16.mxu0 %v13407_v12  ;;  %v13437_v12 = vld [vmem:[%s17151_s2 + $0x1d0] sm:$0xff]  }
 0x269   : > { %12530 = vmatpush3.bf16.msra.mxu1 %v13417_v13  ;;  %v13436_v13 = vld [vmem:[%s17151_s2 + $0x18] sm:$0xff]  }
 0x26a   : > { %12531 = vmatprep.subr.bf16.mxu1 %v13811_v26 }
 0x26b   : > { %12005 = vmatpush3.bf16.msra.mxu0 %v13408_v15  ;;  %v13438_v15 = vld [vmem:[%s17151_s2 + $0x190] sm:$0xff]  }
 0x26c   : > { %12006 = vmatprep.subr.bf16.mxu0 %v13409_v16  ;;  %v13439_v16 = vld [vmem:[%s17151_s2 + $0x60] sm:$0xff]  }
 0x26d   : > { %12532 = vmatpush3.bf16.msra.mxu1 %v13420_v19  ;;  %v13441_v19 = vld [vmem:[%s17151_s2 + $0x1d8] sm:$0xff]  }
 0x26e   : > { %11980 = vmatprep.subr.bf16.mxu1 %v13423_v20  ;;  %v13440_v20 = vld [vmem:[%s17151_s2 + $0x20] sm:$0xff]  }
 0x26f   : > { %12007 = vmatpush3.bf16.msra.mxu0 %v13410_v22  ;;  %v13442_v22 = vld [vmem:[%s17151_s2 + $0x198] sm:$0xff]  }
 0x270   : > { %12008 = vmatprep.subr.bf16.mxu0 %v13412_v24  ;;  %v13443_v24 = vld [vmem:[%s17151_s2 + $0x68] sm:$0xff]  }
 0x273   : > { %12009 = vmatpush3.bf16.msra.mxu0 %v13413_v14  ;;  %v13445_v14 = vld [vmem:[%s17151_s2 + $0x1e0] sm:$0xff]  }
 0x274   : > { %12010 = vmatprep.subr.bf16.mxu0 %v13415_v36  ;;  %v13444_v36 = vld [vmem:[%s17151_s2 + $0x28] sm:$0xff]  }
 0x277   : > { %12011 = vmatpush3.bf16.msra.mxu0 %v13416_v41  ;;  %v13446_v41 = vld [vmem:[%s17151_s2 + $0x1a0] sm:$0xff]  }
 0x278   : > { %12012 = vmatprep.subr.bf16.mxu0 %v13418_v27  ;;  %v13447_v27 = vld [vmem:[%s17151_s2 + $0x70] sm:$0xff]  }
 0x279   : > { %v11705_v42 = vpop.f32.mrb[24].mxu0  ;;  %v11727_v33 = vpop.f32.mrb[24].mxu1 }
 0x27a   : > { %v11706_v8 = vpop.f32.mrb[25].mxu0  ;;  %v11728_v32 = vpop.f32.mrb[25].mxu1 }
 0x27b   : > { %v11707_v35 = vadd.f32 %v11706_v8, %v11705_v42  ;;  %v15869_v43 = vadd.f32 %v11728_v32, %v11727_v33  ;;  %v11708_v45 = vpop.f32.mrb[26].mxu0  ;;  %v11730_v46 = vpop.f32.mrb[26].mxu1  ;;  %12013 = vmatpush3.bf16.msra.mxu0 %v13419_v54  ;;  %v13449_v54 = vld [vmem:[%s17151_s2 + $0x1e8] sm:$0xff]   ;;  %v13451_v33 = vld [vmem:[%s17151_s2 + $0x78] sm:$0xff]   ;;  %v13453_v8 = vld [vmem:[%s17151_s2 + $0x1f0] sm:$0xff]  }
 0x27c   : > { %v11709_v53 = vpop.f32.mrb[27].mxu0  ;;  %v11731_v49 = vpop.f32.mrb[27].mxu1  ;;  %12014 = vmatprep.subr.bf16.mxu0 %v13421_v30  ;;  %v13448_v30 = vld [vmem:[%s17151_s2 + $0x30] sm:$0xff]   ;;  %v13450_v42 = vld [vmem:[%s17151_s2 + $0x1a8] sm:$0xff]   ;;  %v13452_v46 = vld [vmem:[%s17151_s2 + $0x38] sm:$0xff]  }
 0x27d   : > { %v15877_v57 = vpack.c.bf16 %v11707_v35, %v11707_v35 }
 0x27f   : > { %v4077_v58 = vshrl.u32 %v15877_v57, 16  ;;  %12015 = vmatpush3.bf16.msra.mxu0 %v13422_v48 }
 0x280   : > { %12016 = vmatprep.subr.bf16.mxu0 %v13425_v51  ;;  %v13454_v51 = vld [vmem:[%s17151_s2 + $0x1b0] sm:$0xff]  }
 0x281   : > { %12534 = vmatmul.mubr.msk.bf16.vlgmr.msra.gmra.mrb[48].mxu1 %vm5279_vm1, %v4077_v58 }
 0x282   : > { %11981 = vmatpush3.bf16.msra.mxu1 %v13424_v52  ;;  %7013 = vmatprep.mubr.bf16.mxu1 %v15071_v40  ;;  %v13455_v52 = vld [vmem:[%s17151_s2 + $0x140] sm:$0xff]  }
 0x283   : > { %12017 = vmatpush3.bf16.msra.mxu0 %v13426_v62  ;;  %11982 = vmatprep.subr.bf16.mxu1 %v13427_v0 }
 0x284   : > { %12046 = vmatprep.subr.bf16.mxu0 %v13429_v38  ;;  %v13457_v38 = vld [vmem:[%s17151_s2 + $0x1f8] sm:$0xff]  }
 0x286   : > { %11983 = vmatpush3.bf16.msra.mxu1 %v13428_v10  ;;  %7054 = vmatmul.mubr.bf16.vlgmr.msra.gmra.mrb[52].mxu0 %v15280_v60 }
 0x287   : > { %12047 = vmatpush3.bf16.msra.mxu0 %v13430_v50  ;;  %7133 = vmatprep.mubr.bf16.mxu0 %v15303_v1 }
 0x288   : > { %11984 = vmatprep.subr.bf16.mxu1 %v13431_v3  ;;  %12048 = vmatprep.subr.bf16.mxu0 %v13433_v7  ;;  %v13456_v3 = vld [vmem:[%s17151_s2 + $0x100] sm:$0xff]   ;;  %v13458_v7 = vld [vmem:[%s17151_s2 + $0x1b8] sm:$0xff]  }
 0x28a   : > { %11985 = vmatpush3.bf16.msra.mxu1 %v13432_v11  ;;  %v13459_v11 = vld [vmem:[%s17151_s2 + $0x148] sm:$0xff]  }
 0x28b   : > { %12049 = vmatpush3.bf16.msra.mxu0 %v13434_v56  ;;  %11986 = vmatprep.subr.bf16.mxu1 %v13435_v9  ;;  %v13460_v9 = vld [vmem:[%s17151_s2 + $0x108] sm:$0xff]  }
 0x28c   : > { %12050 = vmatprep.subr.bf16.mxu0 %v13437_v12  ;;  %v13462_v12 = vld [vmem:[%s17151_s2 + $0x280] sm:$0xff]  }
 0x28e   : > { %11987 = vmatpush3.bf16.msra.mxu1 %v13436_v13  ;;  %v13463_v13 = vld [vmem:[%s17151_s2 + $0x150] sm:$0xff]  }
 0x28f   : > { %12051 = vmatpush3.bf16.msra.mxu0 %v13438_v15  ;;  %11988 = vmatprep.subr.bf16.mxu1 %v13439_v16  ;;  %v13465_v15 = vld [vmem:[%s17151_s2 + $0x2c8] sm:$0xff]   ;;  %v13464_v16 = vld [vmem:[%s17151_s2 + $0x110] sm:$0xff]  }
 0x290   : > { %12052 = vmatprep.subr.bf16.mxu0 %v13441_v19  ;;  %v13466_v19 = vld [vmem:[%s17151_s2 + $0x288] sm:$0xff]  }
 0x292   : > { %11989 = vmatpush3.bf16.msra.mxu1 %v13440_v20  ;;  %v13467_v20 = vld [vmem:[%s17151_s2 + $0x158] sm:$0xff]  }
 0x293   : > { %12053 = vmatpush3.bf16.msra.mxu0 %v13442_v22  ;;  %11990 = vmatprep.subr.bf16.mxu1 %v13443_v24  ;;  %v13469_v22 = vld [vmem:[%s17151_s2 + $0x2d0] sm:$0xff]   ;;  %v13468_v24 = vld [vmem:[%s17151_s2 + $0x118] sm:$0xff]  }
 0x294   : > { %12054 = vmatprep.subr.bf16.mxu0 %v13445_v14  ;;  %v13470_v14 = vld [vmem:[%s17151_s2 + $0x290] sm:$0xff]  }
 0x296   : > { %11991 = vmatpush3.bf16.msra.mxu1 %v13444_v36  ;;  %v13471_v36 = vld [vmem:[%s17151_s2 + $0x160] sm:$0xff]  }
 0x297   : > { %12055 = vmatpush3.bf16.msra.mxu0 %v13446_v41  ;;  %11992 = vmatprep.subr.bf16.mxu1 %v13447_v27  ;;  %v13473_v41 = vld [vmem:[%s17151_s2 + $0x2d8] sm:$0xff]   ;;  %v13472_v27 = vld [vmem:[%s17151_s2 + $0x120] sm:$0xff]  }
 0x298   : > { %12056 = vmatprep.subr.bf16.mxu0 %v13449_v54  ;;  %v13474_v54 = vld [vmem:[%s17151_s2 + $0x298] sm:$0xff]  }
 0x299   : > { %v11749_v32 = vpop.f32.mrb[28].mxu0 }
 0x29a   : > { %v11771_v35 = vpop.f32.mrb[28].mxu1  ;;  %11993 = vmatpush3.bf16.msra.mxu1 %v13448_v30  ;;  %v11750_v45 = vpop.f32.mrb[29].mxu0  ;;  %v13475_v30 = vld [vmem:[%s17151_s2 + $0x168] sm:$0xff]  }
 0x29b   : > { %v11751_v48 = vadd.f32 %v11750_v45, %v11749_v32  ;;  %v11772_v53 = vpop.f32.mrb[29].mxu1  ;;  %v11752_v49 = vpop.f32.mrb[30].mxu0  ;;  %12057 = vmatpush3.bf16.msra.mxu0 %v13450_v42  ;;  %11994 = vmatprep.subr.bf16.mxu1 %v13451_v33  ;;  %v13477_v42 = vld [vmem:[%s17151_s2 + $0x2e0] sm:$0xff]   ;;  %v13476_v33 = vld [vmem:[%s17151_s2 + $0x128] sm:$0xff]   ;;  %v13479_v32 = vld [vmem:[%s17151_s2 + $0x170] sm:$0xff]  }
 0x29c   : > { %v11773_v58 = vadd.f32 %v11772_v53, %v11771_v35  ;;  %v11774_v62 = vpop.f32.mrb[30].mxu1  ;;  %v11753_v0 = vpop.f32.mrb[31].mxu0  ;;  %12058 = vmatprep.subr.bf16.mxu0 %v13453_v8  ;;  %v13478_v8 = vld [vmem:[%s17151_s2 + $0x2a0] sm:$0xff]   ;;  %v13481_v35 = vld [vmem:[%s17151_s2 + $0x2e8] sm:$0xff]   ;;  %v13480_v45 = vld [vmem:[%s17151_s2 + $0x130] sm:$0xff]  }
 0x29d   : > { %v5358_v10 = vadd.f32 %v11751_v48, %v15869_v43  ;;  %v11775_v50 = vpop.f32.mrb[31].mxu1  ;;  %v13461_v43 = vld [vmem:[%s17151_s2 + $0x2c0] sm:$0xff]   ;;  %v13483_v48 = vld [vmem:[%s17151_s2 + $0x178] sm:$0xff]   ;;  %v13485_v49 = vld [vmem:[%s17151_s2 + $0x2f0] sm:$0xff]  }
 0x29e   : > { %11995 = vmatpush3.bf16.msra.mxu1 %v13452_v46  ;;  %v13482_v46 = vld [vmem:[%s17151_s2 + $0x2a8] sm:$0xff]   ;;  %v13484_v53 = vld [vmem:[%s17151_s2 + $0x138] sm:$0xff]  }
 0x29f   : > { %v15990_v56 = vadd.f32 %v11773_v58, %v5358_v10  ;;  %12059 = vmatpush3.bf16.msra.mxu0 %v13454_v51  ;;  %12024 = vmatprep.subr.bf16.mxu1 %v13455_v52  ;;  %v13486_v52 = vld [vmem:[%s17151_s2 + $0x2b0] sm:$0xff]   ;;  %v13487_v58 = vld [vmem:[%s17151_s2 + $0x240] sm:$0xff]  }
 0x2a0   : > { %12060 = vmatprep.subr.bf16.mxu0 %v13457_v38 }
 0x2a1   : > { %7014 = vmatmul.mubr.bf16.vlgmr.msra.gmra.mrb[52].mxu1 %v15177_v21 }
 0x2a2   : > { %12025 = vmatpush3.bf16.msra.mxu1 %v13456_v3  ;;  %7093 = vmatprep.mubr.bf16.mxu1 %v15191_v25 }
 0x2a3   : > { %12061 = vmatpush3.bf16.msra.mxu0 %v13458_v7  ;;  %12026 = vmatprep.subr.bf16.mxu1 %v13459_v11 }
 0x2a4   : > { %12090 = vmatprep.subr.bf16.mxu0 %v13461_v43  ;;  %v13489_v43 = vld [vmem:[%s17151_s2 + $0x2f8] sm:$0xff]  }
 0x2a6   : > { %12027 = vmatpush3.bf16.msra.mxu1 %v13460_v9  ;;  %7134 = vmatmul.mubr.bf16.vlgmr.msra.gmra.mrb[56].mxu0 %v15393_v44 }
 0x2a7   : > { %12091 = vmatpush3.bf16.msra.mxu0 %v13462_v12  ;;  %7213 = vmatprep.mubr.bf16.mxu0 %v15427_v59 }
 0x2a8   : > { %12028 = vmatprep.subr.bf16.mxu1 %v13463_v13  ;;  %12092 = vmatprep.subr.bf16.mxu0 %v13465_v15  ;;  %v13488_v13 = vld [vmem:[%s17151_s2 + $0x200] sm:$0xff]   ;;  %v13490_v15 = vld [vmem:[%s17151_s2 + $0x2b8] sm:$0xff]  }
 0x2aa   : > { %12029 = vmatpush3.bf16.msra.mxu1 %v13464_v16  ;;  %v13491_v16 = vld [vmem:[%s17151_s2 + $0x248] sm:$0xff]  }
 0x2ab   : > { %12093 = vmatpush3.bf16.msra.mxu0 %v13466_v19  ;;  %12030 = vmatprep.subr.bf16.mxu1 %v13467_v20  ;;  %v13493_v19 = vld [vmem:[%s17151_s2 + $0x3c0] sm:$0xff]  }
 0x2ac   : > { %12094 = vmatprep.subr.bf16.mxu0 %v13469_v22  ;;  %v13494_v22 = vld [vmem:[%s17151_s2 + $0x380] sm:$0xff]  }
 0x2ae   : > { %12031 = vmatpush3.bf16.msra.mxu1 %v13468_v24  ;;  %v13495_v24 = vld [vmem:[%s17151_s2 + $0x250] sm:$0xff]  }
 0x2af   : > { %12095 = vmatpush3.bf16.msra.mxu0 %v13470_v14  ;;  %12032 = vmatprep.subr.bf16.mxu1 %v13471_v36  ;;  %v13497_v14 = vld [vmem:[%s17151_s2 + $0x3c8] sm:$0xff]   ;;  %v13496_v36 = vld [vmem:[%s17151_s2 + $0x210] sm:$0xff]  }
 0x2b0   : > { %12096 = vmatprep.subr.bf16.mxu0 %v13473_v41  ;;  %v13498_v41 = vld [vmem:[%s17151_s2 + $0x388] sm:$0xff]  }
 0x2b2   : > { %12033 = vmatpush3.bf16.msra.mxu1 %v13472_v27  ;;  %v13499_v27 = vld [vmem:[%s17151_s2 + $0x258] sm:$0xff]  }
 0x2b3   : > { %12097 = vmatpush3.bf16.msra.mxu0 %v13474_v54  ;;  %12034 = vmatprep.subr.bf16.mxu1 %v13475_v30  ;;  %v13500_v54 = vld [vmem:[%s17151_s2 + $0x218] sm:$0xff]   ;;  %v13501_v30 = vld [vmem:[%s17151_s2 + $0x3d0] sm:$0xff]  }
 0x2b4   : > { %12098 = vmatprep.subr.bf16.mxu0 %v13477_v42  ;;  %v13502_v42 = vld [vmem:[%s17151_s2 + $0x390] sm:$0xff]  }
 0x2b6   : > { %12035 = vmatpush3.bf16.msra.mxu1 %v13476_v33  ;;  %v13503_v33 = vld [vmem:[%s17151_s2 + $0x260] sm:$0xff]  }
 0x2b7   : > { %12099 = vmatpush3.bf16.msra.mxu0 %v13478_v8  ;;  %12036 = vmatprep.subr.bf16.mxu1 %v13479_v32  ;;  %v13505_v8 = vld [vmem:[%s17151_s2 + $0x3d8] sm:$0xff]   ;;  %v13504_v32 = vld [vmem:[%s17151_s2 + $0x220] sm:$0xff]  }
 0x2b8   : > { %12100 = vmatprep.subr.bf16.mxu0 %v13481_v35  ;;  %v13506_v35 = vld [vmem:[%s17151_s2 + $0x398] sm:$0xff]  }
 0x2b9   : > { %v11793_v51 = vpop.f32.mrb[32].mxu0 }
 0x2ba   : > { %v11815_v62 = vpop.f32.mrb[32].mxu1  ;;  %12037 = vmatpush3.bf16.msra.mxu1 %v13480_v45  ;;  %v11794_v0 = vpop.f32.mrb[33].mxu0  ;;  %v13507_v45 = vld [vmem:[%s17151_s2 + $0x268] sm:$0xff]  }
 0x2bb   : > { %v11795_v38 = vadd.f32 %v11794_v0, %v11793_v51  ;;  %v11816_v10 = vpop.f32.mrb[33].mxu1  ;;  %v11796_v50 = vpop.f32.mrb[34].mxu0  ;;  %12101 = vmatpush3.bf16.msra.mxu0 %v13482_v46  ;;  %12038 = vmatprep.subr.bf16.mxu1 %v13483_v48  ;;  %v13509_v46 = vld [vmem:[%s17151_s2 + $0x3e0] sm:$0xff]   ;;  %v13508_v48 = vld [vmem:[%s17151_s2 + $0x228] sm:$0xff]   ;;  %v13517_v0 = vld [vmem:[%s17151_s2 + $0x3f0] sm:$0xff]  }
 0x2bc   : > { %v11817_v3 = vadd.f32 %v11816_v10, %v11815_v62  ;;  %v11818_v7 = vpop.f32.mrb[34].mxu1  ;;  %v11797_v11 = vpop.f32.mrb[35].mxu0  ;;  %12102 = vmatprep.subr.bf16.mxu0 %v13485_v49  ;;  %v13511_v49 = vld [vmem:[%s17151_s2 + $0x270] sm:$0xff]   ;;  %v13513_v51 = vld [vmem:[%s17151_s2 + $0x3e8] sm:$0xff]   ;;  %v13515_v62 = vld [vmem:[%s17151_s2 + $0x278] sm:$0xff]  }
 0x2bd   : > { %v5438_v9 = vadd.f32 %v11795_v38, %v15990_v56  ;;  %v11819_v12 = vpop.f32.mrb[35].mxu1  ;;  %v13492_v56 = vld [vmem:[%s17151_s2 + $0x208] sm:$0xff]   ;;  %v13516_v10 = vld [vmem:[%s17151_s2 + $0x238] sm:$0xff]  }
 0x2be   : > { %12039 = vmatpush3.bf16.msra.mxu1 %v13484_v53  ;;  %v13510_v53 = vld [vmem:[%s17151_s2 + $0x3a0] sm:$0xff]  }
 0x2bf   : > { %v16096_v20 = vadd.f32 %v11817_v3, %v5438_v9  ;;  %12103 = vmatpush3.bf16.msra.mxu0 %v13486_v52  ;;  %12068 = vmatprep.subr.bf16.mxu1 %v13487_v58  ;;  %v13512_v52 = vld [vmem:[%s17151_s2 + $0x230] sm:$0xff]   ;;  %v13514_v58 = vld [vmem:[%s17151_s2 + $0x3a8] sm:$0xff]   ;;  %v13519_v12 = vld [vmem:[%s17151_s2 + $0x340] sm:$0xff]  }
 0x2c0   : > { %12104 = vmatprep.subr.bf16.mxu0 %v13489_v43  ;;  %v13518_v9 = vld [vmem:[%s17151_s2 + $0x3b0] sm:$0xff]  }
 0x2c1   : > { %7094 = vmatmul.mubr.bf16.vlgmr.msra.gmra.mrb[56].mxu1 %v15284_v61 }
 0x2c2   : > { %12069 = vmatpush3.bf16.msra.mxu1 %v13488_v13  ;;  %7173 = vmatprep.mubr.bf16.mxu1 %v15309_v4 }
 0x2c3   : > { %12105 = vmatpush3.bf16.msra.mxu0 %v13490_v15  ;;  %12070 = vmatprep.subr.bf16.mxu1 %v13491_v16 }
 0x2c4   : > { %12134 = vmatprep.subr.bf16.mxu0 %v13493_v19  ;;  %v13521_v19 = vld [vmem:[%s17151_s2 + $0x3f8] sm:$0xff]  }
 0x2c6   : > { %12071 = vmatpush3.bf16.msra.mxu1 %v13492_v56  ;;  %7214 = vmatmul.mubr.bf16.vlgmr.msra.gmra.mrb[60].mxu0 %v15519_v31 }
 0x2c7   : > { %12135 = vmatpush3.bf16.msra.mxu0 %v13494_v22  ;;  %7293 = vmatprep.mubr.bf16.mxu0 %v15527_v34 }
 0x2c8   : > { %12072 = vmatprep.subr.bf16.mxu1 %v13495_v24  ;;  %12136 = vmatprep.subr.bf16.mxu0 %v13497_v14  ;;  %v13520_v24 = vld [vmem:[%s17151_s2 + $0x300] sm:$0xff]   ;;  %v13522_v14 = vld [vmem:[%s17151_s2 + $0x3b8] sm:$0xff]  }
 0x2ca   : > { %12073 = vmatpush3.bf16.msra.mxu1 %v13496_v36 }
 0x2cb   : > { %12137 = vmatpush3.bf16.msra.mxu0 %v13498_v41  ;;  %12074 = vmatprep.subr.bf16.mxu1 %v13499_v27  ;;  %v13523_v41 = vld [vmem:[%s17151_s2 + $0x348] sm:$0xff]  }
 0x2cc   : > { %12138 = vmatprep.subr.bf16.mxu0 %v13501_v30  ;;  %v13524_v27 = vld [vmem:[%s17151_s2 + $0x308] sm:$0xff]   ;;  %v13527_v30 = vld [vmem:[%s17151_s2 + $0x350] sm:$0xff]  }
 0x2ce   : > { %12075 = vmatpush3.bf16.msra.mxu1 %v13500_v54  ;;  %v13526_v54 = vld [vmem:[%s17151_s2 + $0x480] sm:$0xff]  }
 0x2cf   : > { %12139 = vmatpush3.bf16.msra.mxu0 %v13502_v42  ;;  %12076 = vmatprep.subr.bf16.mxu1 %v13503_v33  ;;  %v13529_v42 = vld [vmem:[%s17151_s2 + $0x4c8] sm:$0xff]   ;;  %v13528_v33 = vld [vmem:[%s17151_s2 + $0x310] sm:$0xff]  }
 0x2d0   : > { %12140 = vmatprep.subr.bf16.mxu0 %v13505_v8  ;;  %v13530_v8 = vld [vmem:[%s17151_s2 + $0x488] sm:$0xff]  }
 0x2d2   : > { %12077 = vmatpush3.bf16.msra.mxu1 %v13504_v32  ;;  %v13531_v32 = vld [vmem:[%s17151_s2 + $0x358] sm:$0xff]  }
 0x2d3   : > { %12141 = vmatpush3.bf16.msra.mxu0 %v13506_v35  ;;  %12078 = vmatprep.subr.bf16.mxu1 %v13507_v45  ;;  %v13533_v35 = vld [vmem:[%s17151_s2 + $0x4d0] sm:$0xff]   ;;  %v13532_v45 = vld [vmem:[%s17151_s2 + $0x318] sm:$0xff]  }
 0x2d4   : > { %12142 = vmatprep.subr.bf16.mxu0 %v13509_v46  ;;  %v13534_v46 = vld [vmem:[%s17151_s2 + $0x490] sm:$0xff]  }
 0x2d6   : > { %12079 = vmatpush3.bf16.msra.mxu1 %v13508_v48  ;;  %v13535_v48 = vld [vmem:[%s17151_s2 + $0x360] sm:$0xff]  }
 0x2d7   : > { %12143 = vmatpush3.bf16.msra.mxu0 %v13510_v53  ;;  %12080 = vmatprep.subr.bf16.mxu1 %v13511_v49  ;;  %v13537_v53 = vld [vmem:[%s17151_s2 + $0x4d8] sm:$0xff]   ;;  %v13536_v49 = vld [vmem:[%s17151_s2 + $0x320] sm:$0xff]  }
 0x2d8   : > { %12144 = vmatprep.subr.bf16.mxu0 %v13513_v51  ;;  %v13538_v51 = vld [vmem:[%s17151_s2 + $0x498] sm:$0xff]  }
 0x2d9   : > { %v11837_v38 = vpop.f32.mrb[36].mxu0 }
 0x2da   : > { %v11859_v50 = vpop.f32.mrb[36].mxu1  ;;  %12081 = vmatpush3.bf16.msra.mxu1 %v13512_v52  ;;  %v11838_v3 = vpop.f32.mrb[37].mxu0  ;;  %v13539_v52 = vld [vmem:[%s17151_s2 + $0x368] sm:$0xff]  }
 0x2db   : > { %v11839_v7 = vadd.f32 %v11838_v3, %v11837_v38  ;;  %v11860_v11 = vpop.f32.mrb[37].mxu1  ;;  %v11840_v43 = vpop.f32.mrb[38].mxu0  ;;  %12145 = vmatpush3.bf16.msra.mxu0 %v13514_v58  ;;  %12082 = vmatprep.subr.bf16.mxu1 %v13515_v62  ;;  %v13541_v58 = vld [vmem:[%s17151_s2 + $0x4e0] sm:$0xff]   ;;  %v13540_v62 = vld [vmem:[%s17151_s2 + $0x328] sm:$0xff]   ;;  %v13543_v38 = vld [vmem:[%s17151_s2 + $0x370] sm:$0xff]  }
 0x2dc   : > { %v11861_v13 = vadd.f32 %v11860_v11, %v11859_v50  ;;  %v11862_v15 = vpop.f32.mrb[38].mxu1  ;;  %v11841_v16 = vpop.f32.mrb[39].mxu0  ;;  %12146 = vmatprep.subr.bf16.mxu0 %v13517_v0  ;;  %v13542_v0 = vld [vmem:[%s17151_s2 + $0x4a0] sm:$0xff]   ;;  %v13545_v50 = vld [vmem:[%s17151_s2 + $0x4e8] sm:$0xff]   ;;  %v13549_v11 = vld [vmem:[%s17151_s2 + $0x4f0] sm:$0xff]  }
 0x2dd   : > { %v5518_v56 = vadd.f32 %v11839_v7, %v16096_v20  ;;  %v11863_v22 = vpop.f32.mrb[39].mxu1  ;;  %v13525_v20 = vld [vmem:[%s17151_s2 + $0x4c0] sm:$0xff]   ;;  %v13546_v3 = vld [vmem:[%s17151_s2 + $0x4a8] sm:$0xff]   ;;  %v13547_v7 = vld [vmem:[%s17151_s2 + $0x378] sm:$0xff]  }
 0x2de   : > { %12083 = vmatpush3.bf16.msra.mxu1 %v13516_v10  ;;  %v13544_v10 = vld [vmem:[%s17151_s2 + $0x330] sm:$0xff]   ;;  %v13551_v22 = vld [vmem:[%s17151_s2 + $0x440] sm:$0xff]  }
 0x2df   : > { %v16193_v36 = vadd.f32 %v11861_v13, %v5518_v56  ;;  %12147 = vmatpush3.bf16.msra.mxu0 %v13518_v9  ;;  %12112 = vmatprep.subr.bf16.mxu1 %v13519_v12  ;;  %v13548_v9 = vld [vmem:[%s17151_s2 + $0x338] sm:$0xff]   ;;  %v13550_v56 = vld [vmem:[%s17151_s2 + $0x4b0] sm:$0xff]  }
 0x2e0   : > { %12148 = vmatprep.subr.bf16.mxu0 %v13521_v19 }
 0x2e1   : > { %7174 = vmatmul.mubr.bf16.vlgmr.msra.gmra.mrb[60].mxu1 %v15397_v39 }
 0x2e2   : > { %12113 = vmatpush3.bf16.msra.mxu1 %v13520_v24  ;;  %7253 = vmatprep.mubr.bf16.mxu1 %v15432_v63 }
 0x2e3   : > { %12149 = vmatpush3.bf16.msra.mxu0 %v13522_v14  ;;  %12114 = vmatprep.subr.bf16.mxu1 %v13523_v41 }
 0x2e4   : > { %12178 = vmatprep.subr.bf16.mxu0 %v13525_v20  ;;  %v13553_v20 = vld [vmem:[%s17151_s2 + $0x4f8] sm:$0xff]  }
 0x2e6   : > { %12115 = vmatpush3.bf16.msra.mxu1 %v13524_v27  ;;  %7294 = vmatmul.mubr.bf16.vlgmr.msra.gmra.mrb[64].mxu0 %v15635_v28 }
 0x2e7   : > { %12179 = vmatpush3.bf16.msra.mxu0 %v13526_v54  ;;  %7373 = vmatprep.mubr.bf16.mxu0 %v15642_v37 }
 0x2e8   : > { %12116 = vmatprep.subr.bf16.mxu1 %v13527_v30  ;;  %12180 = vmatprep.subr.bf16.mxu0 %v13529_v42  ;;  %v13552_v30 = vld [vmem:[%s17151_s2 + $0x400] sm:$0xff]   ;;  %v13554_v42 = vld [vmem:[%s17151_s2 + $0x4b8] sm:$0xff]  }
 0x2ea   : > { %12117 = vmatpush3.bf16.msra.mxu1 %v13528_v33 }
 0x2eb   : > { %12181 = vmatpush3.bf16.msra.mxu0 %v13530_v8  ;;  %12118 = vmatprep.subr.bf16.mxu1 %v13531_v32  ;;  %v13555_v8 = vld [vmem:[%s17151_s2 + $0x448] sm:$0xff]  }
 0x2ec   : > { %12182 = vmatprep.subr.bf16.mxu0 %v13533_v35  ;;  %v13556_v32 = vld [vmem:[%s17151_s2 + $0x408] sm:$0xff]   ;;  %v13558_v35 = vld [vmem:[%s17151_s2 + $0x580] sm:$0xff]  }
 0x2ee   : > { %12119 = vmatpush3.bf16.msra.mxu1 %v13532_v45  ;;  %v13559_v45 = vld [vmem:[%s17151_s2 + $0x450] sm:$0xff]  }
 0x2ef   : > { %12183 = vmatpush3.bf16.msra.mxu0 %v13534_v46  ;;  %12120 = vmatprep.subr.bf16.mxu1 %v13535_v48  ;;  %v13561_v46 = vld [vmem:[%s17151_s2 + $0x5c8] sm:$0xff]   ;;  %v13560_v48 = vld [vmem:[%s17151_s2 + $0x410] sm:$0xff]  }
 0x2f0   : > { %12184 = vmatprep.subr.bf16.mxu0 %v13537_v53  ;;  %v13562_v53 = vld [vmem:[%s17151_s2 + $0x588] sm:$0xff]  }
 0x2f2   : > { %12121 = vmatpush3.bf16.msra.mxu1 %v13536_v49  ;;  %v13563_v49 = vld [vmem:[%s17151_s2 + $0x458] sm:$0xff]  }
 0x2f3   : > { %12185 = vmatpush3.bf16.msra.mxu0 %v13538_v51  ;;  %12122 = vmatprep.subr.bf16.mxu1 %v13539_v52  ;;  %v13565_v51 = vld [vmem:[%s17151_s2 + $0x5d0] sm:$0xff]   ;;  %v13564_v52 = vld [vmem:[%s17151_s2 + $0x418] sm:$0xff]  }
 0x2f4   : > { %12186 = vmatprep.subr.bf16.mxu0 %v13541_v58  ;;  %v13566_v58 = vld [vmem:[%s17151_s2 + $0x590] sm:$0xff]  }
 0x2f6   : > { %12123 = vmatpush3.bf16.msra.mxu1 %v13540_v62  ;;  %v13567_v62 = vld [vmem:[%s17151_s2 + $0x460] sm:$0xff]  }
 0x2f7   : > { %12187 = vmatpush3.bf16.msra.mxu0 %v13542_v0  ;;  %12124 = vmatprep.subr.bf16.mxu1 %v13543_v38  ;;  %v13569_v0 = vld [vmem:[%s17151_s2 + $0x5d8] sm:$0xff]   ;;  %v13568_v38 = vld [vmem:[%s17151_s2 + $0x420] sm:$0xff]  }
 0x2f8   : > { %12188 = vmatprep.subr.bf16.mxu0 %v13545_v50  ;;  %v13571_v50 = vld [vmem:[%s17151_s2 + $0x468] sm:$0xff]  }
 0x2f9   : > { %v11881_v43 = vpop.f32.mrb[40].mxu0 }
 0x2fa   : > { %v11903_v12 = vpop.f32.mrb[40].mxu1  ;;  %12125 = vmatpush3.bf16.msra.mxu1 %v13544_v10  ;;  %v11882_v13 = vpop.f32.mrb[41].mxu0  ;;  %v13570_v10 = vld [vmem:[%s17151_s2 + $0x598] sm:$0xff]  }
 0x2fb   : > { %v11883_v15 = vadd.f32 %v11882_v13, %v11881_v43  ;;  %v11904_v16 = vpop.f32.mrb[41].mxu1  ;;  %v11884_v19 = vpop.f32.mrb[42].mxu0  ;;  %12189 = vmatpush3.bf16.msra.mxu0 %v13546_v3  ;;  %12126 = vmatprep.subr.bf16.mxu1 %v13547_v7  ;;  %v13573_v3 = vld [vmem:[%s17151_s2 + $0x5e0] sm:$0xff]   ;;  %v13572_v7 = vld [vmem:[%s17151_s2 + $0x428] sm:$0xff]   ;;  %v13575_v43 = vld [vmem:[%s17151_s2 + $0x470] sm:$0xff]  }
 0x2fc   : > { %v11905_v24 = vadd.f32 %v11904_v16, %v11903_v12  ;;  %v11906_v14 = vpop.f32.mrb[42].mxu1  ;;  %v11885_v41 = vpop.f32.mrb[43].mxu0  ;;  %12190 = vmatprep.subr.bf16.mxu0 %v13549_v11  ;;  %v13574_v11 = vld [vmem:[%s17151_s2 + $0x5a0] sm:$0xff]   ;;  %v13577_v12 = vld [vmem:[%s17151_s2 + $0x5e8] sm:$0xff]   ;;  %v13581_v16 = vld [vmem:[%s17151_s2 + $0x5f0] sm:$0xff]  }
 0x2fd   : > { %v5598_v27 = vadd.f32 %v11883_v15, %v16193_v36  ;;  %v11907_v54 = vpop.f32.mrb[43].mxu1  ;;  %v13557_v36 = vld [vmem:[%s17151_s2 + $0x5c0] sm:$0xff]   ;;  %v13578_v13 = vld [vmem:[%s17151_s2 + $0x5a8] sm:$0xff]   ;;  %v13579_v15 = vld [vmem:[%s17151_s2 + $0x478] sm:$0xff]  }
 0x2fe   : > { %12127 = vmatpush3.bf16.msra.mxu1 %v13548_v9  ;;  %v13576_v9 = vld [vmem:[%s17151_s2 + $0x430] sm:$0xff]   ;;  %v13585_v54 = vld [vmem:[%s17151_s2 + $0x5f8] sm:$0xff]  }
 0x2ff   : > { %v16296_v33 = vadd.f32 %v11905_v24, %v5598_v27  ;;  %12191 = vmatpush3.bf16.msra.mxu0 %v13550_v56  ;;  %12156 = vmatprep.subr.bf16.mxu1 %v13551_v22  ;;  %v13580_v22 = vld [vmem:[%s17151_s2 + $0x438] sm:$0xff]   ;;  %v13582_v41 = vld [vmem:[%s17151_s2 + $0x5b0] sm:$0xff]  }
 0x300   : > { %12192 = vmatprep.subr.bf16.mxu0 %v13553_v20  ;;  %v13583_v20 = vld [vmem:[%s17151_s2 + $0x540] sm:$0xff]  }
 0x301   : > { %7254 = vmatmul.mubr.bf16.vlgmr.msra.gmra.mrb[64].mxu1 %v15523_v5 }
 0x302   : > { %12157 = vmatpush3.bf16.msra.mxu1 %v13552_v30  ;;  %7333 = vmatprep.mubr.bf16.mxu1 %v15615_v17 }
 0x303   : > { %12193 = vmatpush3.bf16.msra.mxu0 %v13554_v42  ;;  %12158 = vmatprep.subr.bf16.mxu1 %v13555_v8  ;;  %v13584_v42 = vld [vmem:[%s17151_s2 + $0x500] sm:$0xff]   ;;  %v13586_v8 = vld [vmem:[%s17151_s2 + $0x5b8] sm:$0xff]  }
 0x304   : > { %12222 = vmatprep.subr.bf16.mxu0 %v13557_v36  ;;  %v13587_v36 = vld [vmem:[%s17151_s2 + $0x548] sm:$0xff]  }
 0x306   : > { %12159 = vmatpush3.bf16.msra.mxu1 %v13556_v32  ;;  %7374 = vmatmul.mubr.bf16.vlgmr.msra.gmra.mrb[68].mxu0 %v15739_v18  ;;  %v13589_v32 = vld [vmem:[%s17151_s2 + $0xc80] sm:$0xff]  }
 0x307   : > { %12223 = vmatpush3.bf16.msra.mxu0 %v13558_v35  ;;  %7453 = vmatprep.mubr.bf16.mxu0 %v15795_v55  ;;  %v13590_v35 = vld [vmem:[%s17151_s2 + $0xc40] sm:$0xff]  }
 0x308   : > { %12160 = vmatprep.subr.bf16.mxu1 %v13559_v45  ;;  %12224 = vmatprep.subr.bf16.mxu0 %v13561_v46  ;;  %v7920_v45 = vrot.slane %v15071_v40, 1  ;;  %v13591_v46 = vld [vmem:[%s17151_s2 + $0x550] sm:$0xff]   ;;  %v13594_v40 = vld [vmem:[%s17151_s2 + $0xc48] sm:$0xff]  }
 0x30a   : > { %12161 = vmatpush3.bf16.msra.mxu1 %v13560_v48  ;;  %v13593_v48 = vld [vmem:[%s17151_s2 + $0xc88] sm:$0xff]  }
 0x30b   : > { %12225 = vmatpush3.bf16.msra.mxu0 %v13562_v53  ;;  %12162 = vmatprep.subr.bf16.mxu1 %v13563_v49  ;;  %v13592_v53 = vld [vmem:[%s17151_s2 + $0x510] sm:$0xff]   ;;  %v13595_v49 = vld [vmem:[%s17151_s2 + $0x558] sm:$0xff]  }
 0x30c   : > { %12226 = vmatprep.subr.bf16.mxu0 %v13565_v51  ;;  %v13597_v51 = vld [vmem:[%s17151_s2 + $0xc90] sm:$0xff]  }
 0x30e   : > { %12163 = vmatpush3.bf16.msra.mxu1 %v13564_v52  ;;  %v13596_v52 = vld [vmem:[%s17151_s2 + $0x518] sm:$0xff]  }
 0x30f   : > { %12227 = vmatpush3.bf16.msra.mxu0 %v13566_v58  ;;  %12164 = vmatprep.subr.bf16.mxu1 %v13567_v62  ;;  %v13598_v58 = vld [vmem:[%s17151_s2 + $0xc50] sm:$0xff]   ;;  %v13599_v62 = vld [vmem:[%s17151_s2 + $0x560] sm:$0xff]  }
 0x310   : > { %12228 = vmatprep.subr.bf16.mxu0 %v13569_v0  ;;  %v13601_v0 = vld [vmem:[%s17151_s2 + $0xc98] sm:$0xff]  }
 0x312   : > { %12165 = vmatpush3.bf16.msra.mxu1 %v13568_v38  ;;  %v13600_v38 = vld [vmem:[%s17151_s2 + $0x520] sm:$0xff]  }
 0x313   : > { %12229 = vmatpush3.bf16.msra.mxu0 %v13570_v10  ;;  %12166 = vmatprep.subr.bf16.mxu1 %v13571_v50  ;;  %v13602_v10 = vld [vmem:[%s17151_s2 + $0xc58] sm:$0xff]   ;;  %v13603_v50 = vld [vmem:[%s17151_s2 + $0x568] sm:$0xff]  }
 0x314   : > { %12230 = vmatprep.subr.bf16.mxu0 %v13573_v3  ;;  %v13605_v3 = vld [vmem:[%s17151_s2 + $0xca0] sm:$0xff]  }
 0x316   : > { %12167 = vmatpush3.bf16.msra.mxu1 %v13572_v7  ;;  %v13604_v7 = vld [vmem:[%s17151_s2 + $0x528] sm:$0xff]  }
 0x317   : > { %12231 = vmatpush3.bf16.msra.mxu0 %v13574_v11  ;;  %12168 = vmatprep.subr.bf16.mxu1 %v13575_v43  ;;  %v13606_v11 = vld [vmem:[%s17151_s2 + $0xc60] sm:$0xff]  }
 0x318   : > { %12232 = vmatprep.subr.bf16.mxu0 %v13577_v12 }
 0x319   : > { %v11925_v19 = vpop.f32.mrb[44].mxu0 }
 0x31a   : > { %12169 = vmatpush3.bf16.msra.mxu1 %v13576_v9  ;;  %v11926_v56 = vpop.f32.mrb[45].mxu0  ;;  %v13607_v9 = vld [vmem:[%s17151_s2 + $0x570] sm:$0xff]  }
 0x31b   : > { %v11927_v24 = vadd.f32 %v11926_v56, %v11925_v19  ;;  %v11928_v14 = vpop.f32.mrb[46].mxu0  ;;  %12233 = vmatpush3.bf16.msra.mxu0 %v13578_v13  ;;  %12170 = vmatprep.subr.bf16.mxu1 %v13579_v15  ;;  %v13609_v13 = vld [vmem:[%s17151_s2 + $0xca8] sm:$0xff]   ;;  %v13608_v19 = vld [vmem:[%s17151_s2 + $0x530] sm:$0xff]  }
 0x31c   : > { %v11929_v27 = vpop.f32.mrb[47].mxu0  ;;  %12234 = vmatprep.subr.bf16.mxu0 %v13581_v16  ;;  %v13611_v14 = vld [vmem:[%s17151_s2 + $0x578] sm:$0xff]  }
 0x31d   : > { %v5678_v30 = vadd.f32 %v11927_v24, %v16296_v33  ;;  %v13588_v33 = vld [vmem:[%s17151_s2 + $0x508] sm:$0xff]  }
 0x31e   : > { %12171 = vmatpush3.bf16.msra.mxu1 %v13580_v22  ;;  %v13610_v22 = vld [vmem:[%s17151_s2 + $0xc68] sm:$0xff]  }
 0x31f   : > { %12235 = vmatpush3.bf16.msra.mxu0 %v13582_v41  ;;  %12200 = vmatprep.subr.bf16.mxu1 %v13583_v20  ;;  %v13613_v41 = vld [vmem:[%s17151_s2 + $0xcb0] sm:$0xff]  }
 0x320   : > { %12236 = vmatprep.subr.bf16.mxu0 %v13585_v54  ;;  %v13612_v54 = vld [vmem:[%s17151_s2 + $0x538] sm:$0xff]  }
 0x321   : > { %7334 = vmatmul.mubr.bf16.vlgmr.msra.gmra.mrb[68].mxu1 %v15637_v29 }
 0x322   : > { %12201 = vmatpush3.bf16.msra.mxu1 %v13584_v42  ;;  %7413 = vmatprep.mubr.bf16.mxu1 %v15790_v6 }
 0x323   : > { %12237 = vmatpush3.bf16.msra.mxu0 %v13586_v8  ;;  %12202 = vmatprep.subr.bf16.mxu1 %v13587_v36  ;;  %v13616_v36 = vld [vmem:[%s17151_s2 + $0xcb8] sm:$0xff]  }
 0x324   : > { %12249 = vmatprep.subr.bf16.mxu0 %v13589_v32 }
 0x326   : > { %12203 = vmatpush3.bf16.msra.mxu1 %v13588_v33  ;;  %7454 = vmatmul.mubr.bf16.vlgmr.msra.gmra.mrb[72].mxu0 %v15806_v2 }
 0x327   : > { %12250 = vmatpush3.bf16.msra.mxu0 %v13590_v35  ;;  %9179 = vmatprep.mubr.bf16.mxu0 %v7920_v45  ;;  %v13615_v35 = vld [vmem:[%s17151_s2 + $0x600] sm:$0xff]   ;;  %v13617_v45 = vld [vmem:[%s17151_s2 + $0xc78] sm:$0xff]  }
 0x328   : > { %12204 = vmatprep.subr.bf16.mxu1 %v13591_v46  ;;  %12251 = vmatprep.subr.bf16.mxu0 %v13593_v48  ;;  %v13619_v46 = vld [vmem:[%s17151_s2 + $0xd80] sm:$0xff]   ;;  %v13618_v48 = vld [vmem:[%s17151_s2 + $0x608] sm:$0xff]  }
 0x32a   : > { %12205 = vmatpush3.bf16.msra.mxu1 %v13592_v53  ;;  %v7919_v53 = vrot.slane %v15177_v21, 1  ;;  %v13621_v21 = vld [vmem:[%s17151_s2 + $0x610] sm:$0xff]  }
 0x32b   : > { %12252 = vmatpush3.bf16.msra.mxu0 %v13594_v40  ;;  %12206 = vmatprep.subr.bf16.mxu1 %v13595_v49  ;;  %v13620_v40 = vld [vmem:[%s17151_s2 + $0xd40] sm:$0xff]   ;;  %v7924_v49 = vrot.slane %v15191_v25, 1  ;;  %v13625_v25 = vld [vmem:[%s17151_s2 + $0xd90] sm:$0xff]  }
 0x32c   : > { %12253 = vmatprep.subr.bf16.mxu0 %v13597_v51  ;;  %v13622_v51 = vld [vmem:[%s17151_s2 + $0xd88] sm:$0xff]  }
 0x32e   : > { %12207 = vmatpush3.bf16.msra.mxu1 %v13596_v52  ;;  %v13623_v52 = vld [vmem:[%s17151_s2 + $0xd48] sm:$0xff]  }
 0x32f   : > { %12254 = vmatpush3.bf16.msra.mxu0 %v13598_v58  ;;  %12208 = vmatprep.subr.bf16.mxu1 %v13599_v62  ;;  %v13624_v58 = vld [vmem:[%s17151_s2 + $0x618] sm:$0xff]   ;;  %v13626_v62 = vld [vmem:[%s17151_s2 + $0xd50] sm:$0xff]  }
 0x330   : > { %12255 = vmatprep.subr.bf16.mxu0 %v13601_v0  ;;  %v13627_v0 = vld [vmem:[%s17151_s2 + $0xd00] sm:$0xff]  }
 0x332   : > { %12209 = vmatpush3.bf16.msra.mxu1 %v13600_v38  ;;  %v13629_v38 = vld [vmem:[%s17151_s2 + $0xd98] sm:$0xff]  }
 0x333   : > { %v11947_v43 = vpop.f32.mrb[44].mxu1  ;;  %12256 = vmatpush3.bf16.msra.mxu0 %v13602_v10  ;;  %12210 = vmatprep.subr.bf16.mxu1 %v13603_v50  ;;  %v13628_v10 = vld [vmem:[%s17151_s2 + $0xcc0] sm:$0xff]   ;;  %v13630_v50 = vld [vmem:[%s17151_s2 + $0xd58] sm:$0xff]  }
 0x334   : > { %v11948_v12 = vpop.f32.mrb[45].mxu1  ;;  %12257 = vmatprep.subr.bf16.mxu0 %v13605_v3  ;;  %v7922_v3 = vrot.slane %v15184_v23, 1  ;;  %v13634_v23 = vld [vmem:[%s17151_s2 + $0xd60] sm:$0xff]  }
 0x335   : > { %v11949_v15 = vadd.f32 %v11948_v12, %v11947_v43  ;;  %v11950_v16 = vpop.f32.mrb[46].mxu1  ;;  %v13632_v43 = vld [vmem:[%s17151_s2 + $0xcc8] sm:$0xff]   ;;  %v13636_v12 = vld [vmem:[%s17151_s2 + $0xcd0] sm:$0xff]  }
 0x336   : > { %12211 = vmatpush3.bf16.msra.mxu1 %v13604_v7  ;;  %v11951_v56 = vpop.f32.mrb[47].mxu1  ;;  %v13631_v7 = vld [vmem:[%s17151_s2 + $0xd08] sm:$0xff]   ;;  %v13639_v16 = vld [vmem:[%s17151_s2 + $0xd18] sm:$0xff]  }
 0x337   : > { %v5718_v24 = vadd.f32 %v11949_v15, %v5678_v30  ;;  %12258 = vmatpush3.bf16.msra.mxu0 %v13606_v11  ;;  %12212 = vmatprep.subr.bf16.mxu1 %v13607_v9  ;;  %v13614_v30 = vld [vmem:[%s17151_s2 + $0xc70] sm:$0xff]   ;;  %v13633_v11 = vld [vmem:[%s17151_s2 + $0xda0] sm:$0xff]   ;;  %v13638_v15 = vld [vmem:[%s17151_s2 + $0xd68] sm:$0xff]  }
 0x338   : > { %12259 = vmatprep.subr.bf16.mxu0 %v13609_v13  ;;  %v13635_v9 = vld [vmem:[%s17151_s2 + $0xd10] sm:$0xff]   ;;  %v13637_v13 = vld [vmem:[%s17151_s2 + $0xda8] sm:$0xff]  }
 0x339   : > { %v11969_v20 = vpop.f32.mrb[48].mxu0 }
 0x33a   : > { %12213 = vmatpush3.bf16.msra.mxu1 %v13608_v19  ;;  %v11970_v27 = vpop.f32.mrb[49].mxu0  ;;  %v13641_v19 = vld [vmem:[%s17151_s2 + $0xdb0] sm:$0xff]  }
 0x33b   : > { %v11971_v42 = vadd.f32 %v11970_v27, %v11969_v20  ;;  %12260 = vmatpush3.bf16.msra.mxu0 %v13610_v22  ;;  %12214 = vmatprep.subr.bf16.mxu1 %v13611_v14  ;;  %v11972_v8 = vpop.f32.mrb[50].mxu0  ;;  %v13642_v20 = vld [vmem:[%s17151_s2 + $0xd70] sm:$0xff]   ;;  %v13643_v27 = vld [vmem:[%s17151_s2 + $0xd20] sm:$0xff]  }
 0x33c   : > { %12261 = vmatprep.subr.bf16.mxu0 %v13613_v41  ;;  %v11973_v32 = vpop.f32.mrb[51].mxu0  ;;  %v13646_v8 = vld [vmem:[%s17151_s2 + $0xd78] sm:$0xff]  }
 0x33d   : > { %v16490_v33 = vadd.f32 %v11971_v42, %v5718_v24  ;;  %v13640_v24 = vld [vmem:[%s17151_s2 + $0xcd8] sm:$0xff]   ;;  %v13649_v32 = vld [vmem:[%s17151_s2 + $0xe80] sm:$0xff]  }
 0x33e   : > { %12215 = vmatpush3.bf16.msra.mxu1 %v13612_v54  ;;  %v13645_v42 = vld [vmem:[%s17151_s2 + $0xdb8] sm:$0xff]  }
 0x33f   : > { %12262 = vmatpush3.bf16.msra.mxu0 %v13614_v30  ;;  %12537 = vmatprep.subr.bf16.mxu1 %v13811_v26  ;;  %v13644_v30 = vld [vmem:[%s17151_s2 + $0xce0] sm:$0xff]  }
 0x340   : > { %12263 = vmatprep.subr.bf16.mxu0 %v13616_v36  ;;  %v13647_v36 = vld [vmem:[%s17151_s2 + $0xd28] sm:$0xff]  }
 0x341   : > { %7414 = vmatmul.mubr.bf16.vlgmr.msra.gmra.mrb[72].mxu1 %v15788_v47 }
 0x342   : > { %12538 = vmatpush3.bf16.msra.mxu1 %v13615_v35  ;;  %12545 = vmatprep.mubr.msk.bf16.mxu1 %vm13812_vm0, %v13811_v26  ;;  %v13648_v35 = vld [vmem:[%s17151_s2 + $0xce8] sm:$0xff]  }
 0x343   : > { %12264 = vmatpush3.bf16.msra.mxu0 %v13617_v45  ;;  %12539 = vmatprep.subr.bf16.mxu1 %v13811_v26  ;;  %v13650_v45 = vld [vmem:[%s17151_s2 + $0xe40] sm:$0xff]  }
 0x344   : > { %12293 = vmatprep.subr.bf16.mxu0 %v13619_v46  ;;  %v7923_v46 = vrot.slane %v15284_v61, 1  ;;  %v13654_v61 = vld [vmem:[%s17151_s2 + $0xe48] sm:$0xff]  }
 0x346   : > { %12540 = vmatpush3.bf16.msra.mxu1 %v13618_v48  ;;  %9180 = vmatmul.mubr.bf16.vlgmr.msra.gmra.mrb[76].mxu0 %v7919_v53  ;;  %v7928_v48 = vrot.slane %v15309_v4, 1  ;;  %v13651_v53 = vld [vmem:[%s17151_s2 + $0xd30] sm:$0xff]   ;;  %v13655_v4 = vld [vmem:[%s17151_s2 + $0xd38] sm:$0xff]  }
 0x347   : > { %12294 = vmatpush3.bf16.msra.mxu0 %v13620_v40  ;;  %9259 = vmatprep.mubr.bf16.mxu0 %v7924_v49  ;;  %v13653_v40 = vld [vmem:[%s17151_s2 + $0xe88] sm:$0xff]   ;;  %v13652_v49 = vld [vmem:[%s17151_s2 + $0xcf0] sm:$0xff]  }
 0x348   : > { %12541 = vmatprep.subr.bf16.mxu1 %v13811_v26  ;;  %12295 = vmatprep.subr.bf16.mxu0 %v13622_v51  ;;  %v13657_v51 = vld [vmem:[%s17151_s2 + $0xe90] sm:$0xff]  }
 0x34a   : > { %12542 = vmatpush3.bf16.msra.mxu1 %v13621_v21  ;;  %v13656_v21 = vld [vmem:[%s17151_s2 + $0xcf8] sm:$0xff]  }
 0x34b   : > { %12296 = vmatpush3.bf16.msra.mxu0 %v13623_v52  ;;  %12543 = vmatprep.subr.bf16.mxu1 %v13811_v26  ;;  %v13658_v52 = vld [vmem:[%s17151_s2 + $0xe50] sm:$0xff]  }
 0x34c   : > { %12297 = vmatprep.subr.bf16.mxu0 %v13625_v25  ;;  %v13659_v25 = vld [vmem:[%s17151_s2 + $0xe00] sm:$0xff]  }
 0x34e   : > { %12544 = vmatpush3.bf16.msra.mxu1 %v13624_v58  ;;  %v13661_v58 = vld [vmem:[%s17151_s2 + $0xe98] sm:$0xff]  }
 0x34f   : > { %12298 = vmatpush3.bf16.msra.mxu0 %v13626_v62  ;;  %12271 = vmatprep.subr.bf16.mxu1 %v13627_v0  ;;  %v13660_v62 = vld [vmem:[%s17151_s2 + $0xdc0] sm:$0xff]   ;;  %v7921_v0 = vrot.slane %v15280_v60, 1  ;;  %v13664_v60 = vld [vmem:[%s17151_s2 + $0xdc8] sm:$0xff]  }
 0x350   : > { %12299 = vmatprep.subr.bf16.mxu0 %v13629_v38  ;;  %v13662_v38 = vld [vmem:[%s17151_s2 + $0xe58] sm:$0xff]  }
 0x351   : > { %12546 = vmatmul.mubr.msk.bf16.vlgmr.msra.gmra.mrb[48].mxu1 %vm5279_vm1, %v15877_v57 }
 0x352   : > { %12272 = vmatpush3.bf16.msra.mxu1 %v13628_v10  ;;  %9219 = vmatprep.mubr.bf16.mxu1 %v7922_v3  ;;  %v13663_v10 = vld [vmem:[%s17151_s2 + $0xe08] sm:$0xff]   ;;  %v13665_v3 = vld [vmem:[%s17151_s2 + $0xea0] sm:$0xff]  }
 0x353   : > { %12300 = vmatpush3.bf16.msra.mxu0 %v13630_v50  ;;  %12273 = vmatprep.subr.bf16.mxu1 %v13631_v7  ;;  %v7926_v50 = vrot.slane %v15303_v1, 1  ;;  %v13666_v7 = vld [vmem:[%s17151_s2 + $0xe60] sm:$0xff]   ;;  %v13667_v1 = vld [vmem:[%s17151_s2 + $0xe10] sm:$0xff]  }
 0x354   : > { %12301 = vmatprep.subr.bf16.mxu0 %v13633_v11 }
 0x356   : > { %12274 = vmatpush3.bf16.msra.mxu1 %v13632_v43  ;;  %v13669_v43 = vld [vmem:[%s17151_s2 + $0xea8] sm:$0xff]  }
 0x357   : > { %12302 = vmatpush3.bf16.msra.mxu0 %v13634_v23  ;;  %12275 = vmatprep.subr.bf16.mxu1 %v13635_v9 }
 0x358   : > { %12303 = vmatprep.subr.bf16.mxu0 %v13637_v13  ;;  %v13668_v13 = vld [vmem:[%s17151_s2 + $0xdd0] sm:$0xff]  }
 0x359   : > { %v12018_v56 = vpop.f32.mrb[52].mxu0 }
 0x35a   : > { %12276 = vmatpush3.bf16.msra.mxu1 %v13636_v12  ;;  %v12019_v22 = vpop.f32.mrb[53].mxu0 }
 0x35b   : > { %v16582_v14 = vadd.f32 %v12019_v22, %v12018_v56  ;;  %v12021_v41 = vpop.f32.mrb[54].mxu0  ;;  %12304 = vmatpush3.bf16.msra.mxu0 %v13638_v15  ;;  %12277 = vmatprep.subr.bf16.mxu1 %v13639_v16  ;;  %v13670_v16 = vld [vmem:[%s17151_s2 + $0xe68] sm:$0xff]   ;;  %v13673_v22 = vld [vmem:[%s17151_s2 + $0xeb0] sm:$0xff]  }
 0x35c   : > { %v12022_v54 = vpop.f32.mrb[55].mxu0  ;;  %12305 = vmatprep.subr.bf16.mxu0 %v13641_v19  ;;  %v13671_v19 = vld [vmem:[%s17151_s2 + $0xe18] sm:$0xff]  }
 0x35e   : > { %12278 = vmatpush3.bf16.msra.mxu1 %v13640_v24 }
 0x35f   : > { %12306 = vmatpush3.bf16.msra.mxu0 %v13642_v20  ;;  %12279 = vmatprep.subr.bf16.mxu1 %v13643_v27  ;;  %v13672_v20 = vld [vmem:[%s17151_s2 + $0xdd8] sm:$0xff]  }
 0x360   : > { %12307 = vmatprep.subr.bf16.mxu0 %v13645_v42 }
 0x362   : > { %12280 = vmatpush3.bf16.msra.mxu1 %v13644_v30  ;;  %v13675_v30 = vld [vmem:[%s17151_s2 + $0xe20] sm:$0xff]  }
 0x363   : > { %12308 = vmatpush3.bf16.msra.mxu0 %v13646_v8  ;;  %12281 = vmatprep.subr.bf16.mxu1 %v13647_v36  ;;  %v13676_v36 = vld [vmem:[%s17151_s2 + $0xde0] sm:$0xff]  }
 0x364   : > { %12337 = vmatprep.subr.bf16.mxu0 %v13649_v32  ;;  %v13678_v32 = vld [vmem:[%s17151_s2 + $0xe78] sm:$0xff]  }
 0x366   : > { %12282 = vmatpush3.bf16.msra.mxu1 %v13648_v35  ;;  %9260 = vmatmul.mubr.bf16.vlgmr.msra.gmra.mrb[80].mxu0 %v7923_v46  ;;  %v13679_v35 = vld [vmem:[%s17151_s2 + $0xe28] sm:$0xff]  }
 0x367   : > { %12338 = vmatpush3.bf16.msra.mxu0 %v13650_v45  ;;  %9339 = vmatprep.mubr.bf16.mxu0 %v7928_v48  ;;  %v13681_v45 = vld [vmem:[%s17151_s2 + $0xf80] sm:$0xff]   ;;  %v13680_v46 = vld [vmem:[%s17151_s2 + $0xde8] sm:$0xff]  }
 0x368   : > { %12283 = vmatprep.subr.bf16.mxu1 %v13651_v53  ;;  %12339 = vmatprep.subr.bf16.mxu0 %v13653_v40  ;;  %v13682_v48 = vld [vmem:[%s17151_s2 + $0xf40] sm:$0xff]   ;;  %v7927_v53 = vrot.slane %v15397_v39, 1  ;;  %v13683_v40 = vld [vmem:[%s17151_s2 + $0xe30] sm:$0xff]   ;;  %v13686_v39 = vld [vmem:[%s17151_s2 + $0xf48] sm:$0xff]  }
 0x36a   : > { %12284 = vmatpush3.bf16.msra.mxu1 %v13652_v49  ;;  %v13685_v49 = vld [vmem:[%s17151_s2 + $0xf88] sm:$0xff]  }
 0x36b   : > { %12340 = vmatpush3.bf16.msra.mxu0 %v13654_v61  ;;  %12285 = vmatprep.subr.bf16.mxu1 %v13655_v4  ;;  %v7932_v61 = vrot.slane %v15432_v63, 1  ;;  %v13684_v4 = vld [vmem:[%s17151_s2 + $0xdf0] sm:$0xff]  }
 0x36c   : > { %12341 = vmatprep.subr.bf16.mxu0 %v13657_v51  ;;  %v13687_v51 = vld [vmem:[%s17151_s2 + $0xe38] sm:$0xff]   ;;  %v13689_v63 = vld [vmem:[%s17151_s2 + $0xf90] sm:$0xff]  }
 0x36e   : > { %12286 = vmatpush3.bf16.msra.mxu1 %v13656_v21  ;;  %v13688_v21 = vld [vmem:[%s17151_s2 + $0xdf8] sm:$0xff]  }
 0x36f   : > { %12342 = vmatpush3.bf16.msra.mxu0 %v13658_v52  ;;  %12315 = vmatprep.subr.bf16.mxu1 %v13659_v25  ;;  %v13690_v52 = vld [vmem:[%s17151_s2 + $0xf50] sm:$0xff]   ;;  %v13691_v25 = vld [vmem:[%s17151_s2 + $0xf00] sm:$0xff]  }
 0x370   : > { %12343 = vmatprep.subr.bf16.mxu0 %v13661_v58  ;;  %v13693_v58 = vld [vmem:[%s17151_s2 + $0xf98] sm:$0xff]  }
 0x371   : > { %9220 = vmatmul.mubr.bf16.vlgmr.msra.gmra.mrb[76].mxu1 %v7921_v0  ;;  %v7925_v0 = vrot.slane %v15393_v44, 1  ;;  %v13696_v44 = vld [vmem:[%s17151_s2 + $0xec8] sm:$0xff]  }
 0x372   : > { %12316 = vmatpush3.bf16.msra.mxu1 %v13660_v62  ;;  %9299 = vmatprep.mubr.bf16.mxu1 %v7926_v50  ;;  %v13692_v62 = vld [vmem:[%s17151_s2 + $0xec0] sm:$0xff]   ;;  %v7930_v50 = vrot.slane %v15427_v59, 1  ;;  %v13699_v59 = vld [vmem:[%s17151_s2 + $0xf10] sm:$0xff]  }
 0x373   : > { %12344 = vmatpush3.bf16.msra.mxu0 %v13662_v38  ;;  %12317 = vmatprep.subr.bf16.mxu1 %v13663_v10  ;;  %v13694_v38 = vld [vmem:[%s17151_s2 + $0xf58] sm:$0xff]   ;;  %v13695_v10 = vld [vmem:[%s17151_s2 + $0xf08] sm:$0xff]  }
 0x374   : > { %v11996_v11 = vpop.f32.mrb[52].mxu1  ;;  %12345 = vmatprep.subr.bf16.mxu0 %v13665_v3  ;;  %v13697_v3 = vld [vmem:[%s17151_s2 + $0xfa0] sm:$0xff]  }
 0x375   : > { %v11997_v23 = vpop.f32.mrb[53].mxu1 }
 0x376   : > { %v11998_v9 = vadd.f32 %v11997_v23, %v11996_v11  ;;  %v11999_v12 = vpop.f32.mrb[54].mxu1  ;;  %12318 = vmatpush3.bf16.msra.mxu1 %v13664_v60  ;;  %v13698_v60 = vld [vmem:[%s17151_s2 + $0xf60] sm:$0xff]  }
 0x377   : > { %v12000_v15 = vpop.f32.mrb[55].mxu1  ;;  %12346 = vmatpush3.bf16.msra.mxu0 %v13666_v7  ;;  %12319 = vmatprep.subr.bf16.mxu1 %v13667_v1  ;;  %v13701_v1 = vld [vmem:[%s17151_s2 + $0xfa8] sm:$0xff]  }
 0x378   : > { %v12583_v56 = vadd.f32 %v11998_v9, %v16490_v33  ;;  %12347 = vmatprep.subr.bf16.mxu0 %v13669_v43  ;;  %v13674_v33 = vld [vmem:[%s17151_s2 + $0xe70] sm:$0xff]   ;;  %v13703_v15 = vld [vmem:[%s17151_s2 + $0xf18] sm:$0xff]  }
 0x379   : > { %v12062_v24 = vpop.f32.mrb[56].mxu0  ;;  %v13700_v9 = vld [vmem:[%s17151_s2 + $0xed0] sm:$0xff]  }
 0x37a   : > { %12320 = vmatpush3.bf16.msra.mxu1 %v13668_v13  ;;  %v12063_v41 = vpop.f32.mrb[57].mxu0  ;;  %v16686_v27 = vadd.f32 %v12583_v56, %v16582_v14  ;;  %v13677_v14 = vld [vmem:[%s17151_s2 + $0xeb8] sm:$0xff]   ;;  %v13702_v13 = vld [vmem:[%s17151_s2 + $0xf68] sm:$0xff]  }
 0x37b   : > { %v16688_v54 = vadd.f32 %v12063_v41, %v12062_v24  ;;  %v12065_v42 = vpop.f32.mrb[58].mxu0  ;;  %12348 = vmatpush3.bf16.msra.mxu0 %v13670_v16  ;;  %12321 = vmatprep.subr.bf16.mxu1 %v13671_v19  ;;  %v13705_v19 = vld [vmem:[%s17151_s2 + $0xfb0] sm:$0xff]   ;;  %v13704_v24 = vld [vmem:[%s17151_s2 + $0xed8] sm:$0xff]  }
 0x37c   : > { %v12066_v8 = vpop.f32.mrb[59].mxu0  ;;  %12349 = vmatprep.subr.bf16.mxu0 %v13673_v22 }
 0x37d   : > { %v13708_v8 = vld [vmem:[%s17151_s2 + $0xee0] sm:$0xff]  }
 0x37e   : > { %12322 = vmatpush3.bf16.msra.mxu1 %v13672_v20 }
 0x37f   : > { %12350 = vmatpush3.bf16.msra.mxu0 %v13674_v33  ;;  %12323 = vmatprep.subr.bf16.mxu1 %v13675_v30  ;;  %v13707_v33 = vld [vmem:[%s17151_s2 + $0xf20] sm:$0xff]  }
 0x380   : > { %12351 = vmatprep.subr.bf16.mxu0 %v13677_v14  ;;  %v13710_v14 = vld [vmem:[%s17151_s2 + $0xf78] sm:$0xff]  }
 0x382   : > { %12324 = vmatpush3.bf16.msra.mxu1 %v13676_v36  ;;  %v13711_v36 = vld [vmem:[%s17151_s2 + $0xf28] sm:$0xff]  }
 0x383   : > { %12352 = vmatpush3.bf16.msra.mxu0 %v13678_v32  ;;  %12325 = vmatprep.subr.bf16.mxu1 %v13679_v35  ;;  %v13713_v32 = vld [vmem:[%s17151_s2 + $0x1080] sm:$0xff]   ;;  %v13712_v35 = vld [vmem:[%s17151_s2 + $0xee8] sm:$0xff]  }
 0x384   : > { %12381 = vmatprep.subr.bf16.mxu0 %v13681_v45  ;;  %v13714_v45 = vld [vmem:[%s17151_s2 + $0x1040] sm:$0xff]  }
 0x386   : > { %12326 = vmatpush3.bf16.msra.mxu1 %v13680_v46  ;;  %9340 = vmatmul.mubr.bf16.vlgmr.msra.gmra.mrb[84].mxu0 %v7927_v53  ;;  %v7931_v46 = vrot.slane %v15523_v5, 1  ;;  %v13717_v53 = vld [vmem:[%s17151_s2 + $0x1088] sm:$0xff]  }
 0x387   : > { %12382 = vmatpush3.bf16.msra.mxu0 %v13682_v48  ;;  %9419 = vmatprep.mubr.bf16.mxu0 %v7932_v61  ;;  %v13715_v48 = vld [vmem:[%s17151_s2 + $0xf30] sm:$0xff]   ;;  %v13718_v5 = vld [vmem:[%s17151_s2 + $0x1048] sm:$0xff]   ;;  %v13719_v61 = vld [vmem:[%s17151_s2 + $0xf38] sm:$0xff]  }
 0x388   : > { %12327 = vmatprep.subr.bf16.mxu1 %v13683_v40  ;;  %12383 = vmatprep.subr.bf16.mxu0 %v13685_v49  ;;  %v7936_v40 = vrot.slane %v15615_v17, 1  ;;  %v13716_v49 = vld [vmem:[%s17151_s2 + $0xef0] sm:$0xff]  }
 0x389   : > { %v13721_v17 = vld [vmem:[%s17151_s2 + $0x1090] sm:$0xff]  }
 0x38a   : > { %12328 = vmatpush3.bf16.msra.mxu1 %v13684_v4  ;;  %v13720_v4 = vld [vmem:[%s17151_s2 + $0xef8] sm:$0xff]  }
 0x38b   : > { %12384 = vmatpush3.bf16.msra.mxu0 %v13686_v39  ;;  %12329 = vmatprep.subr.bf16.mxu1 %v13687_v51  ;;  %v13722_v39 = vld [vmem:[%s17151_s2 + $0x1050] sm:$0xff]   ;;  %v13723_v51 = vld [vmem:[%s17151_s2 + $0x1000] sm:$0xff]  }
 0x38c   : > { %12385 = vmatprep.subr.bf16.mxu0 %v13689_v63  ;;  %v13725_v63 = vld [vmem:[%s17151_s2 + $0x1098] sm:$0xff]  }
 0x38e   : > { %12330 = vmatpush3.bf16.msra.mxu1 %v13688_v21  ;;  %v13724_v21 = vld [vmem:[%s17151_s2 + $0xfc0] sm:$0xff]  }
 0x38f   : > { %12386 = vmatpush3.bf16.msra.mxu0 %v13690_v52  ;;  %12359 = vmatprep.subr.bf16.mxu1 %v13691_v25  ;;  %v7929_v52 = vrot.slane %v15519_v31, 1  ;;  %v13726_v25 = vld [vmem:[%s17151_s2 + $0x1058] sm:$0xff]   ;;  %v13728_v31 = vld [vmem:[%s17151_s2 + $0xfc8] sm:$0xff]  }
 0x390   : > { %12387 = vmatprep.subr.bf16.mxu0 %v13693_v58  ;;  %v13727_v58 = vld [vmem:[%s17151_s2 + $0x1008] sm:$0xff]  }
 0x391   : > { %9300 = vmatmul.mubr.bf16.vlgmr.msra.gmra.mrb[80].mxu1 %v7925_v0  ;;  %v13729_v0 = vld [vmem:[%s17151_s2 + $0x10a0] sm:$0xff]  }
 0x392   : > { %12360 = vmatpush3.bf16.msra.mxu1 %v13692_v62  ;;  %9379 = vmatprep.mubr.bf16.mxu1 %v7930_v50  ;;  %v7934_v62 = vrot.slane %v15527_v34, 1  ;;  %v13731_v34 = vld [vmem:[%s17151_s2 + $0x1010] sm:$0xff]   ;;  %v13733_v50 = vld [vmem:[%s17151_s2 + $0x10a8] sm:$0xff]  }
 0x393   : > { %12388 = vmatpush3.bf16.msra.mxu0 %v13694_v38  ;;  %12361 = vmatprep.subr.bf16.mxu1 %v13695_v10  ;;  %v13730_v38 = vld [vmem:[%s17151_s2 + $0x1060] sm:$0xff]  }
 0x394   : > { %v12040_v7 = vpop.f32.mrb[56].mxu1  ;;  %12389 = vmatprep.subr.bf16.mxu0 %v13697_v3 }
 0x395   : > { %v12041_v11 = vpop.f32.mrb[57].mxu1 }
 0x396   : > { %v12042_v43 = vadd.f32 %v12041_v11, %v12040_v7  ;;  %v12043_v23 = vpop.f32.mrb[58].mxu1  ;;  %12362 = vmatpush3.bf16.msra.mxu1 %v13696_v44  ;;  %v13735_v11 = vld [vmem:[%s17151_s2 + $0x1018] sm:$0xff]  }
 0x397   : > { %v12044_v12 = vpop.f32.mrb[59].mxu1  ;;  %12390 = vmatpush3.bf16.msra.mxu0 %v13698_v60  ;;  %12363 = vmatprep.subr.bf16.mxu1 %v13699_v59  ;;  %v13732_v59 = vld [vmem:[%s17151_s2 + $0xfd0] sm:$0xff]  }
 0x398   : > { %v12585_v16 = vadd.f32 %v16686_v27, %v12042_v43  ;;  %12391 = vmatprep.subr.bf16.mxu0 %v13701_v1  ;;  %v13706_v27 = vld [vmem:[%s17151_s2 + $0xf70] sm:$0xff]   ;;  %v13734_v1 = vld [vmem:[%s17151_s2 + $0x1068] sm:$0xff]  }
 0x399   : > { %v12106_v56 = vpop.f32.mrb[60].mxu0  ;;  %v13737_v23 = vld [vmem:[%s17151_s2 + $0x10b0] sm:$0xff]  }
 0x39a   : > { %12364 = vmatpush3.bf16.msra.mxu1 %v13700_v9  ;;  %v12107_v22 = vpop.f32.mrb[61].mxu0  ;;  %v16792_v41 = vadd.f32 %v12585_v16, %v16688_v54  ;;  %v13709_v54 = vld [vmem:[%s17151_s2 + $0xfb8] sm:$0xff]  }
 0x39b   : > { %v16794_v20 = vadd.f32 %v12107_v22, %v12106_v56  ;;  %v12109_v42 = vpop.f32.mrb[62].mxu0  ;;  %12392 = vmatpush3.bf16.msra.mxu0 %v13702_v13  ;;  %12365 = vmatprep.subr.bf16.mxu1 %v13703_v15  ;;  %v13736_v13 = vld [vmem:[%s17151_s2 + $0xfd8] sm:$0xff]   ;;  %v13738_v56 = vld [vmem:[%s17151_s2 + $0x1070] sm:$0xff]   ;;  %v13739_v22 = vld [vmem:[%s17151_s2 + $0x1020] sm:$0xff]  }
 0x39c   : > { %v12110_v30 = vpop.f32.mrb[63].mxu0  ;;  %12393 = vmatprep.subr.bf16.mxu0 %v13705_v19  ;;  %v13742_v42 = vld [vmem:[%s17151_s2 + $0x1078] sm:$0xff]  }
 0x39d   : > { %v13744_v30 = vld [vmem:[%s17151_s2 + $0xfe8] sm:$0xff]  }
 0x39e   : > { %12366 = vmatpush3.bf16.msra.mxu1 %v13704_v24 }
 0x39f   : > { %12394 = vmatpush3.bf16.msra.mxu0 %v13706_v27  ;;  %12367 = vmatprep.subr.bf16.mxu1 %v13707_v33  ;;  %v13743_v27 = vld [vmem:[%s17151_s2 + $0x1028] sm:$0xff]   ;;  %v13745_v33 = vld [vmem:[%s17151_s2 + $0x1180] sm:$0xff]  }
 0x3a0   : > { %12395 = vmatprep.subr.bf16.mxu0 %v13709_v54  ;;  %v13746_v54 = vld [vmem:[%s17151_s2 + $0x1140] sm:$0xff]  }
 0x3a2   : > { %12368 = vmatpush3.bf16.msra.mxu1 %v13708_v8  ;;  %v7935_v8 = vrot.slane %v15637_v29, 1  ;;  %v13750_v29 = vld [vmem:[%s17151_s2 + $0x1148] sm:$0xff]  }
 0x3a3   : > { %12396 = vmatpush3.bf16.msra.mxu0 %v13710_v14  ;;  %12369 = vmatprep.subr.bf16.mxu1 %v13711_v36  ;;  %v13747_v14 = vld [vmem:[%s17151_s2 + $0x1030] sm:$0xff]   ;;  %v13749_v36 = vld [vmem:[%s17151_s2 + $0x1188] sm:$0xff]  }
 0x3a4   : > { %12425 = vmatprep.subr.bf16.mxu0 %v13713_v32  ;;  %v7940_v32 = vrot.slane %v15790_v6, 1  ;;  %v13753_v6 = vld [vmem:[%s17151_s2 + $0x1190] sm:$0xff]  }
 0x3a6   : > { %12370 = vmatpush3.bf16.msra.mxu1 %v13712_v35  ;;  %9420 = vmatmul.mubr.bf16.vlgmr.msra.gmra.mrb[88].mxu0 %v7931_v46  ;;  %v13748_v35 = vld [vmem:[%s17151_s2 + $0xff0] sm:$0xff]   ;;  %v13752_v46 = vld [vmem:[%s17151_s2 + $0xff8] sm:$0xff]  }
 0x3a7   : > { %12426 = vmatpush3.bf16.msra.mxu0 %v13714_v45  ;;  %9499 = vmatprep.mubr.bf16.mxu0 %v7936_v40  ;;  %v13751_v45 = vld [vmem:[%s17151_s2 + $0x1038] sm:$0xff]  }
 0x3a8   : > { %12371 = vmatprep.subr.bf16.mxu1 %v13715_v48  ;;  %12427 = vmatprep.subr.bf16.mxu0 %v13717_v53  ;;  %v13754_v48 = vld [vmem:[%s17151_s2 + $0x1150] sm:$0xff]   ;;  %v13755_v53 = vld [vmem:[%s17151_s2 + $0x1100] sm:$0xff]   ;;  %v13757_v40 = vld [vmem:[%s17151_s2 + $0x1198] sm:$0xff]  }
 0x3aa   : > { %12372 = vmatpush3.bf16.msra.mxu1 %v13716_v49  ;;  %v13756_v49 = vld [vmem:[%s17151_s2 + $0x10c0] sm:$0xff]  }
 0x3ab   : > { %12428 = vmatpush3.bf16.msra.mxu0 %v13718_v5  ;;  %12373 = vmatprep.subr.bf16.mxu1 %v13719_v61  ;;  %v7933_v5 = vrot.slane %v15635_v28, 1  ;;  %v13758_v61 = vld [vmem:[%s17151_s2 + $0x1158] sm:$0xff]   ;;  %v13760_v28 = vld [vmem:[%s17151_s2 + $0x10c8] sm:$0xff]  }
 0x3ac   : > { %12429 = vmatprep.subr.bf16.mxu0 %v13721_v17  ;;  %v13759_v17 = vld [vmem:[%s17151_s2 + $0x1108] sm:$0xff]  }
 0x3ae   : > { %12374 = vmatpush3.bf16.msra.mxu1 %v13720_v4  ;;  %v7938_v4 = vrot.slane %v15642_v37, 1  ;;  %v13763_v37 = vld [vmem:[%s17151_s2 + $0x1110] sm:$0xff]  }
 0x3af   : > { %12430 = vmatpush3.bf16.msra.mxu0 %v13722_v39  ;;  %12403 = vmatprep.subr.bf16.mxu1 %v13723_v51  ;;  %v13761_v39 = vld [vmem:[%s17151_s2 + $0x11a0] sm:$0xff]  }
 0x3b0   : > { %12431 = vmatprep.subr.bf16.mxu0 %v13725_v63  ;;  %v13762_v51 = vld [vmem:[%s17151_s2 + $0x1160] sm:$0xff]  }
 0x3b1   : > { %9380 = vmatmul.mubr.bf16.vlgmr.msra.gmra.mrb[84].mxu1 %v7929_v52 }
 0x3b2   : > { %12404 = vmatpush3.bf16.msra.mxu1 %v13724_v21  ;;  %9459 = vmatprep.mubr.bf16.mxu1 %v7934_v62  ;;  %v13765_v21 = vld [vmem:[%s17151_s2 + $0x11a8] sm:$0xff]   ;;  %v13764_v62 = vld [vmem:[%s17151_s2 + $0x10d0] sm:$0xff]  }
 0x3b3   : > { %12432 = vmatpush3.bf16.msra.mxu0 %v13726_v25  ;;  %12405 = vmatprep.subr.bf16.mxu1 %v13727_v58 }
 0x3b4   : > { %v12084_v10 = vpop.f32.mrb[60].mxu1  ;;  %12433 = vmatprep.subr.bf16.mxu0 %v13729_v0 }
 0x3b5   : > { %v12085_v3 = vpop.f32.mrb[61].mxu1 }
 0x3b6   : > { %v12086_v44 = vadd.f32 %v12085_v3, %v12084_v10  ;;  %v12087_v60 = vpop.f32.mrb[62].mxu1  ;;  %12406 = vmatpush3.bf16.msra.mxu1 %v13728_v31  ;;  %v13766_v31 = vld [vmem:[%s17151_s2 + $0x1168] sm:$0xff]   ;;  %v13769_v10 = vld [vmem:[%s17151_s2 + $0x11b0] sm:$0xff]  }
 0x3b7   : > { %v12088_v7 = vpop.f32.mrb[63].mxu1  ;;  %12434 = vmatpush3.bf16.msra.mxu0 %v13730_v38  ;;  %12407 = vmatprep.subr.bf16.mxu1 %v13731_v34  ;;  %v13767_v38 = vld [vmem:[%s17151_s2 + $0x1118] sm:$0xff]  }
 0x3b8   : > { %v12587_v43 = vadd.f32 %v16792_v41, %v12086_v44  ;;  %12435 = vmatprep.subr.bf16.mxu0 %v13733_v50  ;;  %v13741_v41 = vld [vmem:[%s17151_s2 + $0x10b8] sm:$0xff]  }
 0x3b9   : > { %v12150_v9 = vpop.f32.mrb[64].mxu0  ;;  %v13768_v44 = vld [vmem:[%s17151_s2 + $0x10d8] sm:$0xff]  }
 0x3ba   : > { %12408 = vmatpush3.bf16.msra.mxu1 %v13732_v59  ;;  %v12151_v12 = vpop.f32.mrb[65].mxu0  ;;  %v16898_v15 = vadd.f32 %v12587_v43, %v16794_v20  ;;  %v13740_v20 = vld [vmem:[%s17151_s2 + $0xfe0] sm:$0xff]  }
 0x3bb   : > { %v16900_v16 = vadd.f32 %v12151_v12, %v12150_v9  ;;  %v12153_v19 = vpop.f32.mrb[66].mxu0  ;;  %12436 = vmatpush3.bf16.msra.mxu0 %v13734_v1  ;;  %12409 = vmatprep.subr.bf16.mxu1 %v13735_v11  ;;  %v13770_v1 = vld [vmem:[%s17151_s2 + $0x1170] sm:$0xff]   ;;  %v13771_v11 = vld [vmem:[%s17151_s2 + $0x1120] sm:$0xff]   ;;  %v13774_v12 = vld [vmem:[%s17151_s2 + $0x1178] sm:$0xff]  }
 0x3bc   : > { %v12154_v24 = vpop.f32.mrb[67].mxu0  ;;  %12437 = vmatprep.subr.bf16.mxu0 %v13737_v23  ;;  %v13773_v23 = vld [vmem:[%s17151_s2 + $0x11b8] sm:$0xff]   ;;  %v13772_v9 = vld [vmem:[%s17151_s2 + $0x10e0] sm:$0xff]   ;;  %v13776_v19 = vld [vmem:[%s17151_s2 + $0x10e8] sm:$0xff]  }
 0x3bd   : > { %v7939_v24 = vrot.slane %v15788_v47, 1  ;;  %v13779_v47 = vld [vmem:[%s17151_s2 + $0x1138] sm:$0xff]  }
 0x3be   : > { %12410 = vmatpush3.bf16.msra.mxu1 %v13736_v13  ;;  %v13775_v13 = vld [vmem:[%s17151_s2 + $0x1128] sm:$0xff]  }
 0x3bf   : > { %12438 = vmatpush3.bf16.msra.mxu0 %v13738_v56  ;;  %12411 = vmatprep.subr.bf16.mxu1 %v13739_v22  ;;  %v13777_v56 = vld [vmem:[%s17151_s2 + $0x1130] sm:$0xff]  }
 0x3c0   : > { %12439 = vmatprep.subr.bf16.mxu0 %v13741_v41  ;;  %v13813_v41 = vmov 0.0|0.0  }
 0x3c2   : > { %12412 = vmatpush3.bf16.msra.mxu1 %v13740_v20  ;;  %v9671_v20 = vld [vmem:[%s17153_s4 + $0x10] sm:$0xff] }
 0x3c3   : > { %12440 = vmatpush3.bf16.msra.mxu0 %v13742_v42  ;;  %12413 = vmatprep.subr.bf16.mxu1 %v13743_v27  ;;  %v9672_v42 = vld [vmem:[%s17153_s4 + $0x18] sm:$0xff]  ;;  %v13778_v27 = vld [vmem:[%s17151_s2 + $0x10f0] sm:$0xff]  }
 0x3c4   : > { %12469 = vmatprep.subr.bf16.mxu0 %v13745_v33  ;;  %v12581_v33 = vpack.c.bf16 %v9672_v42, %v9671_v20 }
 0x3c6   : > { %12414 = vmatpush3.bf16.msra.mxu1 %v13744_v30  ;;  %9500 = vmatmul.mubr.bf16.vlgmr.msra.gmra.mrb[92].mxu0 %v7935_v8  ;;  %v13780_v30 = vld [vmem:[%s17151_s2 + $0x10f8] sm:$0xff]   ;;  %v9668_v8 = vld [vmem:[%s17152_s3] sm:$0x3] }
 0x3c7   : > { %12470 = vmatpush3.bf16.msra.mxu0 %v13746_v54  ;;  %9579 = vmatprep.mubr.bf16.mxu0 %v7940_v32  ;;  %v13781_v54 = vld [vmem:[%s17151_s2 + $0x1200] sm:$0xff]   ;;  %v13783_v32 = vld [vmem:[%s17151_s2 + $0x1208] sm:$0xff]  }
 0x3c8   : > { %12415 = vmatprep.subr.bf16.mxu1 %v13747_v14  ;;  %12471 = vmatprep.subr.bf16.mxu0 %v13749_v36  ;;  %v13782_v14 = vld [vmem:[%s17151_s2 + $0x11c0] sm:$0xff]   ;;  %v7937_v36 = vrot.slane %v15739_v18, 1  ;;  %v13785_v18 = vld [vmem:[%s17151_s2 + $0x1210] sm:$0xff]  }
 0x3ca   : > { %12416 = vmatpush3.bf16.msra.mxu1 %v13748_v35  ;;  %v7942_v35 = vrot.slane %v15795_v55, 1  ;;  %v13786_v55 = vld [vmem:[%s17151_s2 + $0x11d0] sm:$0xff]  }
 0x3cb   : > { %12472 = vmatpush3.bf16.msra.mxu0 %v13750_v29  ;;  %12417 = vmatprep.subr.bf16.mxu1 %v13751_v45  ;;  %v13784_v29 = vld [vmem:[%s17151_s2 + $0x11c8] sm:$0xff]  }
 0x3cc   : > { %12473 = vmatprep.subr.bf16.mxu0 %v13753_v6 }
 0x3ce   : > { %12418 = vmatpush3.bf16.msra.mxu1 %v13752_v46 }
 0x3cf   : > { %12474 = vmatpush3.bf16.msra.mxu0 %v13754_v48  ;;  %12447 = vmatprep.subr.bf16.mxu1 %v13755_v53 }
 0x3d0   : > { %12475 = vmatprep.subr.bf16.mxu0 %v13757_v40  ;;  %v13787_v40 = vld [vmem:[%s17151_s2 + $0x1218] sm:$0xff]  }
 0x3d1   : > { %9460 = vmatmul.mubr.bf16.vlgmr.msra.gmra.mrb[88].mxu1 %v7933_v5 }
 0x3d2   : > { %12448 = vmatpush3.bf16.msra.mxu1 %v13756_v49  ;;  %9539 = vmatprep.mubr.bf16.mxu1 %v7938_v4 }
 0x3d3   : > { %12476 = vmatpush3.bf16.msra.mxu0 %v13758_v61  ;;  %12449 = vmatprep.subr.bf16.mxu1 %v13759_v17  ;;  %v13788_v17 = vld [vmem:[%s17151_s2 + $0x11d8] sm:$0xff]  }
 0x3d4   : > { %v12128_v63 = vpop.f32.mrb[64].mxu1  ;;  %12477 = vmatprep.subr.bf16.mxu0 %v13761_v39 }
 0x3d5   : > { %v12129_v52 = vpop.f32.mrb[65].mxu1 }
 0x3d6   : > { %v12130_v25 = vadd.f32 %v12129_v52, %v12128_v63  ;;  %v12131_v58 = vpop.f32.mrb[66].mxu1  ;;  %12450 = vmatpush3.bf16.msra.mxu1 %v13760_v28  ;;  %v13790_v63 = vld [vmem:[%s17151_s2 + $0x11e0] sm:$0xff]   ;;  %v13792_v52 = vld [vmem:[%s17151_s2 + $0x11e8] sm:$0xff]  }
 0x3d7   : > { %v12132_v0 = vpop.f32.mrb[67].mxu1  ;;  %12478 = vmatpush3.bf16.msra.mxu0 %v13762_v51  ;;  %12451 = vmatprep.subr.bf16.mxu1 %v13763_v37  ;;  %v13789_v51 = vld [vmem:[%s17151_s2 + $0x1220] sm:$0xff]   ;;  %v13794_v58 = vld [vmem:[%s17151_s2 + $0x11f0] sm:$0xff]  }
 0x3d8   : > { %v12589_v34 = vadd.f32 %v16898_v15, %v12130_v25  ;;  %12479 = vmatprep.subr.bf16.mxu0 %v13765_v21  ;;  %v9669_v15 = vld [vmem:[%s17153_s4] sm:$0xff]  ;;  %v13791_v21 = vld [vmem:[%s17151_s2 + $0x1228] sm:$0xff]   ;;  %v13793_v25 = vld [vmem:[%s17151_s2 + $0x1230] sm:$0xff]  }
 0x3d9   : > { %v12194_v50 = vpop.f32.mrb[68].mxu0  ;;  %v13796_v0 = vld [vmem:[%s17151_s2 + $0x11f8] sm:$0xff]  }
 0x3da   : > { %12452 = vmatpush3.bf16.msra.mxu1 %v13764_v62  ;;  %v12195_v3 = vpop.f32.mrb[69].mxu0  ;;  %v17004_v60 = vadd.f32 %v12589_v34, %v16900_v16  ;;  %v9670_v16 = vld [vmem:[%s17153_s4 + $0x8] sm:$0xff]  ;;  %v13795_v62 = vld [vmem:[%s17151_s2 + $0x1238] sm:$0xff]  }
 0x3db   : > { %v17006_v59 = vadd.f32 %v12195_v3, %v12194_v50  ;;  %v12197_v7 = vpop.f32.mrb[70].mxu0  ;;  %12480 = vmatpush3.bf16.msra.mxu0 %v13766_v31  ;;  %12453 = vmatprep.subr.bf16.mxu1 %v13767_v38  ;;  %v12578_v22 = vpack.c.bf16 %v9670_v16, %v9669_v15  ;;  %v13797_v31 = vld [vmem:[%s17151_s2 + $0x1240] sm:$0xff]   ;;  %v7941_v38 = vrot.slane %v15806_v2, 1  ;;  %v13798_v34 = vld [vmem:[%s17151_s2 + $0x1248] sm:$0xff]   ;;  %v13799_v2 = vld [vmem:[%s17151_s2 + $0x1250] sm:$0xff]  }
 0x3dc   : > { %v12198_v43 = vpop.f32.mrb[71].mxu0  ;;  %12481 = vmatprep.subr.bf16.mxu0 %v13769_v10 }
 0x3de   : > { %12454 = vmatpush3.bf16.msra.mxu1 %v13768_v44 }
 0x3df   : > { %12482 = vmatpush3.bf16.msra.mxu0 %v13770_v1  ;;  %12455 = vmatprep.subr.bf16.mxu1 %v13771_v11  ;;  %v13800_v11 = vld [vmem:[%s17151_s2 + $0x1258] sm:$0xff]  }
 0x3e0   : > { %12483 = vmatprep.subr.bf16.mxu0 %v13773_v23 }
 0x3e2   : > { %12456 = vmatpush3.bf16.msra.mxu1 %v13772_v9 }
 0x3e3   : > { %12484 = vmatpush3.bf16.msra.mxu0 %v13774_v12  ;;  %12457 = vmatprep.subr.bf16.mxu1 %v13775_v13  ;;  %v7943_v13 = vrot.slane %v15877_v57, 1 }
 0x3e4   : > { %12577 = vmatprep.subr.bf16.mxu0 %v13813_v41 }
 0x3e6   : > { %12458 = vmatpush3.bf16.msra.mxu1 %v13776_v19  ;;  %9580 = vmatmul.mubr.bf16.vlgmr.msra.gmra.mrb[96].mxu0 %v7939_v24 }
 0x3e7   : > { %12459 = vmatprep.subr.bf16.mxu1 %v13777_v56  ;;  %12579 = vmatpush3.bf16.msra.mxu0 %v12578_v22 }
 0x3e8   : > { %12580 = vmatprep.subr.bf16.mxu0 %v13813_v41  ;;  %12569 = vmatprep.mubr.msk.f32.mxu0 %vm13812_vm0, %v13811_v26 }
 0x3ea   : > { %12460 = vmatpush3.bf16.msra.mxu1 %v13778_v27 }
 0x3eb   : > { %12461 = vmatprep.subr.bf16.mxu1 %v13779_v47  ;;  %12582 = vmatpush3.bf16.msra.mxu0 %v12581_v33 }
 0x3ec   : > { %12572 = vmatprep.subr.mxu0 %v13811_v26 }
 0x3ee   : > { %12462 = vmatpush3.bf16.msra.mxu1 %v13780_v30  ;;  %12570 = vmatmul.mubr.msk.f32.vlgmr.msra.gmra.mrb[100].mxu0 %vm9673_vm2, %v9668_v8 }
 0x3ef   : > { %12491 = vmatprep.subr.bf16.mxu1 %v13781_v54  ;;  %12574 = vmatprep.mubr.msk.f32.mxu0 %vm13812_vm0, %v13811_v26 }
 0x3f1   : > { %9540 = vmatmul.mubr.bf16.vlgmr.msra.gmra.mrb[92].mxu1 %v7937_v36 }
 0x3f2   : > { %12492 = vmatpush3.bf16.msra.mxu1 %v13782_v14  ;;  %9619 = vmatprep.mubr.bf16.mxu1 %v7942_v35 }
 0x3f3   : > { %12493 = vmatprep.subr.bf16.mxu1 %v13783_v32 }
 0x3f4   : > { %v12172_v45 = vpop.f32.mrb[68].mxu1 }
 0x3f5   : > { %v12173_v6 = vpop.f32.mrb[69].mxu1 }
 0x3f6   : > { %v12174_v46 = vadd.f32 %v12173_v6, %v12172_v45  ;;  %v12175_v48 = vpop.f32.mrb[70].mxu1  ;;  %12494 = vmatpush3.bf16.msra.mxu1 %v13784_v29 }
 0x3f7   : > { %v12176_v53 = vpop.f32.mrb[71].mxu1  ;;  %12495 = vmatprep.subr.bf16.mxu1 %v13785_v18 }
 0x3f8   : > { %v12591_v49 = vadd.f32 %v17004_v60, %v12174_v46 }
 0x3f9   : > { %v12238_v5 = vpop.f32.mrb[72].mxu0 }
 0x3fa   : > { %12496 = vmatpush3.bf16.msra.mxu1 %v13786_v55  ;;  %v12239_v61 = vpop.f32.mrb[73].mxu0  ;;  %v12592_v4 = vadd.f32 %v12591_v49, %v17006_v59 }
 0x3fb   : > { %v12240_v39 = vadd.f32 %v12239_v61, %v12238_v5  ;;  %v12241_v28 = vpop.f32.mrb[74].mxu0  ;;  %12497 = vmatprep.subr.bf16.mxu1 %v13787_v40 }
 0x3fc   : > { %v12242_v37 = vpop.f32.mrb[75].mxu0 }
 0x3fe   : > { %12498 = vmatpush3.bf16.msra.mxu1 %v13788_v17 }
 0x3ff   : > { %12499 = vmatprep.subr.bf16.mxu1 %v13789_v51 }
 0x402   : > { %12500 = vmatpush3.bf16.msra.mxu1 %v13790_v63 }
 0x403   : > { %12501 = vmatprep.subr.bf16.mxu1 %v13791_v21 }
 0x406   : > { %12502 = vmatpush3.bf16.msra.mxu1 %v13792_v52 }
 0x407   : > { %12503 = vmatprep.subr.bf16.mxu1 %v13793_v25 }
 0x40a   : > { %12504 = vmatpush3.bf16.msra.mxu1 %v13794_v58 }
 0x40b   : > { %12505 = vmatprep.subr.bf16.mxu1 %v13795_v62 }
 0x40e   : > { %12506 = vmatpush3.bf16.msra.mxu1 %v13796_v0 }
 0x40f   : > { %12549 = vmatprep.subr.bf16.mxu1 %v13811_v26 }
 0x411   : > { %9620 = vmatmul.mubr.bf16.vlgmr.msra.gmra.mrb[96].mxu1 %v7941_v38 }
 0x412   : > { %12550 = vmatpush3.bf16.msra.mxu1 %v13797_v31  ;;  %12557 = vmatprep.mubr.msk.bf16.mxu1 %vm13812_vm0, %v13811_v26 }
 0x413   : > { %12551 = vmatprep.subr.bf16.mxu1 %v13811_v26 }
 0x414   : > { %v12216_v10 = vpop.f32.mrb[72].mxu1 }
 0x415   : > { %v12217_v50 = vpop.f32.mrb[73].mxu1 }
 0x416   : > { %v12218_v3 = vadd.f32 %v12217_v50, %v12216_v10  ;;  %v12219_v44 = vpop.f32.mrb[74].mxu1  ;;  %12552 = vmatpush3.bf16.msra.mxu1 %v13798_v34 }
 0x417   : > { %v12220_v60 = vpop.f32.mrb[75].mxu1  ;;  %12553 = vmatprep.subr.bf16.mxu1 %v13811_v26 }
 0x418   : > { %v12593_v59 = vadd.f32 %v12592_v4, %v12218_v3 }
 0x419   : > { %v12265_v7 = vpop.f32.mrb[76].mxu0 }
 0x41a   : > { %12554 = vmatpush3.bf16.msra.mxu1 %v13799_v2  ;;  %v12266_v1 = vpop.f32.mrb[77].mxu0  ;;  %v17133_v43 = vadd.f32 %v12593_v59, %v12240_v39 }
 0x41b   : > { %v12267_v23 = vadd.f32 %v12266_v1, %v12265_v7  ;;  %v12268_v9 = vpop.f32.mrb[78].mxu0  ;;  %12555 = vmatprep.subr.bf16.mxu1 %v13811_v26 }
 0x41c   : > { %v12269_v12 = vpop.f32.mrb[79].mxu0 }
 0x41e   : > { %12556 = vmatpush3.bf16.msra.mxu1 %v13800_v11 }
 0x421   : > { %12558 = vmatmul.mubr.msk.bf16.vlgmr.msra.gmra.mrb[48].mxu1 %vm5279_vm1, %v7943_v13 }
 0x439   : > { %v12309_v15 = vpop.f32.mrb[80].mxu0 }
 0x43a   : > { %v12310_v16 = vpop.f32.mrb[81].mxu0 }
 0x43b   : > { %v12311_v19 = vadd.f32 %v12310_v16, %v12309_v15  ;;  %v12312_v56 = vpop.f32.mrb[82].mxu0 }
 0x43c   : > { %v12313_v22 = vpop.f32.mrb[83].mxu0 }
 0x444   : > { %v12287_v24 = vpop.f32.mrb[76].mxu1 }
 0x445   : > { %v12288_v41 = vpop.f32.mrb[77].mxu1 }
 0x446   : > { %v12289_v20 = vadd.f32 %v12288_v41, %v12287_v24  ;;  %v12290_v42 = vpop.f32.mrb[78].mxu1  ;;  %v9749_v24 = vlaneseq }
 0x447   : > { %v12291_v27 = vpop.f32.mrb[79].mxu1 }
 0x448   : > { %v9222_v47 = vadd.f32 %v12289_v20, %v12267_v23  ;;  %v9750_v20 = vshrl.u32 %v9749_v24, 7 }
 0x44a   : > { %v9262_v33 = vadd.f32 %v12311_v19, %v9222_v47  ;;  %v9751_v42 = vsub.s32 0, %v9750_v20 }
 0x459   : > { %v12353_v30 = vpop.f32.mrb[84].mxu0 }
 0x45a   : > { %v12354_v26 = vpop.f32.mrb[85].mxu0 }
 0x45b   : > { %v12355_v54 = vadd.f32 %v12354_v26, %v12353_v30  ;;  %v12356_v8 = vpop.f32.mrb[86].mxu0 }
 0x45c   : > { %v12357_v14 = vpop.f32.mrb[87].mxu0 }
 0x464   : > { %v12331_v57 = vpop.f32.mrb[80].mxu1 }
 0x465   : > { %v12332_v36 = vpop.f32.mrb[81].mxu1 }
 0x466   : > { %v12333_v32 = vadd.f32 %v12332_v36, %v12331_v57  ;;  %v12334_v35 = vpop.f32.mrb[82].mxu1 }
 0x467   : > { %v12335_v29 = vpop.f32.mrb[83].mxu1 }
 0x468   : > { %v9302_v18 = vadd.f32 %v12333_v32, %v9262_v33 }
 0x46a   : > { %v9342_v45 = vadd.f32 %v12355_v54, %v9302_v18 }
 0x479   : > { %v12397_v6 = vpop.f32.mrb[88].mxu0 }
 0x47a   : > { %v12398_v46 = vpop.f32.mrb[89].mxu0 }
 0x47b   : > { %v12399_v48 = vadd.f32 %v12398_v46, %v12397_v6  ;;  %v12400_v55 = vpop.f32.mrb[90].mxu0 }
 0x47c   : > { %v12401_v53 = vpop.f32.mrb[91].mxu0 }
 0x484   : > { %v12375_v40 = vpop.f32.mrb[84].mxu1 }
 0x485   : > { %v12376_v49 = vpop.f32.mrb[85].mxu1 }
 0x486   : > { %v12377_v5 = vadd.f32 %v12376_v49, %v12375_v40  ;;  %v12378_v61 = vpop.f32.mrb[86].mxu1 }
 0x487   : > { %v12379_v17 = vpop.f32.mrb[87].mxu1 }
 0x488   : > { %v9382_v4 = vadd.f32 %v12377_v5, %v9342_v45 }
 0x48a   : > { %v9422_v39 = vadd.f32 %v12399_v48, %v9382_v4 }
 0x499   : > { %v12441_v28 = vpop.f32.mrb[92].mxu0 }
 0x49a   : > { %v12442_v51 = vpop.f32.mrb[93].mxu0 }
 0x49b   : > { %v12443_v37 = vadd.f32 %v12442_v51, %v12441_v28  ;;  %v12444_v63 = vpop.f32.mrb[94].mxu0 }
 0x49c   : > { %v12445_v21 = vpop.f32.mrb[95].mxu0 }
 0x4a4   : > { %v12419_v52 = vpop.f32.mrb[88].mxu1 }
 0x4a5   : > { %v12420_v25 = vpop.f32.mrb[89].mxu1 }
 0x4a6   : > { %v12421_v58 = vadd.f32 %v12420_v25, %v12419_v52  ;;  %v12422_v62 = vpop.f32.mrb[90].mxu1 }
 0x4a7   : > { %v12423_v0 = vpop.f32.mrb[91].mxu1 }
 0x4a8   : > { %v9462_v31 = vadd.f32 %v12421_v58, %v9422_v39 }
 0x4aa   : > { %v9502_v38 = vadd.f32 %v12443_v37, %v9462_v31 }
 0x4b9   : > { %v12485_v34 = vpop.f32.mrb[96].mxu0 }
 0x4ba   : > { %v12486_v10 = vpop.f32.mrb[97].mxu0 }
 0x4bb   : > { %v12487_v50 = vadd.f32 %v12486_v10, %v12485_v34  ;;  %v12488_v3 = vpop.f32.mrb[98].mxu0 }
 0x4bc   : > { %v12489_v44 = vpop.f32.mrb[99].mxu0 }
 0x4c1   : > { %v9743_v2 = vpop.f32.mrb[100].mxu0 }
 0x4c2   : > { %v12571_v60 = vpop.f32.mrb[101].mxu0  ;;  %v9752_v47 = vrot.slane %v9743_v2, %v9751_v42 }
 0x4c4   : > { %v12463_v59 = vpop.f32.mrb[92].mxu1 }
 0x4c5   : > { %v12464_v7 = vpop.f32.mrb[93].mxu1 }
 0x4c6   : > { %v12465_v1 = vadd.f32 %v12464_v7, %v12463_v59  ;;  %v12466_v11 = vpop.f32.mrb[94].mxu1 }
 0x4c7   : > { %v12467_v23 = vpop.f32.mrb[95].mxu1 }
 0x4c8   : > { %v9542_v9 = vadd.f32 %v12465_v1, %v9502_v38 }
 0x4ca   : > { %v9582_v12 = vadd.f32 %v12487_v50, %v9542_v9 }
 0x4e4   : > { %v12507_v13 = vpop.f32.mrb[96].mxu1 }
 0x4e5   : > { %v12508_v15 = vpop.f32.mrb[97].mxu1 }
 0x4e6   : > { %v12509_v16 = vadd.f32 %v12508_v15, %v12507_v13  ;;  %v12510_v19 = vpop.f32.mrb[98].mxu1 }
 0x4e7   : > { %v12511_v56 = vpop.f32.mrb[99].mxu1 }
 0x4e8   : > { %v9622_v22 = vadd.f32 %v12509_v16, %v9582_v12 }
 0x4ea   : > { %v12595_v41 = vadd.f32 %v17133_v43, %v9622_v22 }
 0x4f4   : > { %v9661_v27 = vpop.f32.mrb[48].mxu1 }
 0x4f5   : > { %v12596_v33 = vadd.f32 %v12595_v41, %v9661_v27  ;;  %v12559_v30 = vpop.f32.mrb[49].mxu1 }
 0x4f6   : > { %v9664_v26 = vpop.f32.mrb[50].mxu1 }
 0x4f7   : > { %v9748_v54 = vsel %vm9747_vm3, %v12596_v33, %v9743_v2  ;;  %v12560_v8 = vpop.f32.mrb[51].mxu1 }
 0x4f8   : > { %v9753_v14 = vsub.f32 %v9748_v54, %v9752_v47 }
 0x4fa   : > { %12573 = vmatpush3.xpose.msk.msra.mxu0 %vm9673_vm2, %v9753_v14 }
 0x4fd   : > { %12575 = vmatmul.mubr.msk.f32.vlgmr.msra.gmra.mrb[102].mxu0 %vm9673_vm2, %v9753_v14 }
 0x5d0   : > { %v9823_v57 = vpop.f32.mrb[102].mxu0 }
 0x5d1   : > { %v12576_v36 = vpop.f32.mrb[103].mxu0  ;;  %v9828_v32 = vrot.slane %v9823_v57, 1 }
 0x5d3   : > { %9829 = vrot.lane.b32.xlu0 %v9828_v32, %s13814_s26 }
 0x645   : > { %v9830_v43 = vpop.permute.xlu0 %9829 }
 0x646   : > { %v9832_v35 = vmul.f32 %v9830_v43, %v9823_v57 }
 0x648   : > { %v9833_v29 = vmax.f32 %v9832_v35, 1e-16 }
 0x64a   : > { %13801 = vrsqrt.f32 %v9833_v29 }
 0x654   : > { %v13802_v18 = vpop.eup %13801 }
 0x655   : > { %9836 = vrot.lane.b32.xlu0 %v13802_v18, %s13815_s27 }
 0x6c7   : > { %v9837_v45 = vpop.permute.xlu0 %9836 }
 0x6c8   : > { %v9839_v6 = vmul.f32 %v9837_v45, %v9823_v57 }
 0x6ca   : > { %9841 = vrot.lane.b32.xlu1 %v9839_v6, %s13814_s26 }
 0x73c   : > { %v9842_v46 = vpop.permute.xlu1 %9841 }
 0x73d   : > { %12605 = vpush %v9842_v46 }
 0x76e   : > { %s12606_s6 = spop %12605 }
 0x76f   : > { %v9844_v48 = vstv %s12606_s6 }
 0x770   : > { %9846 = vst [vmem:[%s222_s30] sm:$0xff] %v9844_v48 }
 0x771 PF: > { %s15_s18 = sadd.s32 1, %s13809_s18  }
 0x772   : > { %p12_p4 = scmp.ge.s32.totalorder %s15_s18, 4  }
 0x774   :  { %14 = sbr.rel (!%p12_p4) target bundleno = 1 (0x1), region = 72 }

</bundles_post_ra>
